<compile_context>
chip_gen: v6e
topology: v6e:2x2x1
jax: 0.10.0
libtpu: 0.0.40
codegen_flags: <defaults>
</compile_context>

<pallas_src>
import functools

import jax
import jax.numpy as jnp
from jax import lax
from jax.experimental import pallas as pl
from jax.experimental.pallas import tpu as pltpu


def _round_up(x, m):
    return (x + m - 1) // m * m


# --------------------------------------------------------------------------
# Fused per-layer Pallas kernel:
#     y   = W @ patches (+ bias) (+ residual)
#     out = act( batchnorm(y) )      (BN batch stats computed in-kernel)
# Layout: rows (sublanes) = output channels (padded to 8), lanes = B*H*W
# (padded to a multiple of 128).
# --------------------------------------------------------------------------
def fused_layer(w_p, patches_p, *, bias_p=None, gamma_p=None, beta_p=None,
                residual_p=None, act="none", m_valid=1, emit_raw=False,
                eps=1e-5):
    Cp, Kp = w_p.shape
    Kp2, Mp = patches_p.shape
    assert Kp2 == Kp

    use_bias = bias_p is not None
    use_bn = gamma_p is not None
    use_res = residual_p is not None

    inputs = [w_p, patches_p]
    if use_bias:
        inputs.append(bias_p)
    if use_bn:
        inputs.extend([gamma_p, beta_p])
    if use_res:
        inputs.append(residual_p)

    def kernel(*refs):
        it = iter(refs)
        w_ref = next(it)
        p_ref = next(it)
        b_ref = next(it) if use_bias else None
        g_ref = next(it) if use_bn else None
        bt_ref = next(it) if use_bn else None
        r_ref = next(it) if use_res else None
        raw_ref = next(it) if emit_raw else None
        o_ref = next(it)

        y = jnp.dot(w_ref[...], p_ref[...],
                    preferred_element_type=jnp.float32)
        if use_bias:
            y = y + b_ref[...]                       # (Cp,1) bcast over lanes
        if use_res:
            y = y + r_ref[...]
        if emit_raw:
            raw_ref[...] = y                         # pre-BN logits
        if use_bn:
            lane = lax.broadcasted_iota(jnp.int32, (Cp, Mp), 1)
            valid = lane < m_valid
            inv_m = 1.0 / float(m_valid)
            mean = jnp.sum(jnp.where(valid, y, 0.0), axis=1,
                           keepdims=True) * inv_m
            diff = jnp.where(valid, y - mean, 0.0)
            var = jnp.sum(diff * diff, axis=1, keepdims=True) * inv_m
            scale = g_ref[...] * lax.rsqrt(var + eps)
            y = (y - mean) * scale + bt_ref[...]
        if act == "relu":
            y = jnp.maximum(y, 0.0)
        elif act == "lrelu":
            y = jnp.where(y >= 0.0, y, 0.2 * y)
        elif act == "sigmoid":
            y = jax.nn.sigmoid(y)
        o_ref[...] = y

    def full_spec(a):
        return pl.BlockSpec(a.shape, lambda i, n=a.ndim: (0,) * n)

    n_out = 2 if emit_raw else 1
    out_shape = tuple(jax.ShapeDtypeStruct((Cp, Mp), jnp.float32)
                      for _ in range(n_out))
    out_specs = tuple(pl.BlockSpec((Cp, Mp), lambda i: (0, 0))
                      for _ in range(n_out))

    outs = pl.pallas_call(
        kernel,
        out_shape=out_shape,
        grid=(1,),
        in_specs=[full_spec(a) for a in inputs],
        out_specs=out_specs,
        compiler_params=pltpu.CompilerParams(
            dimension_semantics=("arbitrary",)),
    )(*inputs)
    if emit_raw:
        return outs[0], outs[1]
    return outs[0]


# --------------------------------------------------------------------------
# Conv / deconv layer = one patch-extraction op (XLA glue) + one fused kernel
# --------------------------------------------------------------------------
def conv_block(x_nchw, lp, *, emit_raw=False, residual_p=None):
    B = x_nchw.shape[0]
    kh, kw = lp["ksize"]
    pats = lax.conv_general_dilated_patches(
        x_nchw, (kh, kw), (lp["stride"], lp["stride"]),
        [(lp["pad"], lp["pad"]), (lp["pad"], lp["pad"])],
        lhs_dilation=lp["lhs_dilation"],
        dimension_numbers=("NCHW", "OIHW", "NCHW"))
    _, K, Ho, Wo = pats.shape
    M = B * Ho * Wo
    pats = jnp.transpose(pats, (1, 0, 2, 3)).reshape(K, M)   # (K, B*Ho*Wo)
    Kp = lp["w"].shape[1]
    Mp = _round_up(M, 128)
    pats_p = jnp.pad(pats, ((0, Kp - K), (0, Mp - M)))
    out = fused_layer(lp["w"], pats_p,
                      bias_p=lp.get("bias"),
                      gamma_p=lp.get("gamma"), beta_p=lp.get("beta"),
                      residual_p=residual_p, act=lp["act"],
                      m_valid=M, emit_raw=emit_raw)
    return out, (B, lp["cout"], Ho, Wo)


def cm_to_nchw(y_cm, B, C, H, W):
    """Channel-major padded layout (C_pad, M_pad) -> NCHW (valid region)."""
    return jnp.transpose(y_cm[:C, :B * H * W].reshape(C, B, H, W),
                         (1, 0, 2, 3))


# --------------------------------------------------------------------------
# Model pieces
# --------------------------------------------------------------------------
def encoder_like_forward(p, x_nchw):
    """Encoder / Discriminator: conv(s=2)+LReLU, 3x[conv(s=2)+BN+LReLU], FC."""
    B = x_nchw.shape[0]
    y_cm, sh = conv_block(x_nchw, p["conv0"])
    for m in p["mids"]:
        y_cm, sh = conv_block(cm_to_nchw(y_cm, *sh), m)
    assert sh[2] == 1 and sh[3] == 1       # image_res // 16 == 1 here
    fc = p["fc"]
    # 1x1 spatial: the channel-major block IS the flattened FC input per lane.
    h_p = jnp.pad(y_cm, ((0, fc["w"].shape[1] - y_cm.shape[0]), (0, 0)))
    return fused_layer(fc["w"], h_p, bias_p=fc.get("bias"), act="none",
                       m_valid=B)


def decoder_forward(p, z_cm_p, B):
    fc = p["fc"]
    h_cm = fused_layer(fc["w"], z_cm_p, gamma_p=fc["gamma"],
                       beta_p=fc["beta"], act="relu", m_valid=B)
    sh = (B, p["hd0"], 1, 1)
    for m in p["mids"]:
        h_cm, sh = conv_block(cm_to_nchw(h_cm, *sh), m)

    # crude ConvTranspose2d (+bias); the same kernel also emits
    # relu(refine.in_bn(logits)) as a second output.
    (logits_cm, t_cm), sh = conv_block(cm_to_nchw(h_cm, *sh), p["crude"],
                                       emit_raw=True)

    # refine = ResidualBlock(out_chan, refine_mid, out_chan), skip = Identity
    r = p["refine"]
    t_cm2, sh2 = conv_block(cm_to_nchw(t_cm, *sh), r["in_conv"])
    t_cm2, sh2 = conv_block(cm_to_nchw(t_cm2, *sh2), r["mid_conv"])
    refined_cm, sh_out = conv_block(cm_to_nchw(t_cm2, *sh2), r["out_conv"],
                                    residual_p=logits_cm)   # +skip, sigmoid
    x_refined = cm_to_nchw(refined_cm, *sh_out)
    return logits_cm, x_refined


# --------------------------------------------------------------------------
# Single fused loss-reduction kernel: KLD, MSE(sigmoid(logits), x) sum,
# BCEWithLogits(ds, 1) sum, L2(decoder.refine params).  3 scalars -> SMEM.
# --------------------------------------------------------------------------
def fused_losses(mom_cm, logits_cm, x_cm_p, ds_cm, l2_flat, *,
                 latent_dim, batch, img_channels, img_m, l2_coef):
    def kernel(mom_ref, lg_ref, x_ref, ds_ref, l2_ref, o_ref):
        mom = mom_ref[...]
        mean = mom[:latent_dim, :]
        logvar = mom[latent_dim:2 * latent_dim, :]
        bmask = lax.broadcasted_iota(jnp.int32, mean.shape, 1) < batch
        kterm = jnp.exp(logvar) + mean * mean - logvar - 1.0
        kld = 0.5 * jnp.sum(jnp.where(bmask, kterm, 0.0))

        lg = lg_ref[...]
        xv = x_ref[...]
        rmask = jnp.logical_and(
            lax.broadcasted_iota(jnp.int32, lg.shape, 0) < img_channels,
            lax.broadcasted_iota(jnp.int32, lg.shape, 1) < img_m)
        diff = jax.nn.sigmoid(lg) - xv
        reconst = jnp.sum(jnp.where(rmask, diff * diff, 0.0))

        ds = ds_ref[...]
        dmask = jnp.logical_and(
            lax.broadcasted_iota(jnp.int32, ds.shape, 0) < 1,
            lax.broadcasted_iota(jnp.int32, ds.shape, 1) < batch)
        t = -ds                                   # BCE(ds, 1) = softplus(-ds)
        softplus = jnp.maximum(t, 0.0) + jnp.log(1.0 + jnp.exp(-jnp.abs(t)))
        gen = jnp.sum(jnp.where(dmask, softplus, 0.0))

        l2v = l2_ref[...]
        l2 = jnp.sum(l2v * l2v)

        o_ref[0] = kld + reconst
        o_ref[1] = gen
        o_ref[2] = l2 * l2_coef

    inputs = [mom_cm, logits_cm, x_cm_p, ds_cm, l2_flat]
    in_specs = [pl.BlockSpec(a.shape, lambda i, n=a.ndim: (0,) * n)
                for a in inputs]
    return pl.pallas_call(
        kernel,
        out_shape=jax.ShapeDtypeStruct((3,), jnp.float32),
        grid=(1,),
        in_specs=in_specs,
        out_specs=pl.BlockSpec(memory_space=pltpu.MemorySpace.SMEM),
        compiler_params=pltpu.CompilerParams(
            dimension_semantics=("arbitrary",)),
    )(*inputs)


# --------------------------------------------------------------------------
# Full VAEGAN 'vae' forward
# --------------------------------------------------------------------------
def vaegan_vae_forward(params, x_nchw, noise_key, *, latent_dim=8,
                       l2_reg_coef=0.0005):
    x = x_nchw.astype(jnp.float32)
    B, C, H, W = x.shape

    # ---- encode ----
    mom_cm = encoder_like_forward(params["enc"], x)          # (2*latent, B)pad

    # reparameterization (RNG in JAX glue, torch.randn_like semantics)
    mean_cm = mom_cm[:latent_dim, :B]
    logvar_cm = mom_cm[latent_dim:2 * latent_dim, :B]
    e = jax.random.normal(noise_key, mean_cm.shape, jnp.float32)
    z_cm = e * jnp.exp(0.5 * logvar_cm) + mean_cm

    dec_fc_kp = params["dec"]["fc"]["w"].shape[1]
    z_cm_p = jnp.pad(z_cm, ((0, dec_fc_kp - latent_dim),
                            (0, _round_up(B, 128) - B)))

    # ---- decode ----
    logits_cm, x_refined = decoder_forward(params["dec"], z_cm_p, B)

    # ---- discriminator on the refined reconstruction ----
    ds_cm = encoder_like_forward(params["dis"], x_refined)

    # ---- fused loss reductions (single pallas_call) ----
    img_m = B * H * W
    x_cm = jnp.transpose(x, (1, 0, 2, 3)).reshape(C, img_m)
    x_cm_p = jnp.pad(x_cm, ((0, logits_cm.shape[0] - C),
                            (0, logits_cm.shape[1] - img_m)))
    losses = fused_losses(mom_cm, logits_cm, x_cm_p, ds_cm,
                          params["l2_flat"],
                          latent_dim=latent_dim, batch=B,
                          img_channels=C, img_m=img_m,
                          l2_coef=l2_reg_coef)
    return losses[0], losses[1], losses[2]


# --------------------------------------------------------------------------
# Parameter init: all weights / biases / BN affines are padded to the
# MXU-friendly layout ONCE here.
# --------------------------------------------------------------------------
def init_vaegan_params(key, *, in_chan=3, latent=8, image_res=16,
                       hidden=(8, 8, 8, 8), refine_mid=8):
    mult = image_res // 16
    assert mult == 1, "this kernel version handles image_res == 16"
    kit = iter(jax.random.split(key, 64))

    def nrm(shape, s=0.1):
        return s * jax.random.normal(next(kit), shape, jnp.float32)

    def pad_col(v, cp):
        return jnp.pad(v.reshape(-1, 1), ((0, cp - v.shape[0]), (0, 0)))

    def conv_lp(w_oihw, *, stride, pad, lhs_dilation=None, bias=None,
                gamma=None, beta=None, act="none"):
        cout, cin, kh, kw = w_oihw.shape
        K = cin * kh * kw
        Kp = _round_up(K, 128)
        Cp = _round_up(cout, 8)
        lp = {"w": jnp.pad(w_oihw.reshape(cout, K),
                           ((0, Cp - cout), (0, Kp - K))),
              "cout": cout, "ksize": (kh, kw), "stride": stride,
              "pad": pad, "lhs_dilation": lhs_dilation, "act": act}
        if bias is not None:
            lp["bias"] = pad_col(bias, Cp)
        if gamma is not None:
            lp["gamma"] = pad_col(gamma, Cp)
            lp["beta"] = pad_col(beta, Cp)
        return lp

    def fc_lp(w_oi, *, bias=None, gamma=None, beta=None):
        cout, K = w_oi.shape
        Kp = _round_up(K, 128)
        Cp = _round_up(cout, 8)
        lp = {"w": jnp.pad(w_oi, ((0, Cp - cout), (0, Kp - K))),
              "cout": cout}
        if bias is not None:
            lp["bias"] = pad_col(bias, Cp)
        if gamma is not None:
            lp["gamma"] = pad_col(gamma, Cp)
            lp["beta"] = pad_col(beta, Cp)
        return lp

    def deconv_to_oihw(w_iohw):
        # ConvTranspose2d(k=4, s=2, p=1) == Conv(s=1, p=2, lhs_dilation=2)
        # with channel-transposed, spatially-flipped kernel.
        return jnp.transpose(w_iohw, (1, 0, 2, 3))[:, :, ::-1, ::-1]

    def enc_like(out_dim):
        p = {"conv0": conv_lp(nrm((hidden[0], in_chan, 4, 4)), stride=2,
                              pad=1, bias=nrm((hidden[0],), 0.05),
                              act="lrelu"),
             "mids": []}
        for i in range(len(hidden) - 1):
            p["mids"].append(conv_lp(
                nrm((hidden[i + 1], hidden[i], 4, 4)), stride=2, pad=1,
                gamma=jnp.ones((hidden[i + 1],), jnp.float32),
                beta=jnp.zeros((hidden[i + 1],), jnp.float32),
                act="lrelu"))
        p["fc"] = fc_lp(nrm((out_dim, mult * mult * hidden[-1])),
                        bias=nrm((out_dim,), 0.05))
        return p

    # refine (ResidualBlock) raw parameters: needed both for the kernels and
    # for the L2 regularizer.
    in_conv_w = nrm((refine_mid, in_chan, 3, 3))
    mid_conv_w = nrm((refine_mid, refine_mid, 3, 3))
    out_conv_w = nrm((in_chan, refine_mid, 3, 3))
    in_bn_g = jnp.ones((in_chan,), jnp.float32)
    in_bn_b = jnp.zeros((in_chan,), jnp.float32)
    mid_bn_g = jnp.ones((refine_mid,), jnp.float32)
    mid_bn_b = jnp.zeros((refine_mid,), jnp.float32)
    out_bn_g = jnp.ones((refine_mid,), jnp.float32)
    out_bn_b = jnp.zeros((refine_mid,), jnp.float32)

    dec = {"hd0": hidden[0],
           "fc": fc_lp(nrm((mult * mult * hidden[0], latent)),
                       gamma=jnp.ones((hidden[0],), jnp.float32),
                       beta=jnp.zeros((hidden[0],), jnp.float32)),
           "mids": []}
    for i in range(len(hidden) - 1):
        dec["mids"].append(conv_lp(
            deconv_to_oihw(nrm((hidden[i], hidden[i + 1], 4, 4))),
            stride=1, pad=2, lhs_dilation=(2, 2),
            gamma=jnp.ones((hidden[i + 1],), jnp.float32),
            beta=jnp.zeros((hidden[i + 1],), jnp.float32), act="relu"))
    # crude deconv: fused epilogue also produces relu(refine.in_bn(logits)),
    # the raw (pre-BN) logits are emitted as a second output at call time.
    dec["crude"] = conv_lp(deconv_to_oihw(nrm((hidden[-1], in_chan, 4, 4))),
                           stride=1, pad=2, lhs_dilation=(2, 2),
                           bias=nrm((in_chan,), 0.05),
                           gamma=in_bn_g, beta=in_bn_b, act="relu")
    dec["refine"] = {
        "in_conv": conv_lp(in_conv_w, stride=1, pad=1,
                           gamma=mid_bn_g, beta=mid_bn_b, act="relu"),
        "mid_conv": conv_lp(mid_conv_w, stride=1, pad=1,
                            gamma=out_bn_g, beta=out_bn_b, act="relu"),
        "out_conv": conv_lp(out_conv_w, stride=1, pad=1, act="sigmoid"),
    }

    # L2 reg over decoder.refine parameters (conv weights + BN affine),
    # packed once into a lane-dense padded block (zero padding is harmless
    # for a sum of squares).
    l2_parts = [in_conv_w, mid_conv_w, out_conv_w,
                in_bn_g, in_bn_b, mid_bn_g, mid_bn_b, out_bn_g, out_bn_b]
    flat = jnp.concatenate([v.reshape(-1) for v in l2_parts])
    n = flat.shape[0]
    rows = _round_up(-(-n // 128), 8)
    l2_flat = jnp.pad(flat, (0, rows * 128 - n)).reshape(rows, 128)

    return {"enc": enc_like(2 * latent), "dec": dec, "dis": enc_like(1),
            "l2_flat": l2_flat}


# --------------------------------------------------------------------------
if __name__ == "__main__":
    key = jax.random.PRNGKey(0)
    k_x, k_noise, k_params = jax.random.split(key, 3)

    x = jax.random.uniform(k_x, (2, 3, 16, 16), jnp.float32)  # NCHW images
    params = init_vaegan_params(k_params)

    # params are closed over (they contain static layer metadata).
    fwd = jax.jit(functools.partial(vaegan_vae_forward, params, latent_dim=8))
    vae_loss, gen_loss, l2_term = jax.block_until_ready(fwd(x, k_noise))

    assert bool(jnp.isfinite(vae_loss)) and bool(jnp.isfinite(gen_loss)) \
        and bool(jnp.isfinite(l2_term))
    print("KERNEL_OK")
</pallas_src>

<mosaic_0001>
module attributes {stable_mosaic.version = 11 : i64} {
  func.func @kernel(%arg0: i32, %arg1: memref<8x128xf32, #tpu.memory_space<vmem>>, %arg2: memref<128x128xf32, #tpu.memory_space<vmem>>, %arg3: memref<8x1xf32, #tpu.memory_space<vmem>>, %arg4: memref<8x128xf32, #tpu.memory_space<vmem>>) attributes {dimension_semantics = [#tpu.dimension_semantics<arbitrary>], iteration_bounds = array<i64: 1>, scalar_prefetch = 0 : i64, scratch_operands = 0 : i64, tpu.core_type = #tpu.core_type<tc>, window_params = [{pipeline_mode = #tpu.pipeline_mode<synchronous>, transform_indices = @transform_0, window_bounds = array<i64: 8, 128>}, {pipeline_mode = #tpu.pipeline_mode<synchronous>, transform_indices = @transform_1, window_bounds = array<i64: 128, 128>}, {pipeline_mode = #tpu.pipeline_mode<synchronous>, transform_indices = @transform_2, window_bounds = array<i64: 8, 1>}, {pipeline_mode = #tpu.pipeline_mode<synchronous>, transform_indices = @transform_3, window_bounds = array<i64: 8, 128>}]} {
    %c0 = arith.constant 0 : index
    %c0_0 = arith.constant 0 : index
    %0 = vector.load %arg1[%c0, %c0_0] : memref<8x128xf32, #tpu.memory_space<vmem>>, vector<8x128xf32>
    %c0_1 = arith.constant 0 : index
    %c0_2 = arith.constant 0 : index
    %1 = vector.load %arg2[%c0_1, %c0_2] : memref<128x128xf32, #tpu.memory_space<vmem>>, vector<128x128xf32>
    %cst = arith.constant dense<0.000000e+00> : vector<8x128xf32>
    %2 = tpu.matmul %0, %1, %cst {dimension_numbers = #tpu.dot_dimension_numbers<[1], [0], [0], [1], [0, 0, 1, 1], [], []>} : vector<8x128xf32>, vector<128x128xf32>, vector<8x128xf32> -> vector<8x128xf32>
    %c0_3 = arith.constant 0 : index
    %c0_4 = arith.constant 0 : index
    %3 = vector.load %arg3[%c0_3, %c0_4] : memref<8x1xf32, #tpu.memory_space<vmem>>, vector<8x1xf32>
    %4 = vector.broadcast %3 : vector<8x1xf32> to vector<8x128xf32>
    %5 = arith.addf %2, %4 : vector<8x128xf32>
    %cst_5 = arith.constant 0.000000e+00 : f32
    %6 = vector.broadcast %cst_5 : f32 to vector<8x128xf32>
    %7 = arith.cmpf oge, %5, %6 : vector<8x128xf32>
    %cst_6 = arith.constant 2.000000e-01 : f32
    %8 = vector.broadcast %cst_6 : f32 to vector<8x128xf32>
    %9 = arith.mulf %8, %5 : vector<8x128xf32>
    %10 = arith.select %7, %5, %9 : vector<8x128xi1>, vector<8x128xf32>
    %c0_7 = arith.constant 0 : index
    %c0_8 = arith.constant 0 : index
    %11 = vector.load %arg4[%c0_7, %c0_8] : memref<8x128xf32, #tpu.memory_space<vmem>>, vector<8x128xf32>
    tpu.vector_store %arg4[%c0_7, %c0_8], %10 {strides = array<i32>} : memref<8x128xf32, #tpu.memory_space<vmem>>, vector<8x128xf32>,
    return
  }
  func.func @transform_0(%arg0: i32) -> (i32, i32) {
    %c0_i32 = arith.constant 0 : i32
    %c0_i32_0 = arith.constant 0 : i32
    %c0_i32_1 = arith.constant 0 : i32
    return %c0_i32, %c0_i32_0 : i32, i32
  }
  func.func @transform_1(%arg0: i32) -> (i32, i32) {
    %c0_i32 = arith.constant 0 : i32
    %c0_i32_0 = arith.constant 0 : i32
    %c0_i32_1 = arith.constant 0 : i32
    return %c0_i32, %c0_i32_0 : i32, i32
  }
  func.func @transform_2(%arg0: i32) -> (i32, i32) {
    %c0_i32 = arith.constant 0 : i32
    %c0_i32_0 = arith.constant 0 : i32
    %c0_i32_1 = arith.constant 0 : i32
    return %c0_i32, %c0_i32_0 : i32, i32
  }
  func.func @transform_3(%arg0: i32) -> (i32, i32) {
    %c0_i32 = arith.constant 0 : i32
    %c0_i32_0 = arith.constant 0 : i32
    %c0_i32_1 = arith.constant 0 : i32
    return %c0_i32, %c0_i32_0 : i32, i32
  }
}

module attributes {stable_mosaic.version = 11 : i64} {
  func.func @kernel(%arg0: i32, %arg1: memref<8x128xf32, #tpu.memory_space<vmem>>, %arg2: memref<128x128xf32, #tpu.memory_space<vmem>>, %arg3: memref<8x1xf32, #tpu.memory_space<vmem>>, %arg4: memref<8x1xf32, #tpu.memory_space<vmem>>, %arg5: memref<8x128xf32, #tpu.memory_space<vmem>>) attributes {dimension_semantics = [#tpu.dimension_semantics<arbitrary>], iteration_bounds = array<i64: 1>, scalar_prefetch = 0 : i64, scratch_operands = 0 : i64, tpu.core_type = #tpu.core_type<tc>, window_params = [{pipeline_mode = #tpu.pipeline_mode<synchronous>, transform_indices = @transform_0, window_bounds = array<i64: 8, 128>}, {pipeline_mode = #tpu.pipeline_mode<synchronous>, transform_indices = @transform_1, window_bounds = array<i64: 128, 128>}, {pipeline_mode = #tpu.pipeline_mode<synchronous>, transform_indices = @transform_2, window_bounds = array<i64: 8, 1>}, {pipeline_mode = #tpu.pipeline_mode<synchronous>, transform_indices = @transform_3, window_bounds = array<i64: 8, 1>}, {pipeline_mode = #tpu.pipeline_mode<synchronous>, transform_indices = @transform_4, window_bounds = array<i64: 8, 128>}]} {
    %c0 = arith.constant 0 : index
    %c0_0 = arith.constant 0 : index
    %0 = vector.load %arg1[%c0, %c0_0] : memref<8x128xf32, #tpu.memory_space<vmem>>, vector<8x128xf32>
    %c0_1 = arith.constant 0 : index
    %c0_2 = arith.constant 0 : index
    %1 = vector.load %arg2[%c0_1, %c0_2] : memref<128x128xf32, #tpu.memory_space<vmem>>, vector<128x128xf32>
    %cst = arith.constant dense<0.000000e+00> : vector<8x128xf32>
    %2 = tpu.matmul %0, %1, %cst {dimension_numbers = #tpu.dot_dimension_numbers<[1], [0], [0], [1], [0, 0, 1, 1], [], []>} : vector<8x128xf32>, vector<128x128xf32>, vector<8x128xf32> -> vector<8x128xf32>
    %3 = tpu.iota {dimensions = array<i32: 1>} : vector<8x128xi32>
    %c32_i32 = arith.constant 32 : i32
    %4 = vector.broadcast %c32_i32 : i32 to vector<8x128xi32>
    %5 = arith.cmpi slt, %3, %4 : vector<8x128xi32>
    %cst_3 = arith.constant 0.000000e+00 : f32
    %6 = vector.broadcast %cst_3 : f32 to vector<8x128xf32>
    %7 = arith.select %5, %2, %6 : vector<8x128xi1>, vector<8x128xf32>
    %cst_4 = arith.constant dense<0.000000e+00> : vector<8xf32>
    %8 = vector.multi_reduction <add>, %7, %cst_4 [1] : vector<8x128xf32> to vector<8xf32>
    %9 = vector.shape_cast %8 : vector<8xf32> to vector<8x1xf32>
    %cst_5 = arith.constant 3.125000e-02 : f32
    %10 = vector.broadcast %cst_5 : f32 to vector<8x1xf32>
    %11 = arith.mulf %9, %10 : vector<8x1xf32>
    %12 = vector.broadcast %11 : vector<8x1xf32> to vector<8x128xf32>
    %13 = arith.subf %2, %12 : vector<8x128xf32>
    %cst_6 = arith.constant 0.000000e+00 : f32
    %14 = vector.broadcast %cst_6 : f32 to vector<8x128xf32>
    %15 = arith.select %5, %13, %14 : vector<8x128xi1>, vector<8x128xf32>
    %16 = arith.mulf %15, %15 : vector<8x128xf32>
    %cst_7 = arith.constant dense<0.000000e+00> : vector<8xf32>
    %17 = vector.multi_reduction <add>, %16, %cst_7 [1] : vector<8x128xf32> to vector<8xf32>
    %18 = vector.shape_cast %17 : vector<8xf32> to vector<8x1xf32>
    %cst_8 = arith.constant 3.125000e-02 : f32
    %19 = vector.broadcast %cst_8 : f32 to vector<8x1xf32>
    %20 = arith.mulf %18, %19 : vector<8x1xf32>
    %c0_9 = arith.constant 0 : index
    %c0_10 = arith.constant 0 : index
    %21 = vector.load %arg3[%c0_9, %c0_10] : memref<8x1xf32, #tpu.memory_space<vmem>>, vector<8x1xf32>
    %cst_11 = arith.constant 9.99999974E-6 : f32
    %22 = vector.broadcast %cst_11 : f32 to vector<8x1xf32>
    %23 = arith.addf %20, %22 : vector<8x1xf32>
    %24 = math.rsqrt %23 : vector<8x1xf32>
    %25 = arith.mulf %21, %24 : vector<8x1xf32>
    %26 = vector.broadcast %11 : vector<8x1xf32> to vector<8x128xf32>
    %27 = arith.subf %2, %26 : vector<8x128xf32>
    %28 = vector.broadcast %25 : vector<8x1xf32> to vector<8x128xf32>
    %29 = arith.mulf %27, %28 : vector<8x128xf32>
    %c0_12 = arith.constant 0 : index
    %c0_13 = arith.constant 0 : index
    %30 = vector.load %arg4[%c0_12, %c0_13] : memref<8x1xf32, #tpu.memory_space<vmem>>, vector<8x1xf32>
    %31 = vector.broadcast %30 : vector<8x1xf32> to vector<8x128xf32>
    %32 = arith.addf %29, %31 : vector<8x128xf32>
    %cst_14 = arith.constant 0.000000e+00 : f32
    %33 = vector.broadcast %cst_14 : f32 to vector<8x128xf32>
    %34 = arith.cmpf oge, %32, %33 : vector<8x128xf32>
    %cst_15 = arith.constant 2.000000e-01 : f32
    %35 = vector.broadcast %cst_15 : f32 to vector<8x128xf32>
    %36 = arith.mulf %35, %32 : vector<8x128xf32>
    %37 = arith.select %34, %32, %36 : vector<8x128xi1>, vector<8x128xf32>
    %c0_16 = arith.constant 0 : index
    %c0_17 = arith.constant 0 : index
    %38 = vector.load %arg5[%c0_16, %c0_17] : memref<8x128xf32, #tpu.memory_space<vmem>>, vector<8x128xf32>
    tpu.vector_store %arg5[%c0_16, %c0_17], %37 {strides = array<i32>} : memref<8x128xf32, #tpu.memory_space<vmem>>, vector<8x128xf32>,
    return
  }
  func.func @transform_0(%arg0: i32) -> (i32, i32) {
    %c0_i32 = arith.constant 0 : i32
    %c0_i32_0 = arith.constant 0 : i32
    %c0_i32_1 = arith.constant 0 : i32
    return %c0_i32, %c0_i32_0 : i32, i32
  }
  func.func @transform_1(%arg0: i32) -> (i32, i32) {
    %c0_i32 = arith.constant 0 : i32
    %c0_i32_0 = arith.constant 0 : i32
    %c0_i32_1 = arith.constant 0 : i32
    return %c0_i32, %c0_i32_0 : i32, i32
  }
  func.func @transform_2(%arg0: i32) -> (i32, i32) {
    %c0_i32 = arith.constant 0 : i32
    %c0_i32_0 = arith.constant 0 : i32
    %c0_i32_1 = arith.constant 0 : i32
    return %c0_i32, %c0_i32_0 : i32, i32
  }
  func.func @transform_3(%arg0: i32) -> (i32, i32) {
    %c0_i32 = arith.constant 0 : i32
    %c0_i32_0 = arith.constant 0 : i32
    %c0_i32_1 = arith.constant 0 : i32
    return %c0_i32, %c0_i32_0 : i32, i32
  }
  func.func @transform_4(%arg0: i32) -> (i32, i32) {
    %c0_i32 = arith.constant 0 : i32
    %c0_i32_0 = arith.constant 0 : i32
    %c0_i32_1 = arith.constant 0 : i32
    return %c0_i32, %c0_i32_0 : i32, i32
  }
}

module attributes {stable_mosaic.version = 11 : i64} {
  func.func @kernel(%arg0: i32, %arg1: memref<8x128xf32, #tpu.memory_space<vmem>>, %arg2: memref<128x128xf32, #tpu.memory_space<vmem>>, %arg3: memref<8x1xf32, #tpu.memory_space<vmem>>, %arg4: memref<8x1xf32, #tpu.memory_space<vmem>>, %arg5: memref<8x128xf32, #tpu.memory_space<vmem>>) attributes {dimension_semantics = [#tpu.dimension_semantics<arbitrary>], iteration_bounds = array<i64: 1>, scalar_prefetch = 0 : i64, scratch_operands = 0 : i64, tpu.core_type = #tpu.core_type<tc>, window_params = [{pipeline_mode = #tpu.pipeline_mode<synchronous>, transform_indices = @transform_0, window_bounds = array<i64: 8, 128>}, {pipeline_mode = #tpu.pipeline_mode<synchronous>, transform_indices = @transform_1, window_bounds = array<i64: 128, 128>}, {pipeline_mode = #tpu.pipeline_mode<synchronous>, transform_indices = @transform_2, window_bounds = array<i64: 8, 1>}, {pipeline_mode = #tpu.pipeline_mode<synchronous>, transform_indices = @transform_3, window_bounds = array<i64: 8, 1>}, {pipeline_mode = #tpu.pipeline_mode<synchronous>, transform_indices = @transform_4, window_bounds = array<i64: 8, 128>}]} {
    %c0 = arith.constant 0 : index
    %c0_0 = arith.constant 0 : index
    %0 = vector.load %arg1[%c0, %c0_0] : memref<8x128xf32, #tpu.memory_space<vmem>>, vector<8x128xf32>
    %c0_1 = arith.constant 0 : index
    %c0_2 = arith.constant 0 : index
    %1 = vector.load %arg2[%c0_1, %c0_2] : memref<128x128xf32, #tpu.memory_space<vmem>>, vector<128x128xf32>
    %cst = arith.constant dense<0.000000e+00> : vector<8x128xf32>
    %2 = tpu.matmul %0, %1, %cst {dimension_numbers = #tpu.dot_dimension_numbers<[1], [0], [0], [1], [0, 0, 1, 1], [], []>} : vector<8x128xf32>, vector<128x128xf32>, vector<8x128xf32> -> vector<8x128xf32>
    %3 = tpu.iota {dimensions = array<i32: 1>} : vector<8x128xi32>
    %c8_i32 = arith.constant 8 : i32
    %4 = vector.broadcast %c8_i32 : i32 to vector<8x128xi32>
    %5 = arith.cmpi slt, %3, %4 : vector<8x128xi32>
    %cst_3 = arith.constant 0.000000e+00 : f32
    %6 = vector.broadcast %cst_3 : f32 to vector<8x128xf32>
    %7 = arith.select %5, %2, %6 : vector<8x128xi1>, vector<8x128xf32>
    %cst_4 = arith.constant dense<0.000000e+00> : vector<8xf32>
    %8 = vector.multi_reduction <add>, %7, %cst_4 [1] : vector<8x128xf32> to vector<8xf32>
    %9 = vector.shape_cast %8 : vector<8xf32> to vector<8x1xf32>
    %cst_5 = arith.constant 1.250000e-01 : f32
    %10 = vector.broadcast %cst_5 : f32 to vector<8x1xf32>
    %11 = arith.mulf %9, %10 : vector<8x1xf32>
    %12 = vector.broadcast %11 : vector<8x1xf32> to vector<8x128xf32>
    %13 = arith.subf %2, %12 : vector<8x128xf32>
    %cst_6 = arith.constant 0.000000e+00 : f32
    %14 = vector.broadcast %cst_6 : f32 to vector<8x128xf32>
    %15 = arith.select %5, %13, %14 : vector<8x128xi1>, vector<8x128xf32>
    %16 = arith.mulf %15, %15 : vector<8x128xf32>
    %cst_7 = arith.constant dense<0.000000e+00> : vector<8xf32>
    %17 = vector.multi_reduction <add>, %16, %cst_7 [1] : vector<8x128xf32> to vector<8xf32>
    %18 = vector.shape_cast %17 : vector<8xf32> to vector<8x1xf32>
    %cst_8 = arith.constant 1.250000e-01 : f32
    %19 = vector.broadcast %cst_8 : f32 to vector<8x1xf32>
    %20 = arith.mulf %18, %19 : vector<8x1xf32>
    %c0_9 = arith.constant 0 : index
    %c0_10 = arith.constant 0 : index
    %21 = vector.load %arg3[%c0_9, %c0_10] : memref<8x1xf32, #tpu.memory_space<vmem>>, vector<8x1xf32>
    %cst_11 = arith.constant 9.99999974E-6 : f32
    %22 = vector.broadcast %cst_11 : f32 to vector<8x1xf32>
    %23 = arith.addf %20, %22 : vector<8x1xf32>
    %24 = math.rsqrt %23 : vector<8x1xf32>
    %25 = arith.mulf %21, %24 : vector<8x1xf32>
    %26 = vector.broadcast %11 : vector<8x1xf32> to vector<8x128xf32>
    %27 = arith.subf %2, %26 : vector<8x128xf32>
    %28 = vector.broadcast %25 : vector<8x1xf32> to vector<8x128xf32>
    %29 = arith.mulf %27, %28 : vector<8x128xf32>
    %c0_12 = arith.constant 0 : index
    %c0_13 = arith.constant 0 : index
    %30 = vector.load %arg4[%c0_12, %c0_13] : memref<8x1xf32, #tpu.memory_space<vmem>>, vector<8x1xf32>
    %31 = vector.broadcast %30 : vector<8x1xf32> to vector<8x128xf32>
    %32 = arith.addf %29, %31 : vector<8x128xf32>
    %cst_14 = arith.constant 0.000000e+00 : f32
    %33 = vector.broadcast %cst_14 : f32 to vector<8x128xf32>
    %34 = arith.cmpf oge, %32, %33 : vector<8x128xf32>
    %cst_15 = arith.constant 2.000000e-01 : f32
    %35 = vector.broadcast %cst_15 : f32 to vector<8x128xf32>
    %36 = arith.mulf %35, %32 : vector<8x128xf32>
    %37 = arith.select %34, %32, %36 : vector<8x128xi1>, vector<8x128xf32>
    %c0_16 = arith.constant 0 : index
    %c0_17 = arith.constant 0 : index
    %38 = vector.load %arg5[%c0_16, %c0_17] : memref<8x128xf32, #tpu.memory_space<vmem>>, vector<8x128xf32>
    tpu.vector_store %arg5[%c0_16, %c0_17], %37 {strides = array<i32>} : memref<8x128xf32, #tpu.memory_space<vmem>>, vector<8x128xf32>,
    return
  }
  func.func @transform_0(%arg0: i32) -> (i32, i32) {
    %c0_i32 = arith.constant 0 : i32
    %c0_i32_0 = arith.constant 0 : i32
    %c0_i32_1 = arith.constant 0 : i32
    return %c0_i32, %c0_i32_0 : i32, i32
  }
  func.func @transform_1(%arg0: i32) -> (i32, i32) {
    %c0_i32 = arith.constant 0 : i32
    %c0_i32_0 = arith.constant 0 : i32
    %c0_i32_1 = arith.constant 0 : i32
    return %c0_i32, %c0_i32_0 : i32, i32
  }
  func.func @transform_2(%arg0: i32) -> (i32, i32) {
    %c0_i32 = arith.constant 0 : i32
    %c0_i32_0 = arith.constant 0 : i32
    %c0_i32_1 = arith.constant 0 : i32
    return %c0_i32, %c0_i32_0 : i32, i32
  }
  func.func @transform_3(%arg0: i32) -> (i32, i32) {
    %c0_i32 = arith.constant 0 : i32
    %c0_i32_0 = arith.constant 0 : i32
    %c0_i32_1 = arith.constant 0 : i32
    return %c0_i32, %c0_i32_0 : i32, i32
  }
  func.func @transform_4(%arg0: i32) -> (i32, i32) {
    %c0_i32 = arith.constant 0 : i32
    %c0_i32_0 = arith.constant 0 : i32
    %c0_i32_1 = arith.constant 0 : i32
    return %c0_i32, %c0_i32_0 : i32, i32
  }
}

module attributes {stable_mosaic.version = 11 : i64} {
  func.func @kernel(%arg0: i32, %arg1: memref<8x128xf32, #tpu.memory_space<vmem>>, %arg2: memref<128x128xf32, #tpu.memory_space<vmem>>, %arg3: memref<8x1xf32, #tpu.memory_space<vmem>>, %arg4: memref<8x1xf32, #tpu.memory_space<vmem>>, %arg5: memref<8x128xf32, #tpu.memory_space<vmem>>) attributes {dimension_semantics = [#tpu.dimension_semantics<arbitrary>], iteration_bounds = array<i64: 1>, scalar_prefetch = 0 : i64, scratch_operands = 0 : i64, tpu.core_type = #tpu.core_type<tc>, window_params = [{pipeline_mode = #tpu.pipeline_mode<synchronous>, transform_indices = @transform_0, window_bounds = array<i64: 8, 128>}, {pipeline_mode = #tpu.pipeline_mode<synchronous>, transform_indices = @transform_1, window_bounds = array<i64: 128, 128>}, {pipeline_mode = #tpu.pipeline_mode<synchronous>, transform_indices = @transform_2, window_bounds = array<i64: 8, 1>}, {pipeline_mode = #tpu.pipeline_mode<synchronous>, transform_indices = @transform_3, window_bounds = array<i64: 8, 1>}, {pipeline_mode = #tpu.pipeline_mode<synchronous>, transform_indices = @transform_4, window_bounds = array<i64: 8, 128>}]} {
    %c0 = arith.constant 0 : index
    %c0_0 = arith.constant 0 : index
    %0 = vector.load %arg1[%c0, %c0_0] : memref<8x128xf32, #tpu.memory_space<vmem>>, vector<8x128xf32>
    %c0_1 = arith.constant 0 : index
    %c0_2 = arith.constant 0 : index
    %1 = vector.load %arg2[%c0_1, %c0_2] : memref<128x128xf32, #tpu.memory_space<vmem>>, vector<128x128xf32>
    %cst = arith.constant dense<0.000000e+00> : vector<8x128xf32>
    %2 = tpu.matmul %0, %1, %cst {dimension_numbers = #tpu.dot_dimension_numbers<[1], [0], [0], [1], [0, 0, 1, 1], [], []>} : vector<8x128xf32>, vector<128x128xf32>, vector<8x128xf32> -> vector<8x128xf32>
    %3 = tpu.iota {dimensions = array<i32: 1>} : vector<8x128xi32>
    %c2_i32 = arith.constant 2 : i32
    %4 = vector.broadcast %c2_i32 : i32 to vector<8x128xi32>
    %5 = arith.cmpi slt, %3, %4 : vector<8x128xi32>
    %cst_3 = arith.constant 0.000000e+00 : f32
    %6 = vector.broadcast %cst_3 : f32 to vector<8x128xf32>
    %7 = arith.select %5, %2, %6 : vector<8x128xi1>, vector<8x128xf32>
    %cst_4 = arith.constant dense<0.000000e+00> : vector<8xf32>
    %8 = vector.multi_reduction <add>, %7, %cst_4 [1] : vector<8x128xf32> to vector<8xf32>
    %9 = vector.shape_cast %8 : vector<8xf32> to vector<8x1xf32>
    %cst_5 = arith.constant 5.000000e-01 : f32
    %10 = vector.broadcast %cst_5 : f32 to vector<8x1xf32>
    %11 = arith.mulf %9, %10 : vector<8x1xf32>
    %12 = vector.broadcast %11 : vector<8x1xf32> to vector<8x128xf32>
    %13 = arith.subf %2, %12 : vector<8x128xf32>
    %cst_6 = arith.constant 0.000000e+00 : f32
    %14 = vector.broadcast %cst_6 : f32 to vector<8x128xf32>
    %15 = arith.select %5, %13, %14 : vector<8x128xi1>, vector<8x128xf32>
    %16 = arith.mulf %15, %15 : vector<8x128xf32>
    %cst_7 = arith.constant dense<0.000000e+00> : vector<8xf32>
    %17 = vector.multi_reduction <add>, %16, %cst_7 [1] : vector<8x128xf32> to vector<8xf32>
    %18 = vector.shape_cast %17 : vector<8xf32> to vector<8x1xf32>
    %cst_8 = arith.constant 5.000000e-01 : f32
    %19 = vector.broadcast %cst_8 : f32 to vector<8x1xf32>
    %20 = arith.mulf %18, %19 : vector<8x1xf32>
    %c0_9 = arith.constant 0 : index
    %c0_10 = arith.constant 0 : index
    %21 = vector.load %arg3[%c0_9, %c0_10] : memref<8x1xf32, #tpu.memory_space<vmem>>, vector<8x1xf32>
    %cst_11 = arith.constant 9.99999974E-6 : f32
    %22 = vector.broadcast %cst_11 : f32 to vector<8x1xf32>
    %23 = arith.addf %20, %22 : vector<8x1xf32>
    %24 = math.rsqrt %23 : vector<8x1xf32>
    %25 = arith.mulf %21, %24 : vector<8x1xf32>
    %26 = vector.broadcast %11 : vector<8x1xf32> to vector<8x128xf32>
    %27 = arith.subf %2, %26 : vector<8x128xf32>
    %28 = vector.broadcast %25 : vector<8x1xf32> to vector<8x128xf32>
    %29 = arith.mulf %27, %28 : vector<8x128xf32>
    %c0_12 = arith.constant 0 : index
    %c0_13 = arith.constant 0 : index
    %30 = vector.load %arg4[%c0_12, %c0_13] : memref<8x1xf32, #tpu.memory_space<vmem>>, vector<8x1xf32>
    %31 = vector.broadcast %30 : vector<8x1xf32> to vector<8x128xf32>
    %32 = arith.addf %29, %31 : vector<8x128xf32>
    %cst_14 = arith.constant 0.000000e+00 : f32
    %33 = vector.broadcast %cst_14 : f32 to vector<8x128xf32>
    %34 = arith.cmpf oge, %32, %33 : vector<8x128xf32>
    %cst_15 = arith.constant 2.000000e-01 : f32
    %35 = vector.broadcast %cst_15 : f32 to vector<8x128xf32>
    %36 = arith.mulf %35, %32 : vector<8x128xf32>
    %37 = arith.select %34, %32, %36 : vector<8x128xi1>, vector<8x128xf32>
    %c0_16 = arith.constant 0 : index
    %c0_17 = arith.constant 0 : index
    %38 = vector.load %arg5[%c0_16, %c0_17] : memref<8x128xf32, #tpu.memory_space<vmem>>, vector<8x128xf32>
    tpu.vector_store %arg5[%c0_16, %c0_17], %37 {strides = array<i32>} : memref<8x128xf32, #tpu.memory_space<vmem>>, vector<8x128xf32>,
    return
  }
  func.func @transform_0(%arg0: i32) -> (i32, i32) {
    %c0_i32 = arith.constant 0 : i32
    %c0_i32_0 = arith.constant 0 : i32
    %c0_i32_1 = arith.constant 0 : i32
    return %c0_i32, %c0_i32_0 : i32, i32
  }
  func.func @transform_1(%arg0: i32) -> (i32, i32) {
    %c0_i32 = arith.constant 0 : i32
    %c0_i32_0 = arith.constant 0 : i32
    %c0_i32_1 = arith.constant 0 : i32
    return %c0_i32, %c0_i32_0 : i32, i32
  }
  func.func @transform_2(%arg0: i32) -> (i32, i32) {
    %c0_i32 = arith.constant 0 : i32
    %c0_i32_0 = arith.constant 0 : i32
    %c0_i32_1 = arith.constant 0 : i32
    return %c0_i32, %c0_i32_0 : i32, i32
  }
  func.func @transform_3(%arg0: i32) -> (i32, i32) {
    %c0_i32 = arith.constant 0 : i32
    %c0_i32_0 = arith.constant 0 : i32
    %c0_i32_1 = arith.constant 0 : i32
    return %c0_i32, %c0_i32_0 : i32, i32
  }
  func.func @transform_4(%arg0: i32) -> (i32, i32) {
    %c0_i32 = arith.constant 0 : i32
    %c0_i32_0 = arith.constant 0 : i32
    %c0_i32_1 = arith.constant 0 : i32
    return %c0_i32, %c0_i32_0 : i32, i32
  }
}

module attributes {stable_mosaic.version = 11 : i64} {
  func.func @kernel(%arg0: i32, %arg1: memref<16x128xf32, #tpu.memory_space<vmem>>, %arg2: memref<128x128xf32, #tpu.memory_space<vmem>>, %arg3: memref<16x1xf32, #tpu.memory_space<vmem>>, %arg4: memref<16x128xf32, #tpu.memory_space<vmem>>) attributes {dimension_semantics = [#tpu.dimension_semantics<arbitrary>], iteration_bounds = array<i64: 1>, scalar_prefetch = 0 : i64, scratch_operands = 0 : i64, tpu.core_type = #tpu.core_type<tc>, window_params = [{pipeline_mode = #tpu.pipeline_mode<synchronous>, transform_indices = @transform_0, window_bounds = array<i64: 16, 128>}, {pipeline_mode = #tpu.pipeline_mode<synchronous>, transform_indices = @transform_1, window_bounds = array<i64: 128, 128>}, {pipeline_mode = #tpu.pipeline_mode<synchronous>, transform_indices = @transform_2, window_bounds = array<i64: 16, 1>}, {pipeline_mode = #tpu.pipeline_mode<synchronous>, transform_indices = @transform_3, window_bounds = array<i64: 16, 128>}]} {
    %c0 = arith.constant 0 : index
    %c0_0 = arith.constant 0 : index
    %0 = vector.load %arg1[%c0, %c0_0] : memref<16x128xf32, #tpu.memory_space<vmem>>, vector<16x128xf32>
    %c0_1 = arith.constant 0 : index
    %c0_2 = arith.constant 0 : index
    %1 = vector.load %arg2[%c0_1, %c0_2] : memref<128x128xf32, #tpu.memory_space<vmem>>, vector<128x128xf32>
    %cst = arith.constant dense<0.000000e+00> : vector<16x128xf32>
    %2 = tpu.matmul %0, %1, %cst {dimension_numbers = #tpu.dot_dimension_numbers<[1], [0], [0], [1], [0, 0, 1, 1], [], []>} : vector<16x128xf32>, vector<128x128xf32>, vector<16x128xf32> -> vector<16x128xf32>
    %c0_3 = arith.constant 0 : index
    %c0_4 = arith.constant 0 : index
    %3 = vector.load %arg3[%c0_3, %c0_4] : memref<16x1xf32, #tpu.memory_space<vmem>>, vector<16x1xf32>
    %4 = vector.broadcast %3 : vector<16x1xf32> to vector<16x128xf32>
    %5 = arith.addf %2, %4 : vector<16x128xf32>
    %c0_5 = arith.constant 0 : index
    %c0_6 = arith.constant 0 : index
    %6 = vector.load %arg4[%c0_5, %c0_6] : memref<16x128xf32, #tpu.memory_space<vmem>>, vector<16x128xf32>
    tpu.vector_store %arg4[%c0_5, %c0_6], %5 {strides = array<i32>} : memref<16x128xf32, #tpu.memory_space<vmem>>, vector<16x128xf32>,
    return
  }
  func.func @transform_0(%arg0: i32) -> (i32, i32) {
    %c0_i32 = arith.constant 0 : i32
    %c0_i32_0 = arith.constant 0 : i32
    %c0_i32_1 = arith.constant 0 : i32
    return %c0_i32, %c0_i32_0 : i32, i32
  }
  func.func @transform_1(%arg0: i32) -> (i32, i32) {
    %c0_i32 = arith.constant 0 : i32
    %c0_i32_0 = arith.constant 0 : i32
    %c0_i32_1 = arith.constant 0 : i32
    return %c0_i32, %c0_i32_0 : i32, i32
  }
  func.func @transform_2(%arg0: i32) -> (i32, i32) {
    %c0_i32 = arith.constant 0 : i32
    %c0_i32_0 = arith.constant 0 : i32
    %c0_i32_1 = arith.constant 0 : i32
    return %c0_i32, %c0_i32_0 : i32, i32
  }
  func.func @transform_3(%arg0: i32) -> (i32, i32) {
    %c0_i32 = arith.constant 0 : i32
    %c0_i32_0 = arith.constant 0 : i32
    %c0_i32_1 = arith.constant 0 : i32
    return %c0_i32, %c0_i32_0 : i32, i32
  }
}

module attributes {stable_mosaic.version = 11 : i64} {
  func.func @kernel(%arg0: i32, %arg1: memref<8x128xf32, #tpu.memory_space<vmem>>, %arg2: memref<128x128xf32, #tpu.memory_space<vmem>>, %arg3: memref<8x1xf32, #tpu.memory_space<vmem>>, %arg4: memref<8x1xf32, #tpu.memory_space<vmem>>, %arg5: memref<8x128xf32, #tpu.memory_space<vmem>>) attributes {dimension_semantics = [#tpu.dimension_semantics<arbitrary>], iteration_bounds = array<i64: 1>, scalar_prefetch = 0 : i64, scratch_operands = 0 : i64, tpu.core_type = #tpu.core_type<tc>, window_params = [{pipeline_mode = #tpu.pipeline_mode<synchronous>, transform_indices = @transform_0, window_bounds = array<i64: 8, 128>}, {pipeline_mode = #tpu.pipeline_mode<synchronous>, transform_indices = @transform_1, window_bounds = array<i64: 128, 128>}, {pipeline_mode = #tpu.pipeline_mode<synchronous>, transform_indices = @transform_2, window_bounds = array<i64: 8, 1>}, {pipeline_mode = #tpu.pipeline_mode<synchronous>, transform_indices = @transform_3, window_bounds = array<i64: 8, 1>}, {pipeline_mode = #tpu.pipeline_mode<synchronous>, transform_indices = @transform_4, window_bounds = array<i64: 8, 128>}]} {
    %c0 = arith.constant 0 : index
    %c0_0 = arith.constant 0 : index
    %0 = vector.load %arg1[%c0, %c0_0] : memref<8x128xf32, #tpu.memory_space<vmem>>, vector<8x128xf32>
    %c0_1 = arith.constant 0 : index
    %c0_2 = arith.constant 0 : index
    %1 = vector.load %arg2[%c0_1, %c0_2] : memref<128x128xf32, #tpu.memory_space<vmem>>, vector<128x128xf32>
    %cst = arith.constant dense<0.000000e+00> : vector<8x128xf32>
    %2 = tpu.matmul %0, %1, %cst {dimension_numbers = #tpu.dot_dimension_numbers<[1], [0], [0], [1], [0, 0, 1, 1], [], []>} : vector<8x128xf32>, vector<128x128xf32>, vector<8x128xf32> -> vector<8x128xf32>
    %3 = tpu.iota {dimensions = array<i32: 1>} : vector<8x128xi32>
    %c2_i32 = arith.constant 2 : i32
    %4 = vector.broadcast %c2_i32 : i32 to vector<8x128xi32>
    %5 = arith.cmpi slt, %3, %4 : vector<8x128xi32>
    %cst_3 = arith.constant 0.000000e+00 : f32
    %6 = vector.broadcast %cst_3 : f32 to vector<8x128xf32>
    %7 = arith.select %5, %2, %6 : vector<8x128xi1>, vector<8x128xf32>
    %cst_4 = arith.constant dense<0.000000e+00> : vector<8xf32>
    %8 = vector.multi_reduction <add>, %7, %cst_4 [1] : vector<8x128xf32> to vector<8xf32>
    %9 = vector.shape_cast %8 : vector<8xf32> to vector<8x1xf32>
    %cst_5 = arith.constant 5.000000e-01 : f32
    %10 = vector.broadcast %cst_5 : f32 to vector<8x1xf32>
    %11 = arith.mulf %9, %10 : vector<8x1xf32>
    %12 = vector.broadcast %11 : vector<8x1xf32> to vector<8x128xf32>
    %13 = arith.subf %2, %12 : vector<8x128xf32>
    %cst_6 = arith.constant 0.000000e+00 : f32
    %14 = vector.broadcast %cst_6 : f32 to vector<8x128xf32>
    %15 = arith.select %5, %13, %14 : vector<8x128xi1>, vector<8x128xf32>
    %16 = arith.mulf %15, %15 : vector<8x128xf32>
    %cst_7 = arith.constant dense<0.000000e+00> : vector<8xf32>
    %17 = vector.multi_reduction <add>, %16, %cst_7 [1] : vector<8x128xf32> to vector<8xf32>
    %18 = vector.shape_cast %17 : vector<8xf32> to vector<8x1xf32>
    %cst_8 = arith.constant 5.000000e-01 : f32
    %19 = vector.broadcast %cst_8 : f32 to vector<8x1xf32>
    %20 = arith.mulf %18, %19 : vector<8x1xf32>
    %c0_9 = arith.constant 0 : index
    %c0_10 = arith.constant 0 : index
    %21 = vector.load %arg3[%c0_9, %c0_10] : memref<8x1xf32, #tpu.memory_space<vmem>>, vector<8x1xf32>
    %cst_11 = arith.constant 9.99999974E-6 : f32
    %22 = vector.broadcast %cst_11 : f32 to vector<8x1xf32>
    %23 = arith.addf %20, %22 : vector<8x1xf32>
    %24 = math.rsqrt %23 : vector<8x1xf32>
    %25 = arith.mulf %21, %24 : vector<8x1xf32>
    %26 = vector.broadcast %11 : vector<8x1xf32> to vector<8x128xf32>
    %27 = arith.subf %2, %26 : vector<8x128xf32>
    %28 = vector.broadcast %25 : vector<8x1xf32> to vector<8x128xf32>
    %29 = arith.mulf %27, %28 : vector<8x128xf32>
    %c0_12 = arith.constant 0 : index
    %c0_13 = arith.constant 0 : index
    %30 = vector.load %arg4[%c0_12, %c0_13] : memref<8x1xf32, #tpu.memory_space<vmem>>, vector<8x1xf32>
    %31 = vector.broadcast %30 : vector<8x1xf32> to vector<8x128xf32>
    %32 = arith.addf %29, %31 : vector<8x128xf32>
    %cst_14 = arith.constant 0.000000e+00 : f32
    %33 = vector.broadcast %cst_14 : f32 to vector<8x128xf32>
    %34 = arith.maximumf %32, %33 : vector<8x128xf32>
    %c0_15 = arith.constant 0 : index
    %c0_16 = arith.constant 0 : index
    %35 = vector.load %arg5[%c0_15, %c0_16] : memref<8x128xf32, #tpu.memory_space<vmem>>, vector<8x128xf32>
    tpu.vector_store %arg5[%c0_15, %c0_16], %34 {strides = array<i32>} : memref<8x128xf32, #tpu.memory_space<vmem>>, vector<8x128xf32>,
    return
  }
  func.func @transform_0(%arg0: i32) -> (i32, i32) {
    %c0_i32 = arith.constant 0 : i32
    %c0_i32_0 = arith.constant 0 : i32
    %c0_i32_1 = arith.constant 0 : i32
    return %c0_i32, %c0_i32_0 : i32, i32
  }
  func.func @transform_1(%arg0: i32) -> (i32, i32) {
    %c0_i32 = arith.constant 0 : i32
    %c0_i32_0 = arith.constant 0 : i32
    %c0_i32_1 = arith.constant 0 : i32
    return %c0_i32, %c0_i32_0 : i32, i32
  }
  func.func @transform_2(%arg0: i32) -> (i32, i32) {
    %c0_i32 = arith.constant 0 : i32
    %c0_i32_0 = arith.constant 0 : i32
    %c0_i32_1 = arith.constant 0 : i32
    return %c0_i32, %c0_i32_0 : i32, i32
  }
  func.func @transform_3(%arg0: i32) -> (i32, i32) {
    %c0_i32 = arith.constant 0 : i32
    %c0_i32_0 = arith.constant 0 : i32
    %c0_i32_1 = arith.constant 0 : i32
    return %c0_i32, %c0_i32_0 : i32, i32
  }
  func.func @transform_4(%arg0: i32) -> (i32, i32) {
    %c0_i32 = arith.constant 0 : i32
    %c0_i32_0 = arith.constant 0 : i32
    %c0_i32_1 = arith.constant 0 : i32
    return %c0_i32, %c0_i32_0 : i32, i32
  }
}

module attributes {stable_mosaic.version = 11 : i64} {
  func.func @kernel(%arg0: i32, %arg1: memref<8x128xf32, #tpu.memory_space<vmem>>, %arg2: memref<128x128xf32, #tpu.memory_space<vmem>>, %arg3: memref<8x1xf32, #tpu.memory_space<vmem>>, %arg4: memref<8x1xf32, #tpu.memory_space<vmem>>, %arg5: memref<8x128xf32, #tpu.memory_space<vmem>>) attributes {dimension_semantics = [#tpu.dimension_semantics<arbitrary>], iteration_bounds = array<i64: 1>, scalar_prefetch = 0 : i64, scratch_operands = 0 : i64, tpu.core_type = #tpu.core_type<tc>, window_params = [{pipeline_mode = #tpu.pipeline_mode<synchronous>, transform_indices = @transform_0, window_bounds = array<i64: 8, 128>}, {pipeline_mode = #tpu.pipeline_mode<synchronous>, transform_indices = @transform_1, window_bounds = array<i64: 128, 128>}, {pipeline_mode = #tpu.pipeline_mode<synchronous>, transform_indices = @transform_2, window_bounds = array<i64: 8, 1>}, {pipeline_mode = #tpu.pipeline_mode<synchronous>, transform_indices = @transform_3, window_bounds = array<i64: 8, 1>}, {pipeline_mode = #tpu.pipeline_mode<synchronous>, transform_indices = @transform_4, window_bounds = array<i64: 8, 128>}]} {
    %c0 = arith.constant 0 : index
    %c0_0 = arith.constant 0 : index
    %0 = vector.load %arg1[%c0, %c0_0] : memref<8x128xf32, #tpu.memory_space<vmem>>, vector<8x128xf32>
    %c0_1 = arith.constant 0 : index
    %c0_2 = arith.constant 0 : index
    %1 = vector.load %arg2[%c0_1, %c0_2] : memref<128x128xf32, #tpu.memory_space<vmem>>, vector<128x128xf32>
    %cst = arith.constant dense<0.000000e+00> : vector<8x128xf32>
    %2 = tpu.matmul %0, %1, %cst {dimension_numbers = #tpu.dot_dimension_numbers<[1], [0], [0], [1], [0, 0, 1, 1], [], []>} : vector<8x128xf32>, vector<128x128xf32>, vector<8x128xf32> -> vector<8x128xf32>
    %3 = tpu.iota {dimensions = array<i32: 1>} : vector<8x128xi32>
    %c8_i32 = arith.constant 8 : i32
    %4 = vector.broadcast %c8_i32 : i32 to vector<8x128xi32>
    %5 = arith.cmpi slt, %3, %4 : vector<8x128xi32>
    %cst_3 = arith.constant 0.000000e+00 : f32
    %6 = vector.broadcast %cst_3 : f32 to vector<8x128xf32>
    %7 = arith.select %5, %2, %6 : vector<8x128xi1>, vector<8x128xf32>
    %cst_4 = arith.constant dense<0.000000e+00> : vector<8xf32>
    %8 = vector.multi_reduction <add>, %7, %cst_4 [1] : vector<8x128xf32> to vector<8xf32>
    %9 = vector.shape_cast %8 : vector<8xf32> to vector<8x1xf32>
    %cst_5 = arith.constant 1.250000e-01 : f32
    %10 = vector.broadcast %cst_5 : f32 to vector<8x1xf32>
    %11 = arith.mulf %9, %10 : vector<8x1xf32>
    %12 = vector.broadcast %11 : vector<8x1xf32> to vector<8x128xf32>
    %13 = arith.subf %2, %12 : vector<8x128xf32>
    %cst_6 = arith.constant 0.000000e+00 : f32
    %14 = vector.broadcast %cst_6 : f32 to vector<8x128xf32>
    %15 = arith.select %5, %13, %14 : vector<8x128xi1>, vector<8x128xf32>
    %16 = arith.mulf %15, %15 : vector<8x128xf32>
    %cst_7 = arith.constant dense<0.000000e+00> : vector<8xf32>
    %17 = vector.multi_reduction <add>, %16, %cst_7 [1] : vector<8x128xf32> to vector<8xf32>
    %18 = vector.shape_cast %17 : vector<8xf32> to vector<8x1xf32>
    %cst_8 = arith.constant 1.250000e-01 : f32
    %19 = vector.broadcast %cst_8 : f32 to vector<8x1xf32>
    %20 = arith.mulf %18, %19 : vector<8x1xf32>
    %c0_9 = arith.constant 0 : index
    %c0_10 = arith.constant 0 : index
    %21 = vector.load %arg3[%c0_9, %c0_10] : memref<8x1xf32, #tpu.memory_space<vmem>>, vector<8x1xf32>
    %cst_11 = arith.constant 9.99999974E-6 : f32
    %22 = vector.broadcast %cst_11 : f32 to vector<8x1xf32>
    %23 = arith.addf %20, %22 : vector<8x1xf32>
    %24 = math.rsqrt %23 : vector<8x1xf32>
    %25 = arith.mulf %21, %24 : vector<8x1xf32>
    %26 = vector.broadcast %11 : vector<8x1xf32> to vector<8x128xf32>
    %27 = arith.subf %2, %26 : vector<8x128xf32>
    %28 = vector.broadcast %25 : vector<8x1xf32> to vector<8x128xf32>
    %29 = arith.mulf %27, %28 : vector<8x128xf32>
    %c0_12 = arith.constant 0 : index
    %c0_13 = arith.constant 0 : index
    %30 = vector.load %arg4[%c0_12, %c0_13] : memref<8x1xf32, #tpu.memory_space<vmem>>, vector<8x1xf32>
    %31 = vector.broadcast %30 : vector<8x1xf32> to vector<8x128xf32>
    %32 = arith.addf %29, %31 : vector<8x128xf32>
    %cst_14 = arith.constant 0.000000e+00 : f32
    %33 = vector.broadcast %cst_14 : f32 to vector<8x128xf32>
    %34 = arith.maximumf %32, %33 : vector<8x128xf32>
    %c0_15 = arith.constant 0 : index
    %c0_16 = arith.constant 0 : index
    %35 = vector.load %arg5[%c0_15, %c0_16] : memref<8x128xf32, #tpu.memory_space<vmem>>, vector<8x128xf32>
    tpu.vector_store %arg5[%c0_15, %c0_16], %34 {strides = array<i32>} : memref<8x128xf32, #tpu.memory_space<vmem>>, vector<8x128xf32>,
    return
  }
  func.func @transform_0(%arg0: i32) -> (i32, i32) {
    %c0_i32 = arith.constant 0 : i32
    %c0_i32_0 = arith.constant 0 : i32
    %c0_i32_1 = arith.constant 0 : i32
    return %c0_i32, %c0_i32_0 : i32, i32
  }
  func.func @transform_1(%arg0: i32) -> (i32, i32) {
    %c0_i32 = arith.constant 0 : i32
    %c0_i32_0 = arith.constant 0 : i32
    %c0_i32_1 = arith.constant 0 : i32
    return %c0_i32, %c0_i32_0 : i32, i32
  }
  func.func @transform_2(%arg0: i32) -> (i32, i32) {
    %c0_i32 = arith.constant 0 : i32
    %c0_i32_0 = arith.constant 0 : i32
    %c0_i32_1 = arith.constant 0 : i32
    return %c0_i32, %c0_i32_0 : i32, i32
  }
  func.func @transform_3(%arg0: i32) -> (i32, i32) {
    %c0_i32 = arith.constant 0 : i32
    %c0_i32_0 = arith.constant 0 : i32
    %c0_i32_1 = arith.constant 0 : i32
    return %c0_i32, %c0_i32_0 : i32, i32
  }
  func.func @transform_4(%arg0: i32) -> (i32, i32) {
    %c0_i32 = arith.constant 0 : i32
    %c0_i32_0 = arith.constant 0 : i32
    %c0_i32_1 = arith.constant 0 : i32
    return %c0_i32, %c0_i32_0 : i32, i32
  }
}

module attributes {stable_mosaic.version = 11 : i64} {
  func.func @kernel(%arg0: i32, %arg1: memref<8x128xf32, #tpu.memory_space<vmem>>, %arg2: memref<128x128xf32, #tpu.memory_space<vmem>>, %arg3: memref<8x1xf32, #tpu.memory_space<vmem>>, %arg4: memref<8x1xf32, #tpu.memory_space<vmem>>, %arg5: memref<8x128xf32, #tpu.memory_space<vmem>>) attributes {dimension_semantics = [#tpu.dimension_semantics<arbitrary>], iteration_bounds = array<i64: 1>, scalar_prefetch = 0 : i64, scratch_operands = 0 : i64, tpu.core_type = #tpu.core_type<tc>, window_params = [{pipeline_mode = #tpu.pipeline_mode<synchronous>, transform_indices = @transform_0, window_bounds = array<i64: 8, 128>}, {pipeline_mode = #tpu.pipeline_mode<synchronous>, transform_indices = @transform_1, window_bounds = array<i64: 128, 128>}, {pipeline_mode = #tpu.pipeline_mode<synchronous>, transform_indices = @transform_2, window_bounds = array<i64: 8, 1>}, {pipeline_mode = #tpu.pipeline_mode<synchronous>, transform_indices = @transform_3, window_bounds = array<i64: 8, 1>}, {pipeline_mode = #tpu.pipeline_mode<synchronous>, transform_indices = @transform_4, window_bounds = array<i64: 8, 128>}]} {
    %c0 = arith.constant 0 : index
    %c0_0 = arith.constant 0 : index
    %0 = vector.load %arg1[%c0, %c0_0] : memref<8x128xf32, #tpu.memory_space<vmem>>, vector<8x128xf32>
    %c0_1 = arith.constant 0 : index
    %c0_2 = arith.constant 0 : index
    %1 = vector.load %arg2[%c0_1, %c0_2] : memref<128x128xf32, #tpu.memory_space<vmem>>, vector<128x128xf32>
    %cst = arith.constant dense<0.000000e+00> : vector<8x128xf32>
    %2 = tpu.matmul %0, %1, %cst {dimension_numbers = #tpu.dot_dimension_numbers<[1], [0], [0], [1], [0, 0, 1, 1], [], []>} : vector<8x128xf32>, vector<128x128xf32>, vector<8x128xf32> -> vector<8x128xf32>
    %3 = tpu.iota {dimensions = array<i32: 1>} : vector<8x128xi32>
    %c32_i32 = arith.constant 32 : i32
    %4 = vector.broadcast %c32_i32 : i32 to vector<8x128xi32>
    %5 = arith.cmpi slt, %3, %4 : vector<8x128xi32>
    %cst_3 = arith.constant 0.000000e+00 : f32
    %6 = vector.broadcast %cst_3 : f32 to vector<8x128xf32>
    %7 = arith.select %5, %2, %6 : vector<8x128xi1>, vector<8x128xf32>
    %cst_4 = arith.constant dense<0.000000e+00> : vector<8xf32>
    %8 = vector.multi_reduction <add>, %7, %cst_4 [1] : vector<8x128xf32> to vector<8xf32>
    %9 = vector.shape_cast %8 : vector<8xf32> to vector<8x1xf32>
    %cst_5 = arith.constant 3.125000e-02 : f32
    %10 = vector.broadcast %cst_5 : f32 to vector<8x1xf32>
    %11 = arith.mulf %9, %10 : vector<8x1xf32>
    %12 = vector.broadcast %11 : vector<8x1xf32> to vector<8x128xf32>
    %13 = arith.subf %2, %12 : vector<8x128xf32>
    %cst_6 = arith.constant 0.000000e+00 : f32
    %14 = vector.broadcast %cst_6 : f32 to vector<8x128xf32>
    %15 = arith.select %5, %13, %14 : vector<8x128xi1>, vector<8x128xf32>
    %16 = arith.mulf %15, %15 : vector<8x128xf32>
    %cst_7 = arith.constant dense<0.000000e+00> : vector<8xf32>
    %17 = vector.multi_reduction <add>, %16, %cst_7 [1] : vector<8x128xf32> to vector<8xf32>
    %18 = vector.shape_cast %17 : vector<8xf32> to vector<8x1xf32>
    %cst_8 = arith.constant 3.125000e-02 : f32
    %19 = vector.broadcast %cst_8 : f32 to vector<8x1xf32>
    %20 = arith.mulf %18, %19 : vector<8x1xf32>
    %c0_9 = arith.constant 0 : index
    %c0_10 = arith.constant 0 : index
    %21 = vector.load %arg3[%c0_9, %c0_10] : memref<8x1xf32, #tpu.memory_space<vmem>>, vector<8x1xf32>
    %cst_11 = arith.constant 9.99999974E-6 : f32
    %22 = vector.broadcast %cst_11 : f32 to vector<8x1xf32>
    %23 = arith.addf %20, %22 : vector<8x1xf32>
    %24 = math.rsqrt %23 : vector<8x1xf32>
    %25 = arith.mulf %21, %24 : vector<8x1xf32>
    %26 = vector.broadcast %11 : vector<8x1xf32> to vector<8x128xf32>
    %27 = arith.subf %2, %26 : vector<8x128xf32>
    %28 = vector.broadcast %25 : vector<8x1xf32> to vector<8x128xf32>
    %29 = arith.mulf %27, %28 : vector<8x128xf32>
    %c0_12 = arith.constant 0 : index
    %c0_13 = arith.constant 0 : index
    %30 = vector.load %arg4[%c0_12, %c0_13] : memref<8x1xf32, #tpu.memory_space<vmem>>, vector<8x1xf32>
    %31 = vector.broadcast %30 : vector<8x1xf32> to vector<8x128xf32>
    %32 = arith.addf %29, %31 : vector<8x128xf32>
    %cst_14 = arith.constant 0.000000e+00 : f32
    %33 = vector.broadcast %cst_14 : f32 to vector<8x128xf32>
    %34 = arith.maximumf %32, %33 : vector<8x128xf32>
    %c0_15 = arith.constant 0 : index
    %c0_16 = arith.constant 0 : index
    %35 = vector.load %arg5[%c0_15, %c0_16] : memref<8x128xf32, #tpu.memory_space<vmem>>, vector<8x128xf32>
    tpu.vector_store %arg5[%c0_15, %c0_16], %34 {strides = array<i32>} : memref<8x128xf32, #tpu.memory_space<vmem>>, vector<8x128xf32>,
    return
  }
  func.func @transform_0(%arg0: i32) -> (i32, i32) {
    %c0_i32 = arith.constant 0 : i32
    %c0_i32_0 = arith.constant 0 : i32
    %c0_i32_1 = arith.constant 0 : i32
    return %c0_i32, %c0_i32_0 : i32, i32
  }
  func.func @transform_1(%arg0: i32) -> (i32, i32) {
    %c0_i32 = arith.constant 0 : i32
    %c0_i32_0 = arith.constant 0 : i32
    %c0_i32_1 = arith.constant 0 : i32
    return %c0_i32, %c0_i32_0 : i32, i32
  }
  func.func @transform_2(%arg0: i32) -> (i32, i32) {
    %c0_i32 = arith.constant 0 : i32
    %c0_i32_0 = arith.constant 0 : i32
    %c0_i32_1 = arith.constant 0 : i32
    return %c0_i32, %c0_i32_0 : i32, i32
  }
  func.func @transform_3(%arg0: i32) -> (i32, i32) {
    %c0_i32 = arith.constant 0 : i32
    %c0_i32_0 = arith.constant 0 : i32
    %c0_i32_1 = arith.constant 0 : i32
    return %c0_i32, %c0_i32_0 : i32, i32
  }
  func.func @transform_4(%arg0: i32) -> (i32, i32) {
    %c0_i32 = arith.constant 0 : i32
    %c0_i32_0 = arith.constant 0 : i32
    %c0_i32_1 = arith.constant 0 : i32
    return %c0_i32, %c0_i32_0 : i32, i32
  }
}

module attributes {stable_mosaic.version = 11 : i64} {
  func.func @kernel(%arg0: i32, %arg1: memref<8x128xf32, #tpu.memory_space<vmem>>, %arg2: memref<128x128xf32, #tpu.memory_space<vmem>>, %arg3: memref<8x1xf32, #tpu.memory_space<vmem>>, %arg4: memref<8x1xf32, #tpu.memory_space<vmem>>, %arg5: memref<8x128xf32, #tpu.memory_space<vmem>>) attributes {dimension_semantics = [#tpu.dimension_semantics<arbitrary>], iteration_bounds = array<i64: 1>, scalar_prefetch = 0 : i64, scratch_operands = 0 : i64, tpu.core_type = #tpu.core_type<tc>, window_params = [{pipeline_mode = #tpu.pipeline_mode<synchronous>, transform_indices = @transform_0, window_bounds = array<i64: 8, 128>}, {pipeline_mode = #tpu.pipeline_mode<synchronous>, transform_indices = @transform_1, window_bounds = array<i64: 128, 128>}, {pipeline_mode = #tpu.pipeline_mode<synchronous>, transform_indices = @transform_2, window_bounds = array<i64: 8, 1>}, {pipeline_mode = #tpu.pipeline_mode<synchronous>, transform_indices = @transform_3, window_bounds = array<i64: 8, 1>}, {pipeline_mode = #tpu.pipeline_mode<synchronous>, transform_indices = @transform_4, window_bounds = array<i64: 8, 128>}]} {
    %c0 = arith.constant 0 : index
    %c0_0 = arith.constant 0 : index
    %0 = vector.load %arg1[%c0, %c0_0] : memref<8x128xf32, #tpu.memory_space<vmem>>, vector<8x128xf32>
    %c0_1 = arith.constant 0 : index
    %c0_2 = arith.constant 0 : index
    %1 = vector.load %arg2[%c0_1, %c0_2] : memref<128x128xf32, #tpu.memory_space<vmem>>, vector<128x128xf32>
    %cst = arith.constant dense<0.000000e+00> : vector<8x128xf32>
    %2 = tpu.matmul %0, %1, %cst {dimension_numbers = #tpu.dot_dimension_numbers<[1], [0], [0], [1], [0, 0, 1, 1], [], []>} : vector<8x128xf32>, vector<128x128xf32>, vector<8x128xf32> -> vector<8x128xf32>
    %3 = tpu.iota {dimensions = array<i32: 1>} : vector<8x128xi32>
    %c128_i32 = arith.constant 128 : i32
    %4 = vector.broadcast %c128_i32 : i32 to vector<8x128xi32>
    %5 = arith.cmpi slt, %3, %4 : vector<8x128xi32>
    %cst_3 = arith.constant 0.000000e+00 : f32
    %6 = vector.broadcast %cst_3 : f32 to vector<8x128xf32>
    %7 = arith.select %5, %2, %6 : vector<8x128xi1>, vector<8x128xf32>
    %cst_4 = arith.constant dense<0.000000e+00> : vector<8xf32>
    %8 = vector.multi_reduction <add>, %7, %cst_4 [1] : vector<8x128xf32> to vector<8xf32>
    %9 = vector.shape_cast %8 : vector<8xf32> to vector<8x1xf32>
    %cst_5 = arith.constant 7.812500e-03 : f32
    %10 = vector.broadcast %cst_5 : f32 to vector<8x1xf32>
    %11 = arith.mulf %9, %10 : vector<8x1xf32>
    %12 = vector.broadcast %11 : vector<8x1xf32> to vector<8x128xf32>
    %13 = arith.subf %2, %12 : vector<8x128xf32>
    %cst_6 = arith.constant 0.000000e+00 : f32
    %14 = vector.broadcast %cst_6 : f32 to vector<8x128xf32>
    %15 = arith.select %5, %13, %14 : vector<8x128xi1>, vector<8x128xf32>
    %16 = arith.mulf %15, %15 : vector<8x128xf32>
    %cst_7 = arith.constant dense<0.000000e+00> : vector<8xf32>
    %17 = vector.multi_reduction <add>, %16, %cst_7 [1] : vector<8x128xf32> to vector<8xf32>
    %18 = vector.shape_cast %17 : vector<8xf32> to vector<8x1xf32>
    %cst_8 = arith.constant 7.812500e-03 : f32
    %19 = vector.broadcast %cst_8 : f32 to vector<8x1xf32>
    %20 = arith.mulf %18, %19 : vector<8x1xf32>
    %c0_9 = arith.constant 0 : index
    %c0_10 = arith.constant 0 : index
    %21 = vector.load %arg3[%c0_9, %c0_10] : memref<8x1xf32, #tpu.memory_space<vmem>>, vector<8x1xf32>
    %cst_11 = arith.constant 9.99999974E-6 : f32
    %22 = vector.broadcast %cst_11 : f32 to vector<8x1xf32>
    %23 = arith.addf %20, %22 : vector<8x1xf32>
    %24 = math.rsqrt %23 : vector<8x1xf32>
    %25 = arith.mulf %21, %24 : vector<8x1xf32>
    %26 = vector.broadcast %11 : vector<8x1xf32> to vector<8x128xf32>
    %27 = arith.subf %2, %26 : vector<8x128xf32>
    %28 = vector.broadcast %25 : vector<8x1xf32> to vector<8x128xf32>
    %29 = arith.mulf %27, %28 : vector<8x128xf32>
    %c0_12 = arith.constant 0 : index
    %c0_13 = arith.constant 0 : index
    %30 = vector.load %arg4[%c0_12, %c0_13] : memref<8x1xf32, #tpu.memory_space<vmem>>, vector<8x1xf32>
    %31 = vector.broadcast %30 : vector<8x1xf32> to vector<8x128xf32>
    %32 = arith.addf %29, %31 : vector<8x128xf32>
    %cst_14 = arith.constant 0.000000e+00 : f32
    %33 = vector.broadcast %cst_14 : f32 to vector<8x128xf32>
    %34 = arith.maximumf %32, %33 : vector<8x128xf32>
    %c0_15 = arith.constant 0 : index
    %c0_16 = arith.constant 0 : index
    %35 = vector.load %arg5[%c0_15, %c0_16] : memref<8x128xf32, #tpu.memory_space<vmem>>, vector<8x128xf32>
    tpu.vector_store %arg5[%c0_15, %c0_16], %34 {strides = array<i32>} : memref<8x128xf32, #tpu.memory_space<vmem>>, vector<8x128xf32>,
    return
  }
  func.func @transform_0(%arg0: i32) -> (i32, i32) {
    %c0_i32 = arith.constant 0 : i32
    %c0_i32_0 = arith.constant 0 : i32
    %c0_i32_1 = arith.constant 0 : i32
    return %c0_i32, %c0_i32_0 : i32, i32
  }
  func.func @transform_1(%arg0: i32) -> (i32, i32) {
    %c0_i32 = arith.constant 0 : i32
    %c0_i32_0 = arith.constant 0 : i32
    %c0_i32_1 = arith.constant 0 : i32
    return %c0_i32, %c0_i32_0 : i32, i32
  }
  func.func @transform_2(%arg0: i32) -> (i32, i32) {
    %c0_i32 = arith.constant 0 : i32
    %c0_i32_0 = arith.constant 0 : i32
    %c0_i32_1 = arith.constant 0 : i32
    return %c0_i32, %c0_i32_0 : i32, i32
  }
  func.func @transform_3(%arg0: i32) -> (i32, i32) {
    %c0_i32 = arith.constant 0 : i32
    %c0_i32_0 = arith.constant 0 : i32
    %c0_i32_1 = arith.constant 0 : i32
    return %c0_i32, %c0_i32_0 : i32, i32
  }
  func.func @transform_4(%arg0: i32) -> (i32, i32) {
    %c0_i32 = arith.constant 0 : i32
    %c0_i32_0 = arith.constant 0 : i32
    %c0_i32_1 = arith.constant 0 : i32
    return %c0_i32, %c0_i32_0 : i32, i32
  }
}

module attributes {stable_mosaic.version = 11 : i64} {
  func.func @kernel(%arg0: i32, %arg1: memref<8x128xf32, #tpu.memory_space<vmem>>, %arg2: memref<128x512xf32, #tpu.memory_space<vmem>>, %arg3: memref<8x1xf32, #tpu.memory_space<vmem>>, %arg4: memref<8x1xf32, #tpu.memory_space<vmem>>, %arg5: memref<8x1xf32, #tpu.memory_space<vmem>>, %arg6: memref<8x512xf32, #tpu.memory_space<vmem>>, %arg7: memref<8x512xf32, #tpu.memory_space<vmem>>) attributes {dimension_semantics = [#tpu.dimension_semantics<arbitrary>], iteration_bounds = array<i64: 1>, scalar_prefetch = 0 : i64, scratch_operands = 0 : i64, tpu.core_type = #tpu.core_type<tc>, window_params = [{pipeline_mode = #tpu.pipeline_mode<synchronous>, transform_indices = @transform_0, window_bounds = array<i64: 8, 128>}, {pipeline_mode = #tpu.pipeline_mode<synchronous>, transform_indices = @transform_1, window_bounds = array<i64: 128, 512>}, {pipeline_mode = #tpu.pipeline_mode<synchronous>, transform_indices = @transform_2, window_bounds = array<i64: 8, 1>}, {pipeline_mode = #tpu.pipeline_mode<synchronous>, transform_indices = @transform_3, window_bounds = array<i64: 8, 1>}, {pipeline_mode = #tpu.pipeline_mode<synchronous>, transform_indices = @transform_4, window_bounds = array<i64: 8, 1>}, {pipeline_mode = #tpu.pipeline_mode<synchronous>, transform_indices = @transform_5, window_bounds = array<i64: 8, 512>}, {pipeline_mode = #tpu.pipeline_mode<synchronous>, transform_indices = @transform_6, window_bounds = array<i64: 8, 512>}]} {
    %c0 = arith.constant 0 : index
    %c0_0 = arith.constant 0 : index
    %0 = vector.load %arg1[%c0, %c0_0] : memref<8x128xf32, #tpu.memory_space<vmem>>, vector<8x128xf32>
    %c0_1 = arith.constant 0 : index
    %c0_2 = arith.constant 0 : index
    %1 = vector.load %arg2[%c0_1, %c0_2] : memref<128x512xf32, #tpu.memory_space<vmem>>, vector<128x512xf32>
    %cst = arith.constant dense<0.000000e+00> : vector<8x512xf32>
    %2 = tpu.matmul %0, %1, %cst {dimension_numbers = #tpu.dot_dimension_numbers<[1], [0], [0], [1], [0, 0, 1, 1], [], []>} : vector<8x128xf32>, vector<128x512xf32>, vector<8x512xf32> -> vector<8x512xf32>
    %c0_3 = arith.constant 0 : index
    %c0_4 = arith.constant 0 : index
    %3 = vector.load %arg3[%c0_3, %c0_4] : memref<8x1xf32, #tpu.memory_space<vmem>>, vector<8x1xf32>
    %4 = vector.broadcast %3 : vector<8x1xf32> to vector<8x512xf32>
    %5 = arith.addf %2, %4 : vector<8x512xf32>
    %c0_5 = arith.constant 0 : index
    %c0_6 = arith.constant 0 : index
    %6 = vector.load %arg6[%c0_5, %c0_6] : memref<8x512xf32, #tpu.memory_space<vmem>>, vector<8x512xf32>
    tpu.vector_store %arg6[%c0_5, %c0_6], %5 {strides = array<i32>} : memref<8x512xf32, #tpu.memory_space<vmem>>, vector<8x512xf32>,
    %7 = tpu.iota {dimensions = array<i32: 1>} : vector<8x512xi32>
    %c512_i32 = arith.constant 512 : i32
    %8 = vector.broadcast %c512_i32 : i32 to vector<8x512xi32>
    %9 = arith.cmpi slt, %7, %8 : vector<8x512xi32>
    %cst_7 = arith.constant 0.000000e+00 : f32
    %10 = vector.broadcast %cst_7 : f32 to vector<8x512xf32>
    %11 = arith.select %9, %5, %10 : vector<8x512xi1>, vector<8x512xf32>
    %cst_8 = arith.constant dense<0.000000e+00> : vector<8xf32>
    %12 = vector.multi_reduction <add>, %11, %cst_8 [1] : vector<8x512xf32> to vector<8xf32>
    %13 = vector.shape_cast %12 : vector<8xf32> to vector<8x1xf32>
    %cst_9 = arith.constant 0.001953125 : f32
    %14 = vector.broadcast %cst_9 : f32 to vector<8x1xf32>
    %15 = arith.mulf %13, %14 : vector<8x1xf32>
    %16 = vector.broadcast %15 : vector<8x1xf32> to vector<8x512xf32>
    %17 = arith.subf %5, %16 : vector<8x512xf32>
    %cst_10 = arith.constant 0.000000e+00 : f32
    %18 = vector.broadcast %cst_10 : f32 to vector<8x512xf32>
    %19 = arith.select %9, %17, %18 : vector<8x512xi1>, vector<8x512xf32>
    %20 = arith.mulf %19, %19 : vector<8x512xf32>
    %cst_11 = arith.constant dense<0.000000e+00> : vector<8xf32>
    %21 = vector.multi_reduction <add>, %20, %cst_11 [1] : vector<8x512xf32> to vector<8xf32>
    %22 = vector.shape_cast %21 : vector<8xf32> to vector<8x1xf32>
    %cst_12 = arith.constant 0.001953125 : f32
    %23 = vector.broadcast %cst_12 : f32 to vector<8x1xf32>
    %24 = arith.mulf %22, %23 : vector<8x1xf32>
    %c0_13 = arith.constant 0 : index
    %c0_14 = arith.constant 0 : index
    %25 = vector.load %arg4[%c0_13, %c0_14] : memref<8x1xf32, #tpu.memory_space<vmem>>, vector<8x1xf32>
    %cst_15 = arith.constant 9.99999974E-6 : f32
    %26 = vector.broadcast %cst_15 : f32 to vector<8x1xf32>
    %27 = arith.addf %24, %26 : vector<8x1xf32>
    %28 = math.rsqrt %27 : vector<8x1xf32>
    %29 = arith.mulf %25, %28 : vector<8x1xf32>
    %30 = vector.broadcast %15 : vector<8x1xf32> to vector<8x512xf32>
    %31 = arith.subf %5, %30 : vector<8x512xf32>
    %32 = vector.broadcast %29 : vector<8x1xf32> to vector<8x512xf32>
    %33 = arith.mulf %31, %32 : vector<8x512xf32>
    %c0_16 = arith.constant 0 : index
    %c0_17 = arith.constant 0 : index
    %34 = vector.load %arg5[%c0_16, %c0_17] : memref<8x1xf32, #tpu.memory_space<vmem>>, vector<8x1xf32>
    %35 = vector.broadcast %34 : vector<8x1xf32> to vector<8x512xf32>
    %36 = arith.addf %33, %35 : vector<8x512xf32>
    %cst_18 = arith.constant 0.000000e+00 : f32
    %37 = vector.broadcast %cst_18 : f32 to vector<8x512xf32>
    %38 = arith.maximumf %36, %37 : vector<8x512xf32>
    %c0_19 = arith.constant 0 : index
    %c0_20 = arith.constant 0 : index
    %39 = vector.load %arg7[%c0_19, %c0_20] : memref<8x512xf32, #tpu.memory_space<vmem>>, vector<8x512xf32>
    tpu.vector_store %arg7[%c0_19, %c0_20], %38 {strides = array<i32>} : memref<8x512xf32, #tpu.memory_space<vmem>>, vector<8x512xf32>,
    return
  }
  func.func @transform_0(%arg0: i32) -> (i32, i32) {
    %c0_i32 = arith.constant 0 : i32
    %c0_i32_0 = arith.constant 0 : i32
    %c0_i32_1 = arith.constant 0 : i32
    return %c0_i32, %c0_i32_0 : i32, i32
  }
  func.func @transform_1(%arg0: i32) -> (i32, i32) {
    %c0_i32 = arith.constant 0 : i32
    %c0_i32_0 = arith.constant 0 : i32
    %c0_i32_1 = arith.constant 0 : i32
    return %c0_i32, %c0_i32_0 : i32, i32
  }
  func.func @transform_2(%arg0: i32) -> (i32, i32) {
    %c0_i32 = arith.constant 0 : i32
    %c0_i32_0 = arith.constant 0 : i32
    %c0_i32_1 = arith.constant 0 : i32
    return %c0_i32, %c0_i32_0 : i32, i32
  }
  func.func @transform_3(%arg0: i32) -> (i32, i32) {
    %c0_i32 = arith.constant 0 : i32
    %c0_i32_0 = arith.constant 0 : i32
    %c0_i32_1 = arith.constant 0 : i32
    return %c0_i32, %c0_i32_0 : i32, i32
  }
  func.func @transform_4(%arg0: i32) -> (i32, i32) {
    %c0_i32 = arith.constant 0 : i32
    %c0_i32_0 = arith.constant 0 : i32
    %c0_i32_1 = arith.constant 0 : i32
    return %c0_i32, %c0_i32_0 : i32, i32
  }
  func.func @transform_5(%arg0: i32) -> (i32, i32) {
    %c0_i32 = arith.constant 0 : i32
    %c0_i32_0 = arith.constant 0 : i32
    %c0_i32_1 = arith.constant 0 : i32
    return %c0_i32, %c0_i32_0 : i32, i32
  }
  func.func @transform_6(%arg0: i32) -> (i32, i32) {
    %c0_i32 = arith.constant 0 : i32
    %c0_i32_0 = arith.constant 0 : i32
    %c0_i32_1 = arith.constant 0 : i32
    return %c0_i32, %c0_i32_0 : i32, i32
  }
}

module attributes {stable_mosaic.version = 11 : i64} {
  func.func @kernel(%arg0: i32, %arg1: memref<8x128xf32, #tpu.memory_space<vmem>>, %arg2: memref<128x512xf32, #tpu.memory_space<vmem>>, %arg3: memref<8x1xf32, #tpu.memory_space<vmem>>, %arg4: memref<8x1xf32, #tpu.memory_space<vmem>>, %arg5: memref<8x512xf32, #tpu.memory_space<vmem>>) attributes {dimension_semantics = [#tpu.dimension_semantics<arbitrary>], iteration_bounds = array<i64: 1>, scalar_prefetch = 0 : i64, scratch_operands = 0 : i64, tpu.core_type = #tpu.core_type<tc>, window_params = [{pipeline_mode = #tpu.pipeline_mode<synchronous>, transform_indices = @transform_0, window_bounds = array<i64: 8, 128>}, {pipeline_mode = #tpu.pipeline_mode<synchronous>, transform_indices = @transform_1, window_bounds = array<i64: 128, 512>}, {pipeline_mode = #tpu.pipeline_mode<synchronous>, transform_indices = @transform_2, window_bounds = array<i64: 8, 1>}, {pipeline_mode = #tpu.pipeline_mode<synchronous>, transform_indices = @transform_3, window_bounds = array<i64: 8, 1>}, {pipeline_mode = #tpu.pipeline_mode<synchronous>, transform_indices = @transform_4, window_bounds = array<i64: 8, 512>}]} {
    %c0 = arith.constant 0 : index
    %c0_0 = arith.constant 0 : index
    %0 = vector.load %arg1[%c0, %c0_0] : memref<8x128xf32, #tpu.memory_space<vmem>>, vector<8x128xf32>
    %c0_1 = arith.constant 0 : index
    %c0_2 = arith.constant 0 : index
    %1 = vector.load %arg2[%c0_1, %c0_2] : memref<128x512xf32, #tpu.memory_space<vmem>>, vector<128x512xf32>
    %cst = arith.constant dense<0.000000e+00> : vector<8x512xf32>
    %2 = tpu.matmul %0, %1, %cst {dimension_numbers = #tpu.dot_dimension_numbers<[1], [0], [0], [1], [0, 0, 1, 1], [], []>} : vector<8x128xf32>, vector<128x512xf32>, vector<8x512xf32> -> vector<8x512xf32>
    %3 = tpu.iota {dimensions = array<i32: 1>} : vector<8x512xi32>
    %c512_i32 = arith.constant 512 : i32
    %4 = vector.broadcast %c512_i32 : i32 to vector<8x512xi32>
    %5 = arith.cmpi slt, %3, %4 : vector<8x512xi32>
    %cst_3 = arith.constant 0.000000e+00 : f32
    %6 = vector.broadcast %cst_3 : f32 to vector<8x512xf32>
    %7 = arith.select %5, %2, %6 : vector<8x512xi1>, vector<8x512xf32>
    %cst_4 = arith.constant dense<0.000000e+00> : vector<8xf32>
    %8 = vector.multi_reduction <add>, %7, %cst_4 [1] : vector<8x512xf32> to vector<8xf32>
    %9 = vector.shape_cast %8 : vector<8xf32> to vector<8x1xf32>
    %cst_5 = arith.constant 0.001953125 : f32
    %10 = vector.broadcast %cst_5 : f32 to vector<8x1xf32>
    %11 = arith.mulf %9, %10 : vector<8x1xf32>
    %12 = vector.broadcast %11 : vector<8x1xf32> to vector<8x512xf32>
    %13 = arith.subf %2, %12 : vector<8x512xf32>
    %cst_6 = arith.constant 0.000000e+00 : f32
    %14 = vector.broadcast %cst_6 : f32 to vector<8x512xf32>
    %15 = arith.select %5, %13, %14 : vector<8x512xi1>, vector<8x512xf32>
    %16 = arith.mulf %15, %15 : vector<8x512xf32>
    %cst_7 = arith.constant dense<0.000000e+00> : vector<8xf32>
    %17 = vector.multi_reduction <add>, %16, %cst_7 [1] : vector<8x512xf32> to vector<8xf32>
    %18 = vector.shape_cast %17 : vector<8xf32> to vector<8x1xf32>
    %cst_8 = arith.constant 0.001953125 : f32
    %19 = vector.broadcast %cst_8 : f32 to vector<8x1xf32>
    %20 = arith.mulf %18, %19 : vector<8x1xf32>
    %c0_9 = arith.constant 0 : index
    %c0_10 = arith.constant 0 : index
    %21 = vector.load %arg3[%c0_9, %c0_10] : memref<8x1xf32, #tpu.memory_space<vmem>>, vector<8x1xf32>
    %cst_11 = arith.constant 9.99999974E-6 : f32
    %22 = vector.broadcast %cst_11 : f32 to vector<8x1xf32>
    %23 = arith.addf %20, %22 : vector<8x1xf32>
    %24 = math.rsqrt %23 : vector<8x1xf32>
    %25 = arith.mulf %21, %24 : vector<8x1xf32>
    %26 = vector.broadcast %11 : vector<8x1xf32> to vector<8x512xf32>
    %27 = arith.subf %2, %26 : vector<8x512xf32>
    %28 = vector.broadcast %25 : vector<8x1xf32> to vector<8x512xf32>
    %29 = arith.mulf %27, %28 : vector<8x512xf32>
    %c0_12 = arith.constant 0 : index
    %c0_13 = arith.constant 0 : index
    %30 = vector.load %arg4[%c0_12, %c0_13] : memref<8x1xf32, #tpu.memory_space<vmem>>, vector<8x1xf32>
    %31 = vector.broadcast %30 : vector<8x1xf32> to vector<8x512xf32>
    %32 = arith.addf %29, %31 : vector<8x512xf32>
    %cst_14 = arith.constant 0.000000e+00 : f32
    %33 = vector.broadcast %cst_14 : f32 to vector<8x512xf32>
    %34 = arith.maximumf %32, %33 : vector<8x512xf32>
    %c0_15 = arith.constant 0 : index
    %c0_16 = arith.constant 0 : index
    %35 = vector.load %arg5[%c0_15, %c0_16] : memref<8x512xf32, #tpu.memory_space<vmem>>, vector<8x512xf32>
    tpu.vector_store %arg5[%c0_15, %c0_16], %34 {strides = array<i32>} : memref<8x512xf32, #tpu.memory_space<vmem>>, vector<8x512xf32>,
    return
  }
  func.func @transform_0(%arg0: i32) -> (i32, i32) {
    %c0_i32 = arith.constant 0 : i32
    %c0_i32_0 = arith.constant 0 : i32
    %c0_i32_1 = arith.constant 0 : i32
    return %c0_i32, %c0_i32_0 : i32, i32
  }
  func.func @transform_1(%arg0: i32) -> (i32, i32) {
    %c0_i32 = arith.constant 0 : i32
    %c0_i32_0 = arith.constant 0 : i32
    %c0_i32_1 = arith.constant 0 : i32
    return %c0_i32, %c0_i32_0 : i32, i32
  }
  func.func @transform_2(%arg0: i32) -> (i32, i32) {
    %c0_i32 = arith.constant 0 : i32
    %c0_i32_0 = arith.constant 0 : i32
    %c0_i32_1 = arith.constant 0 : i32
    return %c0_i32, %c0_i32_0 : i32, i32
  }
  func.func @transform_3(%arg0: i32) -> (i32, i32) {
    %c0_i32 = arith.constant 0 : i32
    %c0_i32_0 = arith.constant 0 : i32
    %c0_i32_1 = arith.constant 0 : i32
    return %c0_i32, %c0_i32_0 : i32, i32
  }
  func.func @transform_4(%arg0: i32) -> (i32, i32) {
    %c0_i32 = arith.constant 0 : i32
    %c0_i32_0 = arith.constant 0 : i32
    %c0_i32_1 = arith.constant 0 : i32
    return %c0_i32, %c0_i32_0 : i32, i32
  }
}

module attributes {stable_mosaic.version = 11 : i64} {
  func.func @kernel(%arg0: i32, %arg1: memref<8x128xf32, #tpu.memory_space<vmem>>, %arg2: memref<128x512xf32, #tpu.memory_space<vmem>>, %arg3: memref<8x512xf32, #tpu.memory_space<vmem>>, %arg4: memref<8x512xf32, #tpu.memory_space<vmem>>) attributes {dimension_semantics = [#tpu.dimension_semantics<arbitrary>], iteration_bounds = array<i64: 1>, scalar_prefetch = 0 : i64, scratch_operands = 0 : i64, tpu.core_type = #tpu.core_type<tc>, window_params = [{pipeline_mode = #tpu.pipeline_mode<synchronous>, transform_indices = @transform_0, window_bounds = array<i64: 8, 128>}, {pipeline_mode = #tpu.pipeline_mode<synchronous>, transform_indices = @transform_1, window_bounds = array<i64: 128, 512>}, {pipeline_mode = #tpu.pipeline_mode<synchronous>, transform_indices = @transform_2, window_bounds = array<i64: 8, 512>}, {pipeline_mode = #tpu.pipeline_mode<synchronous>, transform_indices = @transform_3, window_bounds = array<i64: 8, 512>}]} {
    %c0 = arith.constant 0 : index
    %c0_0 = arith.constant 0 : index
    %0 = vector.load %arg1[%c0, %c0_0] : memref<8x128xf32, #tpu.memory_space<vmem>>, vector<8x128xf32>
    %c0_1 = arith.constant 0 : index
    %c0_2 = arith.constant 0 : index
    %1 = vector.load %arg2[%c0_1, %c0_2] : memref<128x512xf32, #tpu.memory_space<vmem>>, vector<128x512xf32>
    %cst = arith.constant dense<0.000000e+00> : vector<8x512xf32>
    %2 = tpu.matmul %0, %1, %cst {dimension_numbers = #tpu.dot_dimension_numbers<[1], [0], [0], [1], [0, 0, 1, 1], [], []>} : vector<8x128xf32>, vector<128x512xf32>, vector<8x512xf32> -> vector<8x512xf32>
    %c0_3 = arith.constant 0 : index
    %c0_4 = arith.constant 0 : index
    %3 = vector.load %arg3[%c0_3, %c0_4] : memref<8x512xf32, #tpu.memory_space<vmem>>, vector<8x512xf32>
    %4 = arith.addf %2, %3 : vector<8x512xf32>
    %5 = arith.negf %4 : vector<8x512xf32>
    %6 = math.exp %5 : vector<8x512xf32>
    %cst_5 = arith.constant 1.000000e+00 : f32
    %7 = vector.broadcast %cst_5 : f32 to vector<8x512xf32>
    %8 = arith.addf %7, %6 : vector<8x512xf32>
    %9 = arith.divf %7, %8 : vector<8x512xf32>
    %c0_6 = arith.constant 0 : index
    %c0_7 = arith.constant 0 : index
    %10 = vector.load %arg4[%c0_6, %c0_7] : memref<8x512xf32, #tpu.memory_space<vmem>>, vector<8x512xf32>
    tpu.vector_store %arg4[%c0_6, %c0_7], %9 {strides = array<i32>} : memref<8x512xf32, #tpu.memory_space<vmem>>, vector<8x512xf32>,
    return
  }
  func.func @transform_0(%arg0: i32) -> (i32, i32) {
    %c0_i32 = arith.constant 0 : i32
    %c0_i32_0 = arith.constant 0 : i32
    %c0_i32_1 = arith.constant 0 : i32
    return %c0_i32, %c0_i32_0 : i32, i32
  }
  func.func @transform_1(%arg0: i32) -> (i32, i32) {
    %c0_i32 = arith.constant 0 : i32
    %c0_i32_0 = arith.constant 0 : i32
    %c0_i32_1 = arith.constant 0 : i32
    return %c0_i32, %c0_i32_0 : i32, i32
  }
  func.func @transform_2(%arg0: i32) -> (i32, i32) {
    %c0_i32 = arith.constant 0 : i32
    %c0_i32_0 = arith.constant 0 : i32
    %c0_i32_1 = arith.constant 0 : i32
    return %c0_i32, %c0_i32_0 : i32, i32
  }
  func.func @transform_3(%arg0: i32) -> (i32, i32) {
    %c0_i32 = arith.constant 0 : i32
    %c0_i32_0 = arith.constant 0 : i32
    %c0_i32_1 = arith.constant 0 : i32
    return %c0_i32, %c0_i32_0 : i32, i32
  }
}

module attributes {stable_mosaic.version = 11 : i64} {
  func.func @kernel(%arg0: i32, %arg1: memref<8x128xf32, #tpu.memory_space<vmem>>, %arg2: memref<128x128xf32, #tpu.memory_space<vmem>>, %arg3: memref<8x1xf32, #tpu.memory_space<vmem>>, %arg4: memref<8x128xf32, #tpu.memory_space<vmem>>) attributes {dimension_semantics = [#tpu.dimension_semantics<arbitrary>], iteration_bounds = array<i64: 1>, scalar_prefetch = 0 : i64, scratch_operands = 0 : i64, tpu.core_type = #tpu.core_type<tc>, window_params = [{pipeline_mode = #tpu.pipeline_mode<synchronous>, transform_indices = @transform_0, window_bounds = array<i64: 8, 128>}, {pipeline_mode = #tpu.pipeline_mode<synchronous>, transform_indices = @transform_1, window_bounds = array<i64: 128, 128>}, {pipeline_mode = #tpu.pipeline_mode<synchronous>, transform_indices = @transform_2, window_bounds = array<i64: 8, 1>}, {pipeline_mode = #tpu.pipeline_mode<synchronous>, transform_indices = @transform_3, window_bounds = array<i64: 8, 128>}]} {
    %c0 = arith.constant 0 : index
    %c0_0 = arith.constant 0 : index
    %0 = vector.load %arg1[%c0, %c0_0] : memref<8x128xf32, #tpu.memory_space<vmem>>, vector<8x128xf32>
    %c0_1 = arith.constant 0 : index
    %c0_2 = arith.constant 0 : index
    %1 = vector.load %arg2[%c0_1, %c0_2] : memref<128x128xf32, #tpu.memory_space<vmem>>, vector<128x128xf32>
    %cst = arith.constant dense<0.000000e+00> : vector<8x128xf32>
    %2 = tpu.matmul %0, %1, %cst {dimension_numbers = #tpu.dot_dimension_numbers<[1], [0], [0], [1], [0, 0, 1, 1], [], []>} : vector<8x128xf32>, vector<128x128xf32>, vector<8x128xf32> -> vector<8x128xf32>
    %c0_3 = arith.constant 0 : index
    %c0_4 = arith.constant 0 : index
    %3 = vector.load %arg3[%c0_3, %c0_4] : memref<8x1xf32, #tpu.memory_space<vmem>>, vector<8x1xf32>
    %4 = vector.broadcast %3 : vector<8x1xf32> to vector<8x128xf32>
    %5 = arith.addf %2, %4 : vector<8x128xf32>
    %c0_5 = arith.constant 0 : index
    %c0_6 = arith.constant 0 : index
    %6 = vector.load %arg4[%c0_5, %c0_6] : memref<8x128xf32, #tpu.memory_space<vmem>>, vector<8x128xf32>
    tpu.vector_store %arg4[%c0_5, %c0_6], %5 {strides = array<i32>} : memref<8x128xf32, #tpu.memory_space<vmem>>, vector<8x128xf32>,
    return
  }
  func.func @transform_0(%arg0: i32) -> (i32, i32) {
    %c0_i32 = arith.constant 0 : i32
    %c0_i32_0 = arith.constant 0 : i32
    %c0_i32_1 = arith.constant 0 : i32
    return %c0_i32, %c0_i32_0 : i32, i32
  }
  func.func @transform_1(%arg0: i32) -> (i32, i32) {
    %c0_i32 = arith.constant 0 : i32
    %c0_i32_0 = arith.constant 0 : i32
    %c0_i32_1 = arith.constant 0 : i32
    return %c0_i32, %c0_i32_0 : i32, i32
  }
  func.func @transform_2(%arg0: i32) -> (i32, i32) {
    %c0_i32 = arith.constant 0 : i32
    %c0_i32_0 = arith.constant 0 : i32
    %c0_i32_1 = arith.constant 0 : i32
    return %c0_i32, %c0_i32_0 : i32, i32
  }
  func.func @transform_3(%arg0: i32) -> (i32, i32) {
    %c0_i32 = arith.constant 0 : i32
    %c0_i32_0 = arith.constant 0 : i32
    %c0_i32_1 = arith.constant 0 : i32
    return %c0_i32, %c0_i32_0 : i32, i32
  }
}

module attributes {stable_mosaic.version = 11 : i64} {
  func.func @kernel(%arg0: i32, %arg1: memref<16x128xf32, #tpu.memory_space<vmem>>, %arg2: memref<8x512xf32, #tpu.memory_space<vmem>>, %arg3: memref<8x512xf32, #tpu.memory_space<vmem>>, %arg4: memref<8x128xf32, #tpu.memory_space<vmem>>, %arg5: memref<16x128xf32, #tpu.memory_space<vmem>>, %arg6: memref<3xf32, #tpu.memory_space<smem>>) attributes {dimension_semantics = [#tpu.dimension_semantics<arbitrary>], iteration_bounds = array<i64: 1>, scalar_prefetch = 0 : i64, scratch_operands = 0 : i64, tpu.core_type = #tpu.core_type<tc>, window_params = [{pipeline_mode = #tpu.pipeline_mode<synchronous>, transform_indices = @transform_0, window_bounds = array<i64: 16, 128>}, {pipeline_mode = #tpu.pipeline_mode<synchronous>, transform_indices = @transform_1, window_bounds = array<i64: 8, 512>}, {pipeline_mode = #tpu.pipeline_mode<synchronous>, transform_indices = @transform_2, window_bounds = array<i64: 8, 512>}, {pipeline_mode = #tpu.pipeline_mode<synchronous>, transform_indices = @transform_3, window_bounds = array<i64: 8, 128>}, {pipeline_mode = #tpu.pipeline_mode<synchronous>, transform_indices = @transform_4, window_bounds = array<i64: 16, 128>}, {transform_indices = @transform_5, window_bounds = array<i64: 3>}]} {
    %c0 = arith.constant 0 : index
    %c0_0 = arith.constant 0 : index
    %0 = vector.load %arg1[%c0, %c0_0] : memref<16x128xf32, #tpu.memory_space<vmem>>, vector<16x128xf32>
    %1 = vector.extract_strided_slice %0 {offsets = [0, 0], sizes = [8, 128], strides = [1, 1]} : vector<16x128xf32> to vector<8x128xf32>
    %2 = vector.extract_strided_slice %0 {offsets = [8, 0], sizes = [8, 128], strides = [1, 1]} : vector<16x128xf32> to vector<8x128xf32>
    %3 = tpu.iota {dimensions = array<i32: 1>} : vector<8x128xi32>
    %c2_i32 = arith.constant 2 : i32
    %4 = vector.broadcast %c2_i32 : i32 to vector<8x128xi32>
    %5 = arith.cmpi slt, %3, %4 : vector<8x128xi32>
    %6 = math.exp %2 : vector<8x128xf32>
    %7 = arith.mulf %1, %1 : vector<8x128xf32>
    %8 = arith.addf %6, %7 : vector<8x128xf32>
    %9 = arith.subf %8, %2 : vector<8x128xf32>
    %cst = arith.constant 1.000000e+00 : f32
    %10 = vector.broadcast %cst : f32 to vector<8x128xf32>
    %11 = arith.subf %9, %10 : vector<8x128xf32>
    %cst_1 = arith.constant 0.000000e+00 : f32
    %12 = vector.broadcast %cst_1 : f32 to vector<8x128xf32>
    %13 = arith.select %5, %11, %12 : vector<8x128xi1>, vector<8x128xf32>
    %14 = vector.shape_cast %13 : vector<8x128xf32> to vector<1x8x128xf32>
    %cst_2 = arith.constant dense<0.000000e+00> : vector<1xf32>
    %15 = vector.multi_reduction <add>, %14, %cst_2 [1, 2] : vector<1x8x128xf32> to vector<1xf32>
    %16 = vector.shape_cast %15 : vector<1xf32> to vector<1x1x1xf32>
    %17 = vector.extract %16[0, 0, 0] : f32 from vector<1x1x1xf32>
    %cst_3 = arith.constant 5.000000e-01 : f32
    %18 = arith.mulf %cst_3, %17 : f32
    %c0_4 = arith.constant 0 : index
    %c0_5 = arith.constant 0 : index
    %19 = vector.load %arg2[%c0_4, %c0_5] : memref<8x512xf32, #tpu.memory_space<vmem>>, vector<8x512xf32>
    %c0_6 = arith.constant 0 : index
    %c0_7 = arith.constant 0 : index
    %20 = vector.load %arg3[%c0_6, %c0_7] : memref<8x512xf32, #tpu.memory_space<vmem>>, vector<8x512xf32>
    %21 = tpu.iota {dimensions = array<i32: 0>} : vector<8x512xi32>
    %c3_i32 = arith.constant 3 : i32
    %22 = vector.broadcast %c3_i32 : i32 to vector<8x512xi32>
    %23 = arith.cmpi slt, %21, %22 : vector<8x512xi32>
    %24 = tpu.iota {dimensions = array<i32: 1>} : vector<8x512xi32>
    %c512_i32 = arith.constant 512 : i32
    %25 = vector.broadcast %c512_i32 : i32 to vector<8x512xi32>
    %26 = arith.cmpi slt, %24, %25 : vector<8x512xi32>
    %27 = arith.andi %23, %26 : vector<8x512xi1>
    %28 = arith.negf %19 : vector<8x512xf32>
    %29 = math.exp %28 : vector<8x512xf32>
    %cst_8 = arith.constant 1.000000e+00 : f32
    %30 = vector.broadcast %cst_8 : f32 to vector<8x512xf32>
    %31 = arith.addf %30, %29 : vector<8x512xf32>
    %32 = arith.divf %30, %31 : vector<8x512xf32>
    %33 = arith.subf %32, %20 : vector<8x512xf32>
    %34 = arith.mulf %33, %33 : vector<8x512xf32>
    %cst_9 = arith.constant 0.000000e+00 : f32
    %35 = vector.broadcast %cst_9 : f32 to vector<8x512xf32>
    %36 = arith.select %27, %34, %35 : vector<8x512xi1>, vector<8x512xf32>
    %37 = vector.shape_cast %36 : vector<8x512xf32> to vector<1x8x512xf32>
    %cst_10 = arith.constant dense<0.000000e+00> : vector<1xf32>
    %38 = vector.multi_reduction <add>, %37, %cst_10 [1, 2] : vector<1x8x512xf32> to vector<1xf32>
    %39 = vector.shape_cast %38 : vector<1xf32> to vector<1x1x1xf32>
    %40 = vector.extract %39[0, 0, 0] : f32 from vector<1x1x1xf32>
    %c0_11 = arith.constant 0 : index
    %c0_12 = arith.constant 0 : index
    %41 = vector.load %arg4[%c0_11, %c0_12] : memref<8x128xf32, #tpu.memory_space<vmem>>, vector<8x128xf32>
    %42 = tpu.iota {dimensions = array<i32: 0>} : vector<8x128xi32>
    %c1_i32 = arith.constant 1 : i32
    %43 = vector.broadcast %c1_i32 : i32 to vector<8x128xi32>
    %44 = arith.cmpi slt, %42, %43 : vector<8x128xi32>
    %45 = tpu.iota {dimensions = array<i32: 1>} : vector<8x128xi32>
    %c2_i32_13 = arith.constant 2 : i32
    %46 = vector.broadcast %c2_i32_13 : i32 to vector<8x128xi32>
    %47 = arith.cmpi slt, %45, %46 : vector<8x128xi32>
    %48 = arith.andi %44, %47 : vector<8x128xi1>
    %cst_14 = arith.constant 0.000000e+00 : f32
    %49 = vector.broadcast %cst_14 : f32 to vector<8x128xf32>
    %50 = arith.subf %49, %41 : vector<8x128xf32>
    %cst_15 = arith.constant 0.000000e+00 : f32
    %51 = vector.broadcast %cst_15 : f32 to vector<8x128xf32>
    %52 = arith.maximumf %50, %51 : vector<8x128xf32>
    %53 = math.absf %50 : vector<8x128xf32>
    %cst_16 = arith.constant 0.000000e+00 : f32
    %54 = vector.broadcast %cst_16 : f32 to vector<8x128xf32>
    %55 = arith.subf %54, %53 : vector<8x128xf32>
    %56 = math.exp %55 : vector<8x128xf32>
    %cst_17 = arith.constant 1.000000e+00 : f32
    %57 = vector.broadcast %cst_17 : f32 to vector<8x128xf32>
    %58 = arith.addf %57, %56 : vector<8x128xf32>
    %59 = math.log %58 : vector<8x128xf32>
    %60 = arith.addf %52, %59 : vector<8x128xf32>
    %cst_18 = arith.constant 0.000000e+00 : f32
    %61 = vector.broadcast %cst_18 : f32 to vector<8x128xf32>
    %62 = arith.select %48, %60, %61 : vector<8x128xi1>, vector<8x128xf32>
    %63 = vector.shape_cast %62 : vector<8x128xf32> to vector<1x8x128xf32>
    %cst_19 = arith.constant dense<0.000000e+00> : vector<1xf32>
    %64 = vector.multi_reduction <add>, %63, %cst_19 [1, 2] : vector<1x8x128xf32> to vector<1xf32>
    %65 = vector.shape_cast %64 : vector<1xf32> to vector<1x1x1xf32>
    %66 = vector.extract %65[0, 0, 0] : f32 from vector<1x1x1xf32>
    %c0_20 = arith.constant 0 : index
    %c0_21 = arith.constant 0 : index
    %67 = vector.load %arg5[%c0_20, %c0_21] : memref<16x128xf32, #tpu.memory_space<vmem>>, vector<16x128xf32>
    %68 = arith.mulf %67, %67 : vector<16x128xf32>
    %69 = vector.shape_cast %68 : vector<16x128xf32> to vector<1x16x128xf32>
    %cst_22 = arith.constant dense<0.000000e+00> : vector<1xf32>
    %70 = vector.multi_reduction <add>, %69, %cst_22 [1, 2] : vector<1x16x128xf32> to vector<1xf32>
    %71 = vector.shape_cast %70 : vector<1xf32> to vector<1x1x1xf32>
    %72 = vector.extract %71[0, 0, 0] : f32 from vector<1x1x1xf32>
    %73 = arith.addf %18, %40 : f32
    %c0_23 = arith.constant 0 : index
    %74 = memref.load %arg6[%c0_23] : memref<3xf32, #tpu.memory_space<smem>>
    memref.store %73, %arg6[%c0_23] : memref<3xf32, #tpu.memory_space<smem>>
    %c1 = arith.constant 1 : index
    %75 = memref.load %arg6[%c1] : memref<3xf32, #tpu.memory_space<smem>>
    memref.store %66, %arg6[%c1] : memref<3xf32, #tpu.memory_space<smem>>
    %cst_24 = arith.constant 5.000000e-04 : f32
    %76 = arith.mulf %72, %cst_24 : f32
    %c2 = arith.constant 2 : index
    %77 = memref.load %arg6[%c2] : memref<3xf32, #tpu.memory_space<smem>>
    memref.store %76, %arg6[%c2] : memref<3xf32, #tpu.memory_space<smem>>
    return
  }
  func.func @transform_0(%arg0: i32) -> (i32, i32) {
    %c0_i32 = arith.constant 0 : i32
    %c0_i32_0 = arith.constant 0 : i32
    %c0_i32_1 = arith.constant 0 : i32
    return %c0_i32, %c0_i32_0 : i32, i32
  }
  func.func @transform_1(%arg0: i32) -> (i32, i32) {
    %c0_i32 = arith.constant 0 : i32
    %c0_i32_0 = arith.constant 0 : i32
    %c0_i32_1 = arith.constant 0 : i32
    return %c0_i32, %c0_i32_0 : i32, i32
  }
  func.func @transform_2(%arg0: i32) -> (i32, i32) {
    %c0_i32 = arith.constant 0 : i32
    %c0_i32_0 = arith.constant 0 : i32
    %c0_i32_1 = arith.constant 0 : i32
    return %c0_i32, %c0_i32_0 : i32, i32
  }
  func.func @transform_3(%arg0: i32) -> (i32, i32) {
    %c0_i32 = arith.constant 0 : i32
    %c0_i32_0 = arith.constant 0 : i32
    %c0_i32_1 = arith.constant 0 : i32
    return %c0_i32, %c0_i32_0 : i32, i32
  }
  func.func @transform_4(%arg0: i32) -> (i32, i32) {
    %c0_i32 = arith.constant 0 : i32
    %c0_i32_0 = arith.constant 0 : i32
    %c0_i32_1 = arith.constant 0 : i32
    return %c0_i32, %c0_i32_0 : i32, i32
  }
  func.func @transform_5(%arg0: i32) -> i32 {
    %c0_i32 = arith.constant 0 : i32
    %c0_i32_0 = arith.constant 0 : i32
    return %c0_i32 : i32
  }
}

</mosaic_0001>

<bundles_post_ra>
// kernel: vaegan_vae_forward.19
= control target key start
LH: loop header
LB: loop body
LE: loop exit
PB: predicated region body
PF: predicated region fallthrough
CT: control target
= control target key end

     0   :  { %v171_v0 = vmov 0.0   ;;  %vm172_vm0 = vmmov 0   ;;  %v173_v3 = vmov 0   ;;  %s251_s1 = inlined_call_operand.vmem [shape: f32[128,128], index: 1, kind: input, shape index: {}]   ;;  %s252_s2 = inlined_call_operand.vmem [shape: f32[8,1], index: 2, kind: input, shape index: {}]   ;;  %s253_s0 = inlined_call_operand.vmem [shape: f32[8,128], index: 0, kind: input, shape index: {}]   ;;  %s254_s3 = inlined_call_operand.vmem [shape: f32[8,128], index: 3, kind: output, shape index: {}]  }
   0x1   :  { %132 = vmatprep.subr.mxu0 %v171_v0  ;;  %v30_v1 = vld [vmem:[%s251_s1 + $0x78] sm:$0xff]  ;;  %v29_v2 = vld [vmem:[%s251_s1 + $0x70] sm:$0xff]  ;;  %164 = vmatprep.mubr.msk.f32.mxu0 %vm172_vm0, %v171_v0  ;;  %v28_v4 = vld [vmem:[%s251_s1 + $0x68] sm:$0xff] }
   0x2   :  { %133 = vmatpush3.msra.mxu0 %v30_v1  ;;  %170 = vset.pattern.permute.xlu0 %v173_v3  ;;  %v27_v5 = vld [vmem:[%s251_s1 + $0x60] sm:$0xff]  ;;  %v26_v7 = vld [vmem:[%s251_s1 + $0x58] sm:$0xff]  ;;  %v25_v8 = vld [vmem:[%s251_s1 + $0x50] sm:$0xff] }
   0x3   :  { %134 = vmatprep.subr.mxu0 %v171_v0  ;;  %v31_v6 = vld [vmem:[%s252_s2] sm:$0xff]  ;;  %v24_v9 = vld [vmem:[%s251_s1 + $0x48] sm:$0xff]  ;;  %v22_v11 = vld [vmem:[%s251_s1 + $0x38] sm:$0xff] }
   0x4   :  { %135 = vmatpush3.msra.mxu0 %v29_v2  ;;  %34 = vperm.xlu0 %170, %v31_v6   ;;  %v23_v10 = vld [vmem:[%s251_s1 + $0x40] sm:$0xff]  ;;  %v21_v12 = vld [vmem:[%s251_s1 + $0x30] sm:$0xff]  ;;  %v20_v13 = vld [vmem:[%s251_s1 + $0x28] sm:$0xff] }
   0x5   :  { %136 = vmatprep.subr.mxu0 %v171_v0  ;;  %v19_v14 = vld [vmem:[%s251_s1 + $0x20] sm:$0xff]  ;;  %v18_v15 = vld [vmem:[%s251_s1 + $0x18] sm:$0xff]  ;;  %v17_v16 = vld [vmem:[%s251_s1 + $0x10] sm:$0xff] }
   0x6   :  { %137 = vmatpush3.msra.mxu0 %v28_v4  ;;  %v16_v17 = vld [vmem:[%s251_s1 + $0x8] sm:$0xff]  ;;  %v15_v18 = vld [vmem:[%s251_s1] sm:$0xff] }
   0x7   :  { %138 = vmatprep.subr.mxu0 %v171_v0  ;;  %v14_v19 = vld [vmem:[%s253_s0] sm:$0xff] }
   0x8   :  { %139 = vmatpush3.msra.mxu0 %v27_v5 }
   0x9   :  { %140 = vmatprep.subr.mxu0 %v171_v0 }
   0xa   :  { %141 = vmatpush3.msra.mxu0 %v26_v7 }
   0xb   :  { %142 = vmatprep.subr.mxu0 %v171_v0 }
   0xc   :  { %143 = vmatpush3.msra.mxu0 %v25_v8 }
   0xd   :  { %144 = vmatprep.subr.mxu0 %v171_v0 }
   0xe   :  { %145 = vmatpush3.msra.mxu0 %v24_v9 }
   0xf   :  { %146 = vmatprep.subr.mxu0 %v171_v0 }
  0x10   :  { %147 = vmatpush3.msra.mxu0 %v23_v10 }
  0x11   :  { %148 = vmatprep.subr.mxu0 %v171_v0 }
  0x12   :  { %149 = vmatpush3.msra.mxu0 %v22_v11 }
  0x13   :  { %150 = vmatprep.subr.mxu0 %v171_v0 }
  0x14   :  { %151 = vmatpush3.msra.mxu0 %v21_v12 }
  0x15   :  { %152 = vmatprep.subr.mxu0 %v171_v0 }
  0x16   :  { %153 = vmatpush3.msra.mxu0 %v20_v13 }
  0x17   :  { %154 = vmatprep.subr.mxu0 %v171_v0 }
  0x18   :  { %155 = vmatpush3.msra.mxu0 %v19_v14 }
  0x19   :  { %156 = vmatprep.subr.mxu0 %v171_v0 }
  0x1a   :  { %157 = vmatpush3.msra.mxu0 %v18_v15 }
  0x1b   :  { %158 = vmatprep.subr.mxu0 %v171_v0 }
  0x1c   :  { %159 = vmatpush3.msra.mxu0 %v17_v16 }
  0x1d   :  { %160 = vmatprep.subr.mxu0 %v171_v0 }
  0x1e   :  { %161 = vmatpush3.msra.mxu0 %v16_v17 }
  0x1f   :  { %162 = vmatprep.subr.mxu0 %v171_v0 }
  0x20   :  { %163 = vmatpush3.msra.mxu0 %v15_v18 }
  0x21   :  { %165 = vmatmul.mubr.f32.vlgmr.msra.gmra.mxu0 %v14_v19 }
  0x7f   :  { %v35_v20 = vpop.permute.xlu0 %34 }
  0xe1   :  { %v103_v21 = vpop.f32.mrf.mxu0 }
  0xe2   :  { %v104_v22 = vadd.f32 %v103_v21, %v35_v20 }
  0xe3   :  { %v166_v23 = vpop.f32.mrf.mxu0 }
  0xe4   :  { %vm107_vm1 = vcmp.ge.f32.partialorder %v104_v22, 0.0  ;;  %v108_v24 = vmul.f32 0.2, %v104_v22 }
  0xe6   :  { %v109_v25 = vsel %vm107_vm1, %v104_v22, %v108_v24 }
  0xe7   :  { %110 = vst [vmem:[%s254_s3] sm:$0xff] %v109_v25 }

// kernel: reverse
= control target key start
LH: loop header
LB: loop body
LE: loop exit
PB: predicated region body
PF: predicated region fallthrough
CT: control target
= control target key end

     0   :  { %s248_s0 = inlined_call_operand.vmem [shape: bf16[128,8,4,4], index: 0, kind: input, shape index: {}]   ;;  %s249_s1 = inlined_call_operand.vmem [shape: bf16[128,8,4,4], index: 1, kind: output, shape index: {}]  }
   0x1   :  { %v112_v0 = vld [vmem:[%s248_s0 + $0x3c] sm:$0xf]  ;;  %v113_v1 = vld [vmem:[%s248_s0 + $0x2c] sm:$0xf]  ;;  %v119_v4 = vld [vmem:[%s248_s0 + $0x38] sm:$0xf] }
   0x2   :  { %v115_v2 = vld [vmem:[%s248_s0 + $0x1c] sm:$0xf]  ;;  %7 = vst [vmem:[%s249_s1] sm:$0xf] %v112_v0  ;;  %114 = vst [vmem:[%s249_s1 + $0x10] sm:$0xf] %v113_v1 }
   0x3   :  { %116 = vst [vmem:[%s249_s1 + $0x20] sm:$0xf] %v115_v2  ;;  %v117_v3 = vld [vmem:[%s248_s0 + $0xc] sm:$0xf]  ;;  %v121_v5 = vld [vmem:[%s248_s0 + $0x28] sm:$0xf] }
   0x4   :  { %118 = vst [vmem:[%s249_s1 + $0x30] sm:$0xf] %v117_v3  ;;  %120 = vst [vmem:[%s249_s1 + $0x4] sm:$0xf] %v119_v4  ;;  %v123_v6 = vld [vmem:[%s248_s0 + $0x18] sm:$0xf] }
   0x5   :  { %122 = vst [vmem:[%s249_s1 + $0x14] sm:$0xf] %v121_v5  ;;  %v125_v7 = vld [vmem:[%s248_s0 + $0x8] sm:$0xf]  ;;  %v127_v8 = vld [vmem:[%s248_s0 + $0x34] sm:$0xf] }
   0x6   :  { %124 = vst [vmem:[%s249_s1 + $0x24] sm:$0xf] %v123_v6  ;;  %126 = vst [vmem:[%s249_s1 + $0x34] sm:$0xf] %v125_v7  ;;  %v129_v9 = vld [vmem:[%s248_s0 + $0x24] sm:$0xf] }
   0x7   :  { %128 = vst [vmem:[%s249_s1 + $0x8] sm:$0xf] %v127_v8  ;;  %v131_v10 = vld [vmem:[%s248_s0 + $0x14] sm:$0xf]  ;;  %v133_v11 = vld [vmem:[%s248_s0 + $0x4] sm:$0xf] }
   0x8   :  { %130 = vst [vmem:[%s249_s1 + $0x18] sm:$0xf] %v129_v9  ;;  %132 = vst [vmem:[%s249_s1 + $0x28] sm:$0xf] %v131_v10  ;;  %v135_v12 = vld [vmem:[%s248_s0 + $0x30] sm:$0xf] }
   0x9   :  { %134 = vst [vmem:[%s249_s1 + $0x38] sm:$0xf] %v133_v11  ;;  %v137_v13 = vld [vmem:[%s248_s0 + $0x20] sm:$0xf]  ;;  %v139_v14 = vld [vmem:[%s248_s0 + $0x10] sm:$0xf] }
   0xa   :  { %136 = vst [vmem:[%s249_s1 + $0xc] sm:$0xf] %v135_v12  ;;  %138 = vst [vmem:[%s249_s1 + $0x1c] sm:$0xf] %v137_v13  ;;  %v106_v15 = vld [vmem:[%s248_s0] sm:$0xf] }
   0xb   :  { %140 = vst [vmem:[%s249_s1 + $0x2c] sm:$0xf] %v139_v14  ;;  %141 = vst [vmem:[%s249_s1 + $0x3c] sm:$0xf] %v106_v15 }

// kernel: vaegan_vae_forward.20
= control target key start
LH: loop header
LB: loop body
LE: loop exit
PB: predicated region body
PF: predicated region fallthrough
CT: control target
= control target key end

     0   :  { %v201_v0 = vmov 0.0   ;;  %vm202_vm0 = vmmov 0   ;;  %v104_v18 = vlaneseq  ;;  %v203_v28 = vmov 0   ;;  %s289_s1 = inlined_call_operand.vmem [shape: f32[128,128], index: 1, kind: input, shape index: {}]   ;;  %s290_s0 = inlined_call_operand.vmem [shape: f32[8,128], index: 0, kind: input, shape index: {}]   ;;  %s291_s2 = inlined_call_operand.vmem [shape: f32[8,1], index: 2, kind: input, shape index: {}]   ;;  %s292_s3 = inlined_call_operand.vmem [shape: f32[8,1], index: 3, kind: input, shape index: {}]   ;;  %s293_s4 = inlined_call_operand.vmem [shape: f32[8,128], index: 4, kind: output, shape index: {}]  }
   0x1   :  { %159 = vmatprep.subr.mxu0 %v201_v0  ;;  %v33_v1 = vld [vmem:[%s289_s1 + $0x78] sm:$0xff]  ;;  %v32_v2 = vld [vmem:[%s289_s1 + $0x70] sm:$0xff]  ;;  %191 = vmatprep.mubr.msk.f32.mxu0 %vm202_vm0, %v201_v0  ;;  %v31_v3 = vld [vmem:[%s289_s1 + $0x68] sm:$0xff] }
   0x2   :  { %160 = vmatpush3.msra.mxu0 %v33_v1  ;;  %v30_v4 = vld [vmem:[%s289_s1 + $0x60] sm:$0xff]  ;;  %v29_v5 = vld [vmem:[%s289_s1 + $0x58] sm:$0xff]  ;;  %v28_v6 = vld [vmem:[%s289_s1 + $0x50] sm:$0xff]  ;;  %v105_v19 = vand.u32 127, %v104_v18  ;;  %197 = vset.pattern.permute.xlu1 %v203_v28 }
   0x3   :  { %161 = vmatprep.subr.mxu0 %v201_v0  ;;  %v27_v7 = vld [vmem:[%s289_s1 + $0x48] sm:$0xff]  ;;  %v26_v8 = vld [vmem:[%s289_s1 + $0x40] sm:$0xff]  ;;  %v25_v9 = vld [vmem:[%s289_s1 + $0x38] sm:$0xff]  ;;  %198 = vset.pattern.permute.xlu0 %v203_v28 }
   0x4   :  { %162 = vmatpush3.msra.mxu0 %v32_v2  ;;  %v24_v10 = vld [vmem:[%s289_s1 + $0x30] sm:$0xff]  ;;  %v23_v11 = vld [vmem:[%s289_s1 + $0x28] sm:$0xff]  ;;  %v22_v12 = vld [vmem:[%s289_s1 + $0x20] sm:$0xff]  ;;  %vm106_vm1 = vcmp.lt.s32.totalorder %v105_v19, 32 }
   0x5   :  { %163 = vmatprep.subr.mxu0 %v201_v0  ;;  %v21_v13 = vld [vmem:[%s289_s1 + $0x18] sm:$0xff]  ;;  %v20_v14 = vld [vmem:[%s289_s1 + $0x10] sm:$0xff]  ;;  %v19_v15 = vld [vmem:[%s289_s1 + $0x8] sm:$0xff] }
   0x6   :  { %164 = vmatpush3.msra.mxu0 %v31_v3  ;;  %v18_v16 = vld [vmem:[%s289_s1] sm:$0xff] }
   0x7   :  { %165 = vmatprep.subr.mxu0 %v201_v0  ;;  %v17_v17 = vld [vmem:[%s290_s0] sm:$0xff] }
   0x8   :  { %166 = vmatpush3.msra.mxu0 %v30_v4  ;;  %v117_v32 = vld [vmem:[%s291_s2] sm:$0xff] }
   0x9   :  { %167 = vmatprep.subr.mxu0 %v201_v0  ;;  %v127_v35 = vld [vmem:[%s292_s3] sm:$0xff] }
   0xa   :  { %168 = vmatpush3.msra.mxu0 %v29_v5 }
   0xb   :  { %169 = vmatprep.subr.mxu0 %v201_v0 }
   0xc   :  { %170 = vmatpush3.msra.mxu0 %v28_v6 }
   0xd   :  { %171 = vmatprep.subr.mxu0 %v201_v0 }
   0xe   :  { %172 = vmatpush3.msra.mxu0 %v27_v7 }
   0xf   :  { %173 = vmatprep.subr.mxu0 %v201_v0 }
  0x10   :  { %174 = vmatpush3.msra.mxu0 %v26_v8 }
  0x11   :  { %175 = vmatprep.subr.mxu0 %v201_v0 }
  0x12   :  { %176 = vmatpush3.msra.mxu0 %v25_v9 }
  0x13   :  { %177 = vmatprep.subr.mxu0 %v201_v0 }
  0x14   :  { %178 = vmatpush3.msra.mxu0 %v24_v10 }
  0x15   :  { %179 = vmatprep.subr.mxu0 %v201_v0 }
  0x16   :  { %180 = vmatpush3.msra.mxu0 %v23_v11 }
  0x17   :  { %181 = vmatprep.subr.mxu0 %v201_v0 }
  0x18   :  { %182 = vmatpush3.msra.mxu0 %v22_v12 }
  0x19   :  { %183 = vmatprep.subr.mxu0 %v201_v0 }
  0x1a   :  { %184 = vmatpush3.msra.mxu0 %v21_v13 }
  0x1b   :  { %185 = vmatprep.subr.mxu0 %v201_v0 }
  0x1c   :  { %186 = vmatpush3.msra.mxu0 %v20_v14 }
  0x1d   :  { %187 = vmatprep.subr.mxu0 %v201_v0 }
  0x1e   :  { %188 = vmatpush3.msra.mxu0 %v19_v15 }
  0x1f   :  { %189 = vmatprep.subr.mxu0 %v201_v0 }
  0x20   :  { %190 = vmatpush3.msra.mxu0 %v18_v16 }
  0x21   :  { %192 = vmatmul.mubr.f32.vlgmr.msra.gmra.mxu0 %v17_v17 }
  0xe1   :  { %v100_v20 = vpop.f32.mrf.mxu0 }
  0xe2   :  { %v107_v21 = vsel %vm106_vm1, %v100_v20, 0.0 }
  0xe3   :  { %108 = vadd.xlane.f32.xlu0 %v107_v21  ;;  %v193_v22 = vpop.f32.mrf.mxu0 }
 0x16c   :  { %v109_v23 = vpop.xlane.xlu0 %108 }
 0x16d   :  { %v110_v24 = vmul.f32 0.03125, %v109_v23 }
 0x16f   :  { %v111_v25 = vsub.f32 %v100_v20, %v110_v24 }
 0x171   :  { %v112_v26 = vsel %vm106_vm1, %v111_v25, 0.0 }
 0x172   :  { %v113_v27 = vmul.f32 %v112_v26, %v112_v26 }
 0x174   :  { %114 = vadd.xlane.f32.xlu0 %v113_v27 }
 0x1fd   :  { %v115_v29 = vpop.xlane.xlu0 %114 }
 0x1fe   :  { %v116_v30 = vmul.f32 0.03125, %v115_v29 }
 0x200   :  { %v118_v31 = vadd.f32 1e-05, %v116_v30 }
 0x202   :  { %199 = vrsqrt.f32 %v118_v31 }
 0x20f   :  { %v200_v33 = vpop.eup %199 }
 0x210   :  { %v120_v34 = vmul.f32 %v200_v33, %v117_v32 }
 0x212   :  { %123 = vperm.xlu1 %197, %v120_v34  }
 0x216   :  { %130 = vperm.xlu1 %197, %v127_v35  }
 0x28d   :  { %v124_v36 = vpop.permute.xlu1 %123 }
 0x28e   :  { %v126_v37 = vmul.f32 %v124_v36, %v111_v25 }
 0x291   :  { %v131_v38 = vpop.permute.xlu1 %130 }
 0x292   :  { %v133_v39 = vadd.f32 %v131_v38, %v126_v37 }
 0x294   :  { %vm134_vm2 = vcmp.ge.f32.partialorder %v133_v39, 0.0  ;;  %v135_v40 = vmul.f32 0.2, %v133_v39 }
 0x296   :  { %v136_v41 = vsel %vm134_vm2, %v133_v39, %v135_v40 }
 0x297   :  { %137 = vst [vmem:[%s293_s4] sm:$0xff] %v136_v41 }

// kernel: vaegan_vae_forward.21
= control target key start
LH: loop header
LB: loop body
LE: loop exit
PB: predicated region body
PF: predicated region fallthrough
CT: control target
= control target key end

     0   :  { %v201_v0 = vmov 0.0   ;;  %vm202_vm0 = vmmov 0   ;;  %v104_v18 = vlaneseq  ;;  %v203_v28 = vmov 0   ;;  %s289_s1 = inlined_call_operand.vmem [shape: f32[128,128], index: 1, kind: input, shape index: {}]   ;;  %s290_s0 = inlined_call_operand.vmem [shape: f32[8,128], index: 0, kind: input, shape index: {}]   ;;  %s291_s2 = inlined_call_operand.vmem [shape: f32[8,1], index: 2, kind: input, shape index: {}]   ;;  %s292_s3 = inlined_call_operand.vmem [shape: f32[8,1], index: 3, kind: input, shape index: {}]   ;;  %s293_s4 = inlined_call_operand.vmem [shape: f32[8,128], index: 4, kind: output, shape index: {}]  }
   0x1   :  { %159 = vmatprep.subr.mxu0 %v201_v0  ;;  %v33_v1 = vld [vmem:[%s289_s1 + $0x78] sm:$0xff]  ;;  %v32_v2 = vld [vmem:[%s289_s1 + $0x70] sm:$0xff]  ;;  %191 = vmatprep.mubr.msk.f32.mxu0 %vm202_vm0, %v201_v0  ;;  %v31_v3 = vld [vmem:[%s289_s1 + $0x68] sm:$0xff] }
   0x2   :  { %160 = vmatpush3.msra.mxu0 %v33_v1  ;;  %v30_v4 = vld [vmem:[%s289_s1 + $0x60] sm:$0xff]  ;;  %v29_v5 = vld [vmem:[%s289_s1 + $0x58] sm:$0xff]  ;;  %v28_v6 = vld [vmem:[%s289_s1 + $0x50] sm:$0xff]  ;;  %v105_v19 = vand.u32 127, %v104_v18  ;;  %197 = vset.pattern.permute.xlu1 %v203_v28 }
   0x3   :  { %161 = vmatprep.subr.mxu0 %v201_v0  ;;  %v27_v7 = vld [vmem:[%s289_s1 + $0x48] sm:$0xff]  ;;  %v26_v8 = vld [vmem:[%s289_s1 + $0x40] sm:$0xff]  ;;  %v25_v9 = vld [vmem:[%s289_s1 + $0x38] sm:$0xff]  ;;  %198 = vset.pattern.permute.xlu0 %v203_v28 }
   0x4   :  { %162 = vmatpush3.msra.mxu0 %v32_v2  ;;  %v24_v10 = vld [vmem:[%s289_s1 + $0x30] sm:$0xff]  ;;  %v23_v11 = vld [vmem:[%s289_s1 + $0x28] sm:$0xff]  ;;  %v22_v12 = vld [vmem:[%s289_s1 + $0x20] sm:$0xff]  ;;  %vm106_vm1 = vcmp.lt.s32.totalorder %v105_v19, 8 }
   0x5   :  { %163 = vmatprep.subr.mxu0 %v201_v0  ;;  %v21_v13 = vld [vmem:[%s289_s1 + $0x18] sm:$0xff]  ;;  %v20_v14 = vld [vmem:[%s289_s1 + $0x10] sm:$0xff]  ;;  %v19_v15 = vld [vmem:[%s289_s1 + $0x8] sm:$0xff] }
   0x6   :  { %164 = vmatpush3.msra.mxu0 %v31_v3  ;;  %v18_v16 = vld [vmem:[%s289_s1] sm:$0xff] }
   0x7   :  { %165 = vmatprep.subr.mxu0 %v201_v0  ;;  %v17_v17 = vld [vmem:[%s290_s0] sm:$0xff] }
   0x8   :  { %166 = vmatpush3.msra.mxu0 %v30_v4  ;;  %v117_v32 = vld [vmem:[%s291_s2] sm:$0xff] }
   0x9   :  { %167 = vmatprep.subr.mxu0 %v201_v0  ;;  %v127_v35 = vld [vmem:[%s292_s3] sm:$0xff] }
   0xa   :  { %168 = vmatpush3.msra.mxu0 %v29_v5 }
   0xb   :  { %169 = vmatprep.subr.mxu0 %v201_v0 }
   0xc   :  { %170 = vmatpush3.msra.mxu0 %v28_v6 }
   0xd   :  { %171 = vmatprep.subr.mxu0 %v201_v0 }
   0xe   :  { %172 = vmatpush3.msra.mxu0 %v27_v7 }
   0xf   :  { %173 = vmatprep.subr.mxu0 %v201_v0 }
  0x10   :  { %174 = vmatpush3.msra.mxu0 %v26_v8 }
  0x11   :  { %175 = vmatprep.subr.mxu0 %v201_v0 }
  0x12   :  { %176 = vmatpush3.msra.mxu0 %v25_v9 }
  0x13   :  { %177 = vmatprep.subr.mxu0 %v201_v0 }
  0x14   :  { %178 = vmatpush3.msra.mxu0 %v24_v10 }
  0x15   :  { %179 = vmatprep.subr.mxu0 %v201_v0 }
  0x16   :  { %180 = vmatpush3.msra.mxu0 %v23_v11 }
  0x17   :  { %181 = vmatprep.subr.mxu0 %v201_v0 }
  0x18   :  { %182 = vmatpush3.msra.mxu0 %v22_v12 }
  0x19   :  { %183 = vmatprep.subr.mxu0 %v201_v0 }
  0x1a   :  { %184 = vmatpush3.msra.mxu0 %v21_v13 }
  0x1b   :  { %185 = vmatprep.subr.mxu0 %v201_v0 }
  0x1c   :  { %186 = vmatpush3.msra.mxu0 %v20_v14 }
  0x1d   :  { %187 = vmatprep.subr.mxu0 %v201_v0 }
  0x1e   :  { %188 = vmatpush3.msra.mxu0 %v19_v15 }
  0x1f   :  { %189 = vmatprep.subr.mxu0 %v201_v0 }
  0x20   :  { %190 = vmatpush3.msra.mxu0 %v18_v16 }
  0x21   :  { %192 = vmatmul.mubr.f32.vlgmr.msra.gmra.mxu0 %v17_v17 }
  0xe1   :  { %v100_v20 = vpop.f32.mrf.mxu0 }
  0xe2   :  { %v107_v21 = vsel %vm106_vm1, %v100_v20, 0.0 }
  0xe3   :  { %108 = vadd.xlane.f32.xlu0 %v107_v21  ;;  %v193_v22 = vpop.f32.mrf.mxu0 }
 0x16c   :  { %v109_v23 = vpop.xlane.xlu0 %108 }
 0x16d   :  { %v110_v24 = vmul.f32 0.125, %v109_v23 }
 0x16f   :  { %v111_v25 = vsub.f32 %v100_v20, %v110_v24 }
 0x171   :  { %v112_v26 = vsel %vm106_vm1, %v111_v25, 0.0 }
 0x172   :  { %v113_v27 = vmul.f32 %v112_v26, %v112_v26 }
 0x174   :  { %114 = vadd.xlane.f32.xlu0 %v113_v27 }
 0x1fd   :  { %v115_v29 = vpop.xlane.xlu0 %114 }
 0x1fe   :  { %v116_v30 = vmul.f32 0.125, %v115_v29 }
 0x200   :  { %v118_v31 = vadd.f32 1e-05, %v116_v30 }
 0x202   :  { %199 = vrsqrt.f32 %v118_v31 }
 0x20f   :  { %v200_v33 = vpop.eup %199 }
 0x210   :  { %v120_v34 = vmul.f32 %v200_v33, %v117_v32 }
 0x212   :  { %123 = vperm.xlu1 %197, %v120_v34  }
 0x216   :  { %130 = vperm.xlu1 %197, %v127_v35  }
 0x28d   :  { %v124_v36 = vpop.permute.xlu1 %123 }
 0x28e   :  { %v126_v37 = vmul.f32 %v124_v36, %v111_v25 }
 0x291   :  { %v131_v38 = vpop.permute.xlu1 %130 }
 0x292   :  { %v133_v39 = vadd.f32 %v131_v38, %v126_v37 }
 0x294   :  { %vm134_vm2 = vcmp.ge.f32.partialorder %v133_v39, 0.0  ;;  %v135_v40 = vmul.f32 0.2, %v133_v39 }
 0x296   :  { %v136_v41 = vsel %vm134_vm2, %v133_v39, %v135_v40 }
 0x297   :  { %137 = vst [vmem:[%s293_s4] sm:$0xff] %v136_v41 }

// kernel: vaegan_vae_forward.22
= control target key start
LH: loop header
LB: loop body
LE: loop exit
PB: predicated region body
PF: predicated region fallthrough
CT: control target
= control target key end

     0   :  { %v201_v0 = vmov 0.0   ;;  %vm202_vm0 = vmmov 0   ;;  %v104_v18 = vlaneseq  ;;  %v203_v28 = vmov 0   ;;  %s289_s1 = inlined_call_operand.vmem [shape: f32[128,128], index: 1, kind: input, shape index: {}]   ;;  %s290_s0 = inlined_call_operand.vmem [shape: f32[8,128], index: 0, kind: input, shape index: {}]   ;;  %s291_s2 = inlined_call_operand.vmem [shape: f32[8,1], index: 2, kind: input, shape index: {}]   ;;  %s292_s3 = inlined_call_operand.vmem [shape: f32[8,1], index: 3, kind: input, shape index: {}]   ;;  %s293_s4 = inlined_call_operand.vmem [shape: f32[8,128], index: 4, kind: output, shape index: {}]  }
   0x1   :  { %159 = vmatprep.subr.mxu0 %v201_v0  ;;  %v33_v1 = vld [vmem:[%s289_s1 + $0x78] sm:$0xff]  ;;  %v32_v2 = vld [vmem:[%s289_s1 + $0x70] sm:$0xff]  ;;  %191 = vmatprep.mubr.msk.f32.mxu0 %vm202_vm0, %v201_v0  ;;  %v31_v3 = vld [vmem:[%s289_s1 + $0x68] sm:$0xff] }
   0x2   :  { %160 = vmatpush3.msra.mxu0 %v33_v1  ;;  %v30_v4 = vld [vmem:[%s289_s1 + $0x60] sm:$0xff]  ;;  %v29_v5 = vld [vmem:[%s289_s1 + $0x58] sm:$0xff]  ;;  %v28_v6 = vld [vmem:[%s289_s1 + $0x50] sm:$0xff]  ;;  %v105_v19 = vand.u32 127, %v104_v18  ;;  %197 = vset.pattern.permute.xlu1 %v203_v28 }
   0x3   :  { %161 = vmatprep.subr.mxu0 %v201_v0  ;;  %v27_v7 = vld [vmem:[%s289_s1 + $0x48] sm:$0xff]  ;;  %v26_v8 = vld [vmem:[%s289_s1 + $0x40] sm:$0xff]  ;;  %v25_v9 = vld [vmem:[%s289_s1 + $0x38] sm:$0xff]  ;;  %198 = vset.pattern.permute.xlu0 %v203_v28 }
   0x4   :  { %162 = vmatpush3.msra.mxu0 %v32_v2  ;;  %v24_v10 = vld [vmem:[%s289_s1 + $0x30] sm:$0xff]  ;;  %v23_v11 = vld [vmem:[%s289_s1 + $0x28] sm:$0xff]  ;;  %v22_v12 = vld [vmem:[%s289_s1 + $0x20] sm:$0xff]  ;;  %vm106_vm1 = vcmp.lt.s32.totalorder %v105_v19, 2 }
   0x5   :  { %163 = vmatprep.subr.mxu0 %v201_v0  ;;  %v21_v13 = vld [vmem:[%s289_s1 + $0x18] sm:$0xff]  ;;  %v20_v14 = vld [vmem:[%s289_s1 + $0x10] sm:$0xff]  ;;  %v19_v15 = vld [vmem:[%s289_s1 + $0x8] sm:$0xff] }
   0x6   :  { %164 = vmatpush3.msra.mxu0 %v31_v3  ;;  %v18_v16 = vld [vmem:[%s289_s1] sm:$0xff] }
   0x7   :  { %165 = vmatprep.subr.mxu0 %v201_v0  ;;  %v17_v17 = vld [vmem:[%s290_s0] sm:$0xff] }
   0x8   :  { %166 = vmatpush3.msra.mxu0 %v30_v4  ;;  %v117_v32 = vld [vmem:[%s291_s2] sm:$0xff] }
   0x9   :  { %167 = vmatprep.subr.mxu0 %v201_v0  ;;  %v127_v35 = vld [vmem:[%s292_s3] sm:$0xff] }
   0xa   :  { %168 = vmatpush3.msra.mxu0 %v29_v5 }
   0xb   :  { %169 = vmatprep.subr.mxu0 %v201_v0 }
   0xc   :  { %170 = vmatpush3.msra.mxu0 %v28_v6 }
   0xd   :  { %171 = vmatprep.subr.mxu0 %v201_v0 }
   0xe   :  { %172 = vmatpush3.msra.mxu0 %v27_v7 }
   0xf   :  { %173 = vmatprep.subr.mxu0 %v201_v0 }
  0x10   :  { %174 = vmatpush3.msra.mxu0 %v26_v8 }
  0x11   :  { %175 = vmatprep.subr.mxu0 %v201_v0 }
  0x12   :  { %176 = vmatpush3.msra.mxu0 %v25_v9 }
  0x13   :  { %177 = vmatprep.subr.mxu0 %v201_v0 }
  0x14   :  { %178 = vmatpush3.msra.mxu0 %v24_v10 }
  0x15   :  { %179 = vmatprep.subr.mxu0 %v201_v0 }
  0x16   :  { %180 = vmatpush3.msra.mxu0 %v23_v11 }
  0x17   :  { %181 = vmatprep.subr.mxu0 %v201_v0 }
  0x18   :  { %182 = vmatpush3.msra.mxu0 %v22_v12 }
  0x19   :  { %183 = vmatprep.subr.mxu0 %v201_v0 }
  0x1a   :  { %184 = vmatpush3.msra.mxu0 %v21_v13 }
  0x1b   :  { %185 = vmatprep.subr.mxu0 %v201_v0 }
  0x1c   :  { %186 = vmatpush3.msra.mxu0 %v20_v14 }
  0x1d   :  { %187 = vmatprep.subr.mxu0 %v201_v0 }
  0x1e   :  { %188 = vmatpush3.msra.mxu0 %v19_v15 }
  0x1f   :  { %189 = vmatprep.subr.mxu0 %v201_v0 }
  0x20   :  { %190 = vmatpush3.msra.mxu0 %v18_v16 }
  0x21   :  { %192 = vmatmul.mubr.f32.vlgmr.msra.gmra.mxu0 %v17_v17 }
  0xe1   :  { %v100_v20 = vpop.f32.mrf.mxu0 }
  0xe2   :  { %v107_v21 = vsel %vm106_vm1, %v100_v20, 0.0 }
  0xe3   :  { %108 = vadd.xlane.f32.xlu0 %v107_v21  ;;  %v193_v22 = vpop.f32.mrf.mxu0 }
 0x16c   :  { %v109_v23 = vpop.xlane.xlu0 %108 }
 0x16d   :  { %v110_v24 = vmul.f32 0.5, %v109_v23 }
 0x16f   :  { %v111_v25 = vsub.f32 %v100_v20, %v110_v24 }
 0x171   :  { %v112_v26 = vsel %vm106_vm1, %v111_v25, 0.0 }
 0x172   :  { %v113_v27 = vmul.f32 %v112_v26, %v112_v26 }
 0x174   :  { %114 = vadd.xlane.f32.xlu0 %v113_v27 }
 0x1fd   :  { %v115_v29 = vpop.xlane.xlu0 %114 }
 0x1fe   :  { %v116_v30 = vmul.f32 0.5, %v115_v29 }
 0x200   :  { %v118_v31 = vadd.f32 1e-05, %v116_v30 }
 0x202   :  { %199 = vrsqrt.f32 %v118_v31 }
 0x20f   :  { %v200_v33 = vpop.eup %199 }
 0x210   :  { %v120_v34 = vmul.f32 %v200_v33, %v117_v32 }
 0x212   :  { %123 = vperm.xlu1 %197, %v120_v34  }
 0x216   :  { %130 = vperm.xlu1 %197, %v127_v35  }
 0x28d   :  { %v124_v36 = vpop.permute.xlu1 %123 }
 0x28e   :  { %v126_v37 = vmul.f32 %v124_v36, %v111_v25 }
 0x291   :  { %v131_v38 = vpop.permute.xlu1 %130 }
 0x292   :  { %v133_v39 = vadd.f32 %v131_v38, %v126_v37 }
 0x294   :  { %vm134_vm2 = vcmp.ge.f32.partialorder %v133_v39, 0.0  ;;  %v135_v40 = vmul.f32 0.2, %v133_v39 }
 0x296   :  { %v136_v41 = vsel %vm134_vm2, %v133_v39, %v135_v40 }
 0x297   :  { %137 = vst [vmem:[%s293_s4] sm:$0xff] %v136_v41 }

// kernel: vaegan_vae_forward.23
= control target key start
LH: loop header
LB: loop body
LE: loop exit
PB: predicated region body
PF: predicated region fallthrough
CT: control target
= control target key end

     0   :  { %v180_v2 = vmov 0   ;;  %s267_s1 = inlined_call_operand.vmem [shape: f32[128,128], index: 1, kind: input, shape index: {}]   ;;  %s268_s0 = inlined_call_operand.vmem [shape: f32[16,128], index: 0, kind: input, shape index: {}]   ;;  %s269_s2 = inlined_call_operand.vmem [shape: f32[16,1], index: 2, kind: input, shape index: {}]   ;;  %s270_s3 = inlined_call_operand.vmem [shape: f32[16,128], index: 3, kind: output, shape index: {}]  }
   0x1   :  { %v31_v0 = vld [vmem:[%s267_s1 + $0x78] sm:$0xff]  ;;  %v30_v1 = vld [vmem:[%s267_s1 + $0x70] sm:$0xff]  ;;  %179 = vset.pattern.permute.xlu0 %v180_v2  ;;  %v29_v3 = vld [vmem:[%s267_s1 + $0x68] sm:$0xff] }
   0x2   :  { %143 = vmatprep.subr.mxu0 %v31_v0  ;;  %v28_v4 = vld [vmem:[%s267_s1 + $0x60] sm:$0xff]  ;;  %v27_v6 = vld [vmem:[%s267_s1 + $0x58] sm:$0xff]  ;;  %v26_v8 = vld [vmem:[%s267_s1 + $0x50] sm:$0xff] }
   0x3   :  { %144 = vmatpush3.msra.mxu0 %v31_v0  ;;  %v14_v5 = vld [vmem:[%s268_s0] sm:$0xff]  ;;  %v33_v9 = vld [vmem:[%s269_s2 + $0x8] sm:$0xff]  ;;  %v23_v12 = vld [vmem:[%s267_s1 + $0x38] sm:$0xff] }
   0x4   :  { %145 = vmatprep.subr.mxu0 %v30_v1  ;;  %175 = vmatprep.mubr.f32.mxu0 %v14_v5  ;;  %v32_v7 = vld [vmem:[%s269_s2] sm:$0xff]  ;;  %v25_v10 = vld [vmem:[%s267_s1 + $0x48] sm:$0xff]  ;;  %v22_v13 = vld [vmem:[%s267_s1 + $0x30] sm:$0xff] }
   0x5   :  { %146 = vmatpush3.msra.mxu0 %v30_v1  ;;  %36 = vperm.xlu0 %179, %v32_v7   ;;  %v24_v11 = vld [vmem:[%s267_s1 + $0x40] sm:$0xff]  ;;  %v21_v14 = vld [vmem:[%s267_s1 + $0x28] sm:$0xff]  ;;  %v19_v16 = vld [vmem:[%s267_s1 + $0x18] sm:$0xff] }
   0x6   :  { %147 = vmatprep.subr.mxu0 %v29_v3  ;;  %v20_v15 = vld [vmem:[%s267_s1 + $0x20] sm:$0xff]  ;;  %v18_v17 = vld [vmem:[%s267_s1 + $0x10] sm:$0xff]  ;;  %v17_v18 = vld [vmem:[%s267_s1 + $0x8] sm:$0xff] }
   0x7   :  { %148 = vmatpush3.msra.mxu0 %v29_v3  ;;  %v16_v19 = vld [vmem:[%s267_s1] sm:$0xff]  ;;  %v15_v20 = vld [vmem:[%s268_s0 + $0x8] sm:$0xff] }
   0x8   :  { %149 = vmatprep.subr.mxu0 %v28_v4 }
   0x9   :  { %150 = vmatpush3.msra.mxu0 %v28_v4  ;;  %41 = vperm.xlu0 %179, %v33_v9  }
   0xa   :  { %151 = vmatprep.subr.mxu0 %v27_v6 }
   0xb   :  { %152 = vmatpush3.msra.mxu0 %v27_v6 }
   0xc   :  { %153 = vmatprep.subr.mxu0 %v26_v8 }
   0xd   :  { %154 = vmatpush3.msra.mxu0 %v26_v8 }
   0xe   :  { %155 = vmatprep.subr.mxu0 %v25_v10 }
   0xf   :  { %156 = vmatpush3.msra.mxu0 %v25_v10 }
  0x10   :  { %157 = vmatprep.subr.mxu0 %v24_v11 }
  0x11   :  { %158 = vmatpush3.msra.mxu0 %v24_v11 }
  0x12   :  { %159 = vmatprep.subr.mxu0 %v23_v12 }
  0x13   :  { %160 = vmatpush3.msra.mxu0 %v23_v12 }
  0x14   :  { %161 = vmatprep.subr.mxu0 %v22_v13 }
  0x15   :  { %162 = vmatpush3.msra.mxu0 %v22_v13 }
  0x16   :  { %163 = vmatprep.subr.mxu0 %v21_v14 }
  0x17   :  { %164 = vmatpush3.msra.mxu0 %v21_v14 }
  0x18   :  { %165 = vmatprep.subr.mxu0 %v20_v15 }
  0x19   :  { %166 = vmatpush3.msra.mxu0 %v20_v15 }
  0x1a   :  { %167 = vmatprep.subr.mxu0 %v19_v16 }
  0x1b   :  { %168 = vmatpush3.msra.mxu0 %v19_v16 }
  0x1c   :  { %169 = vmatprep.subr.mxu0 %v18_v17 }
  0x1d   :  { %170 = vmatpush3.msra.mxu0 %v18_v17 }
  0x1e   :  { %171 = vmatprep.subr.mxu0 %v17_v18 }
  0x1f   :  { %172 = vmatpush3.msra.mxu0 %v17_v18 }
  0x20   :  { %173 = vmatprep.subr.mxu0 %v16_v19 }
  0x21   :  { %174 = vmatpush3.msra.mxu0 %v16_v19 }
  0x22   :  { %176 = vmatmul.mubr.f32.vlgmr.msra.gmra.mxu0 %v15_v20 }
  0x80   :  { %v37_v21 = vpop.permute.xlu0 %36 }
  0x84   :  { %v42_v22 = vpop.permute.xlu0 %41 }
  0xe2   :  { %v177_v23 = vpop.f32.mrf.mxu0 }
  0xe3   :  { %v116_v24 = vadd.f32 %v177_v23, %v42_v22 }
  0xe4   :  { %v110_v25 = vpop.f32.mrf.mxu0 }
  0xe5   :  { %120 = vst [vmem:[%s270_s3 + $0x8] sm:$0xff] %v116_v24  ;;  %v111_v26 = vadd.f32 %v110_v25, %v37_v21 }
  0xe7   :  { %119 = vst [vmem:[%s270_s3] sm:$0xff] %v111_v26 }

// kernel: vaegan_vae_forward.24
= control target key start
LH: loop header
LB: loop body
LE: loop exit
PB: predicated region body
PF: predicated region fallthrough
CT: control target
= control target key end

     0   :  { %v199_v0 = vmov 0.0   ;;  %vm200_vm0 = vmmov 0   ;;  %v104_v18 = vlaneseq  ;;  %v201_v28 = vmov 0   ;;  %s287_s1 = inlined_call_operand.vmem [shape: f32[128,128], index: 1, kind: input, shape index: {}]   ;;  %s288_s0 = inlined_call_operand.vmem [shape: f32[8,128], index: 0, kind: input, shape index: {}]   ;;  %s289_s2 = inlined_call_operand.vmem [shape: f32[8,1], index: 2, kind: input, shape index: {}]   ;;  %s290_s3 = inlined_call_operand.vmem [shape: f32[8,1], index: 3, kind: input, shape index: {}]   ;;  %s291_s4 = inlined_call_operand.vmem [shape: f32[8,128], index: 4, kind: output, shape index: {}]  }
   0x1   :  { %157 = vmatprep.subr.mxu0 %v199_v0  ;;  %v33_v1 = vld [vmem:[%s287_s1 + $0x78] sm:$0xff]  ;;  %v32_v2 = vld [vmem:[%s287_s1 + $0x70] sm:$0xff]  ;;  %189 = vmatprep.mubr.msk.f32.mxu0 %vm200_vm0, %v199_v0  ;;  %v31_v3 = vld [vmem:[%s287_s1 + $0x68] sm:$0xff] }
   0x2   :  { %158 = vmatpush3.msra.mxu0 %v33_v1  ;;  %v30_v4 = vld [vmem:[%s287_s1 + $0x60] sm:$0xff]  ;;  %v29_v5 = vld [vmem:[%s287_s1 + $0x58] sm:$0xff]  ;;  %v28_v6 = vld [vmem:[%s287_s1 + $0x50] sm:$0xff]  ;;  %v105_v19 = vand.u32 127, %v104_v18  ;;  %195 = vset.pattern.permute.xlu1 %v201_v28 }
   0x3   :  { %159 = vmatprep.subr.mxu0 %v199_v0  ;;  %v27_v7 = vld [vmem:[%s287_s1 + $0x48] sm:$0xff]  ;;  %v26_v8 = vld [vmem:[%s287_s1 + $0x40] sm:$0xff]  ;;  %v25_v9 = vld [vmem:[%s287_s1 + $0x38] sm:$0xff]  ;;  %196 = vset.pattern.permute.xlu0 %v201_v28 }
   0x4   :  { %160 = vmatpush3.msra.mxu0 %v32_v2  ;;  %v24_v10 = vld [vmem:[%s287_s1 + $0x30] sm:$0xff]  ;;  %v23_v11 = vld [vmem:[%s287_s1 + $0x28] sm:$0xff]  ;;  %v22_v12 = vld [vmem:[%s287_s1 + $0x20] sm:$0xff]  ;;  %vm106_vm1 = vcmp.lt.s32.totalorder %v105_v19, 2 }
   0x5   :  { %161 = vmatprep.subr.mxu0 %v199_v0  ;;  %v21_v13 = vld [vmem:[%s287_s1 + $0x18] sm:$0xff]  ;;  %v20_v14 = vld [vmem:[%s287_s1 + $0x10] sm:$0xff]  ;;  %v19_v15 = vld [vmem:[%s287_s1 + $0x8] sm:$0xff] }
   0x6   :  { %162 = vmatpush3.msra.mxu0 %v31_v3  ;;  %v18_v16 = vld [vmem:[%s287_s1] sm:$0xff] }
   0x7   :  { %163 = vmatprep.subr.mxu0 %v199_v0  ;;  %v17_v17 = vld [vmem:[%s288_s0] sm:$0xff] }
   0x8   :  { %164 = vmatpush3.msra.mxu0 %v30_v4  ;;  %v117_v32 = vld [vmem:[%s289_s2] sm:$0xff] }
   0x9   :  { %165 = vmatprep.subr.mxu0 %v199_v0  ;;  %v127_v35 = vld [vmem:[%s290_s3] sm:$0xff] }
   0xa   :  { %166 = vmatpush3.msra.mxu0 %v29_v5 }
   0xb   :  { %167 = vmatprep.subr.mxu0 %v199_v0 }
   0xc   :  { %168 = vmatpush3.msra.mxu0 %v28_v6 }
   0xd   :  { %169 = vmatprep.subr.mxu0 %v199_v0 }
   0xe   :  { %170 = vmatpush3.msra.mxu0 %v27_v7 }
   0xf   :  { %171 = vmatprep.subr.mxu0 %v199_v0 }
  0x10   :  { %172 = vmatpush3.msra.mxu0 %v26_v8 }
  0x11   :  { %173 = vmatprep.subr.mxu0 %v199_v0 }
  0x12   :  { %174 = vmatpush3.msra.mxu0 %v25_v9 }
  0x13   :  { %175 = vmatprep.subr.mxu0 %v199_v0 }
  0x14   :  { %176 = vmatpush3.msra.mxu0 %v24_v10 }
  0x15   :  { %177 = vmatprep.subr.mxu0 %v199_v0 }
  0x16   :  { %178 = vmatpush3.msra.mxu0 %v23_v11 }
  0x17   :  { %179 = vmatprep.subr.mxu0 %v199_v0 }
  0x18   :  { %180 = vmatpush3.msra.mxu0 %v22_v12 }
  0x19   :  { %181 = vmatprep.subr.mxu0 %v199_v0 }
  0x1a   :  { %182 = vmatpush3.msra.mxu0 %v21_v13 }
  0x1b   :  { %183 = vmatprep.subr.mxu0 %v199_v0 }
  0x1c   :  { %184 = vmatpush3.msra.mxu0 %v20_v14 }
  0x1d   :  { %185 = vmatprep.subr.mxu0 %v199_v0 }
  0x1e   :  { %186 = vmatpush3.msra.mxu0 %v19_v15 }
  0x1f   :  { %187 = vmatprep.subr.mxu0 %v199_v0 }
  0x20   :  { %188 = vmatpush3.msra.mxu0 %v18_v16 }
  0x21   :  { %190 = vmatmul.mubr.f32.vlgmr.msra.gmra.mxu0 %v17_v17 }
  0xe1   :  { %v100_v20 = vpop.f32.mrf.mxu0 }
  0xe2   :  { %v107_v21 = vsel %vm106_vm1, %v100_v20, 0.0 }
  0xe3   :  { %108 = vadd.xlane.f32.xlu0 %v107_v21  ;;  %v191_v22 = vpop.f32.mrf.mxu0 }
 0x16c   :  { %v109_v23 = vpop.xlane.xlu0 %108 }
 0x16d   :  { %v110_v24 = vmul.f32 0.5, %v109_v23 }
 0x16f   :  { %v111_v25 = vsub.f32 %v100_v20, %v110_v24 }
 0x171   :  { %v112_v26 = vsel %vm106_vm1, %v111_v25, 0.0 }
 0x172   :  { %v113_v27 = vmul.f32 %v112_v26, %v112_v26 }
 0x174   :  { %114 = vadd.xlane.f32.xlu0 %v113_v27 }
 0x1fd   :  { %v115_v29 = vpop.xlane.xlu0 %114 }
 0x1fe   :  { %v116_v30 = vmul.f32 0.5, %v115_v29 }
 0x200   :  { %v118_v31 = vadd.f32 1e-05, %v116_v30 }
 0x202   :  { %197 = vrsqrt.f32 %v118_v31 }
 0x20f   :  { %v198_v33 = vpop.eup %197 }
 0x210   :  { %v120_v34 = vmul.f32 %v198_v33, %v117_v32 }
 0x212   :  { %123 = vperm.xlu1 %195, %v120_v34  }
 0x216   :  { %130 = vperm.xlu1 %195, %v127_v35  }
 0x28d   :  { %v124_v36 = vpop.permute.xlu1 %123 }
 0x28e   :  { %v126_v37 = vmul.f32 %v124_v36, %v111_v25 }
 0x291   :  { %v131_v38 = vpop.permute.xlu1 %130 }
 0x292   :  { %v133_v39 = vadd.f32 %v131_v38, %v126_v37 }
 0x294   :  { %v134_v40 = vmax.f32 %v133_v39, 0.0 }
 0x296   :  { %135 = vst [vmem:[%s291_s4] sm:$0xff] %v134_v40 }

// kernel: vaegan_vae_forward.25
= control target key start
LH: loop header
LB: loop body
LE: loop exit
PB: predicated region body
PF: predicated region fallthrough
CT: control target
= control target key end

     0   :  { %v199_v0 = vmov 0.0   ;;  %vm200_vm0 = vmmov 0   ;;  %v104_v18 = vlaneseq  ;;  %v201_v28 = vmov 0   ;;  %s287_s1 = inlined_call_operand.vmem [shape: f32[128,128], index: 1, kind: input, shape index: {}]   ;;  %s288_s0 = inlined_call_operand.vmem [shape: f32[8,128], index: 0, kind: input, shape index: {}]   ;;  %s289_s2 = inlined_call_operand.vmem [shape: f32[8,1], index: 2, kind: input, shape index: {}]   ;;  %s290_s3 = inlined_call_operand.vmem [shape: f32[8,1], index: 3, kind: input, shape index: {}]   ;;  %s291_s4 = inlined_call_operand.vmem [shape: f32[8,128], index: 4, kind: output, shape index: {}]  }
   0x1   :  { %157 = vmatprep.subr.mxu0 %v199_v0  ;;  %v33_v1 = vld [vmem:[%s287_s1 + $0x78] sm:$0xff]  ;;  %v32_v2 = vld [vmem:[%s287_s1 + $0x70] sm:$0xff]  ;;  %189 = vmatprep.mubr.msk.f32.mxu0 %vm200_vm0, %v199_v0  ;;  %v31_v3 = vld [vmem:[%s287_s1 + $0x68] sm:$0xff] }
   0x2   :  { %158 = vmatpush3.msra.mxu0 %v33_v1  ;;  %v30_v4 = vld [vmem:[%s287_s1 + $0x60] sm:$0xff]  ;;  %v29_v5 = vld [vmem:[%s287_s1 + $0x58] sm:$0xff]  ;;  %v28_v6 = vld [vmem:[%s287_s1 + $0x50] sm:$0xff]  ;;  %v105_v19 = vand.u32 127, %v104_v18  ;;  %195 = vset.pattern.permute.xlu1 %v201_v28 }
   0x3   :  { %159 = vmatprep.subr.mxu0 %v199_v0  ;;  %v27_v7 = vld [vmem:[%s287_s1 + $0x48] sm:$0xff]  ;;  %v26_v8 = vld [vmem:[%s287_s1 + $0x40] sm:$0xff]  ;;  %v25_v9 = vld [vmem:[%s287_s1 + $0x38] sm:$0xff]  ;;  %196 = vset.pattern.permute.xlu0 %v201_v28 }
   0x4   :  { %160 = vmatpush3.msra.mxu0 %v32_v2  ;;  %v24_v10 = vld [vmem:[%s287_s1 + $0x30] sm:$0xff]  ;;  %v23_v11 = vld [vmem:[%s287_s1 + $0x28] sm:$0xff]  ;;  %v22_v12 = vld [vmem:[%s287_s1 + $0x20] sm:$0xff]  ;;  %vm106_vm1 = vcmp.lt.s32.totalorder %v105_v19, 8 }
   0x5   :  { %161 = vmatprep.subr.mxu0 %v199_v0  ;;  %v21_v13 = vld [vmem:[%s287_s1 + $0x18] sm:$0xff]  ;;  %v20_v14 = vld [vmem:[%s287_s1 + $0x10] sm:$0xff]  ;;  %v19_v15 = vld [vmem:[%s287_s1 + $0x8] sm:$0xff] }
   0x6   :  { %162 = vmatpush3.msra.mxu0 %v31_v3  ;;  %v18_v16 = vld [vmem:[%s287_s1] sm:$0xff] }
   0x7   :  { %163 = vmatprep.subr.mxu0 %v199_v0  ;;  %v17_v17 = vld [vmem:[%s288_s0] sm:$0xff] }
   0x8   :  { %164 = vmatpush3.msra.mxu0 %v30_v4  ;;  %v117_v32 = vld [vmem:[%s289_s2] sm:$0xff] }
   0x9   :  { %165 = vmatprep.subr.mxu0 %v199_v0  ;;  %v127_v35 = vld [vmem:[%s290_s3] sm:$0xff] }
   0xa   :  { %166 = vmatpush3.msra.mxu0 %v29_v5 }
   0xb   :  { %167 = vmatprep.subr.mxu0 %v199_v0 }
   0xc   :  { %168 = vmatpush3.msra.mxu0 %v28_v6 }
   0xd   :  { %169 = vmatprep.subr.mxu0 %v199_v0 }
   0xe   :  { %170 = vmatpush3.msra.mxu0 %v27_v7 }
   0xf   :  { %171 = vmatprep.subr.mxu0 %v199_v0 }
  0x10   :  { %172 = vmatpush3.msra.mxu0 %v26_v8 }
  0x11   :  { %173 = vmatprep.subr.mxu0 %v199_v0 }
  0x12   :  { %174 = vmatpush3.msra.mxu0 %v25_v9 }
  0x13   :  { %175 = vmatprep.subr.mxu0 %v199_v0 }
  0x14   :  { %176 = vmatpush3.msra.mxu0 %v24_v10 }
  0x15   :  { %177 = vmatprep.subr.mxu0 %v199_v0 }
  0x16   :  { %178 = vmatpush3.msra.mxu0 %v23_v11 }
  0x17   :  { %179 = vmatprep.subr.mxu0 %v199_v0 }
  0x18   :  { %180 = vmatpush3.msra.mxu0 %v22_v12 }
  0x19   :  { %181 = vmatprep.subr.mxu0 %v199_v0 }
  0x1a   :  { %182 = vmatpush3.msra.mxu0 %v21_v13 }
  0x1b   :  { %183 = vmatprep.subr.mxu0 %v199_v0 }
  0x1c   :  { %184 = vmatpush3.msra.mxu0 %v20_v14 }
  0x1d   :  { %185 = vmatprep.subr.mxu0 %v199_v0 }
  0x1e   :  { %186 = vmatpush3.msra.mxu0 %v19_v15 }
  0x1f   :  { %187 = vmatprep.subr.mxu0 %v199_v0 }
  0x20   :  { %188 = vmatpush3.msra.mxu0 %v18_v16 }
  0x21   :  { %190 = vmatmul.mubr.f32.vlgmr.msra.gmra.mxu0 %v17_v17 }
  0xe1   :  { %v100_v20 = vpop.f32.mrf.mxu0 }
  0xe2   :  { %v107_v21 = vsel %vm106_vm1, %v100_v20, 0.0 }
  0xe3   :  { %108 = vadd.xlane.f32.xlu0 %v107_v21  ;;  %v191_v22 = vpop.f32.mrf.mxu0 }
 0x16c   :  { %v109_v23 = vpop.xlane.xlu0 %108 }
 0x16d   :  { %v110_v24 = vmul.f32 0.125, %v109_v23 }
 0x16f   :  { %v111_v25 = vsub.f32 %v100_v20, %v110_v24 }
 0x171   :  { %v112_v26 = vsel %vm106_vm1, %v111_v25, 0.0 }
 0x172   :  { %v113_v27 = vmul.f32 %v112_v26, %v112_v26 }
 0x174   :  { %114 = vadd.xlane.f32.xlu0 %v113_v27 }
 0x1fd   :  { %v115_v29 = vpop.xlane.xlu0 %114 }
 0x1fe   :  { %v116_v30 = vmul.f32 0.125, %v115_v29 }
 0x200   :  { %v118_v31 = vadd.f32 1e-05, %v116_v30 }
 0x202   :  { %197 = vrsqrt.f32 %v118_v31 }
 0x20f   :  { %v198_v33 = vpop.eup %197 }
 0x210   :  { %v120_v34 = vmul.f32 %v198_v33, %v117_v32 }
 0x212   :  { %123 = vperm.xlu1 %195, %v120_v34  }
 0x216   :  { %130 = vperm.xlu1 %195, %v127_v35  }
 0x28d   :  { %v124_v36 = vpop.permute.xlu1 %123 }
 0x28e   :  { %v126_v37 = vmul.f32 %v124_v36, %v111_v25 }
 0x291   :  { %v131_v38 = vpop.permute.xlu1 %130 }
 0x292   :  { %v133_v39 = vadd.f32 %v131_v38, %v126_v37 }
 0x294   :  { %v134_v40 = vmax.f32 %v133_v39, 0.0 }
 0x296   :  { %135 = vst [vmem:[%s291_s4] sm:$0xff] %v134_v40 }

// kernel: vaegan_vae_forward.26
= control target key start
LH: loop header
LB: loop body
LE: loop exit
PB: predicated region body
PF: predicated region fallthrough
CT: control target
= control target key end

     0   :  { %v199_v0 = vmov 0.0   ;;  %vm200_vm0 = vmmov 0   ;;  %v104_v18 = vlaneseq  ;;  %v201_v28 = vmov 0   ;;  %s287_s1 = inlined_call_operand.vmem [shape: f32[128,128], index: 1, kind: input, shape index: {}]   ;;  %s288_s0 = inlined_call_operand.vmem [shape: f32[8,128], index: 0, kind: input, shape index: {}]   ;;  %s289_s2 = inlined_call_operand.vmem [shape: f32[8,1], index: 2, kind: input, shape index: {}]   ;;  %s290_s3 = inlined_call_operand.vmem [shape: f32[8,1], index: 3, kind: input, shape index: {}]   ;;  %s291_s4 = inlined_call_operand.vmem [shape: f32[8,128], index: 4, kind: output, shape index: {}]  }
   0x1   :  { %157 = vmatprep.subr.mxu0 %v199_v0  ;;  %v33_v1 = vld [vmem:[%s287_s1 + $0x78] sm:$0xff]  ;;  %v32_v2 = vld [vmem:[%s287_s1 + $0x70] sm:$0xff]  ;;  %189 = vmatprep.mubr.msk.f32.mxu0 %vm200_vm0, %v199_v0  ;;  %v31_v3 = vld [vmem:[%s287_s1 + $0x68] sm:$0xff] }
   0x2   :  { %158 = vmatpush3.msra.mxu0 %v33_v1  ;;  %v30_v4 = vld [vmem:[%s287_s1 + $0x60] sm:$0xff]  ;;  %v29_v5 = vld [vmem:[%s287_s1 + $0x58] sm:$0xff]  ;;  %v28_v6 = vld [vmem:[%s287_s1 + $0x50] sm:$0xff]  ;;  %v105_v19 = vand.u32 127, %v104_v18  ;;  %195 = vset.pattern.permute.xlu1 %v201_v28 }
   0x3   :  { %159 = vmatprep.subr.mxu0 %v199_v0  ;;  %v27_v7 = vld [vmem:[%s287_s1 + $0x48] sm:$0xff]  ;;  %v26_v8 = vld [vmem:[%s287_s1 + $0x40] sm:$0xff]  ;;  %v25_v9 = vld [vmem:[%s287_s1 + $0x38] sm:$0xff]  ;;  %196 = vset.pattern.permute.xlu0 %v201_v28 }
   0x4   :  { %160 = vmatpush3.msra.mxu0 %v32_v2  ;;  %v24_v10 = vld [vmem:[%s287_s1 + $0x30] sm:$0xff]  ;;  %v23_v11 = vld [vmem:[%s287_s1 + $0x28] sm:$0xff]  ;;  %v22_v12 = vld [vmem:[%s287_s1 + $0x20] sm:$0xff]  ;;  %vm106_vm1 = vcmp.lt.s32.totalorder %v105_v19, 32 }
   0x5   :  { %161 = vmatprep.subr.mxu0 %v199_v0  ;;  %v21_v13 = vld [vmem:[%s287_s1 + $0x18] sm:$0xff]  ;;  %v20_v14 = vld [vmem:[%s287_s1 + $0x10] sm:$0xff]  ;;  %v19_v15 = vld [vmem:[%s287_s1 + $0x8] sm:$0xff] }
   0x6   :  { %162 = vmatpush3.msra.mxu0 %v31_v3  ;;  %v18_v16 = vld [vmem:[%s287_s1] sm:$0xff] }
   0x7   :  { %163 = vmatprep.subr.mxu0 %v199_v0  ;;  %v17_v17 = vld [vmem:[%s288_s0] sm:$0xff] }
   0x8   :  { %164 = vmatpush3.msra.mxu0 %v30_v4  ;;  %v117_v32 = vld [vmem:[%s289_s2] sm:$0xff] }
   0x9   :  { %165 = vmatprep.subr.mxu0 %v199_v0  ;;  %v127_v35 = vld [vmem:[%s290_s3] sm:$0xff] }
   0xa   :  { %166 = vmatpush3.msra.mxu0 %v29_v5 }
   0xb   :  { %167 = vmatprep.subr.mxu0 %v199_v0 }
   0xc   :  { %168 = vmatpush3.msra.mxu0 %v28_v6 }
   0xd   :  { %169 = vmatprep.subr.mxu0 %v199_v0 }
   0xe   :  { %170 = vmatpush3.msra.mxu0 %v27_v7 }
   0xf   :  { %171 = vmatprep.subr.mxu0 %v199_v0 }
  0x10   :  { %172 = vmatpush3.msra.mxu0 %v26_v8 }
  0x11   :  { %173 = vmatprep.subr.mxu0 %v199_v0 }
  0x12   :  { %174 = vmatpush3.msra.mxu0 %v25_v9 }
  0x13   :  { %175 = vmatprep.subr.mxu0 %v199_v0 }
  0x14   :  { %176 = vmatpush3.msra.mxu0 %v24_v10 }
  0x15   :  { %177 = vmatprep.subr.mxu0 %v199_v0 }
  0x16   :  { %178 = vmatpush3.msra.mxu0 %v23_v11 }
  0x17   :  { %179 = vmatprep.subr.mxu0 %v199_v0 }
  0x18   :  { %180 = vmatpush3.msra.mxu0 %v22_v12 }
  0x19   :  { %181 = vmatprep.subr.mxu0 %v199_v0 }
  0x1a   :  { %182 = vmatpush3.msra.mxu0 %v21_v13 }
  0x1b   :  { %183 = vmatprep.subr.mxu0 %v199_v0 }
  0x1c   :  { %184 = vmatpush3.msra.mxu0 %v20_v14 }
  0x1d   :  { %185 = vmatprep.subr.mxu0 %v199_v0 }
  0x1e   :  { %186 = vmatpush3.msra.mxu0 %v19_v15 }
  0x1f   :  { %187 = vmatprep.subr.mxu0 %v199_v0 }
  0x20   :  { %188 = vmatpush3.msra.mxu0 %v18_v16 }
  0x21   :  { %190 = vmatmul.mubr.f32.vlgmr.msra.gmra.mxu0 %v17_v17 }
  0xe1   :  { %v100_v20 = vpop.f32.mrf.mxu0 }
  0xe2   :  { %v107_v21 = vsel %vm106_vm1, %v100_v20, 0.0 }
  0xe3   :  { %108 = vadd.xlane.f32.xlu0 %v107_v21  ;;  %v191_v22 = vpop.f32.mrf.mxu0 }
 0x16c   :  { %v109_v23 = vpop.xlane.xlu0 %108 }
 0x16d   :  { %v110_v24 = vmul.f32 0.03125, %v109_v23 }
 0x16f   :  { %v111_v25 = vsub.f32 %v100_v20, %v110_v24 }
 0x171   :  { %v112_v26 = vsel %vm106_vm1, %v111_v25, 0.0 }
 0x172   :  { %v113_v27 = vmul.f32 %v112_v26, %v112_v26 }
 0x174   :  { %114 = vadd.xlane.f32.xlu0 %v113_v27 }
 0x1fd   :  { %v115_v29 = vpop.xlane.xlu0 %114 }
 0x1fe   :  { %v116_v30 = vmul.f32 0.03125, %v115_v29 }
 0x200   :  { %v118_v31 = vadd.f32 1e-05, %v116_v30 }
 0x202   :  { %197 = vrsqrt.f32 %v118_v31 }
 0x20f   :  { %v198_v33 = vpop.eup %197 }
 0x210   :  { %v120_v34 = vmul.f32 %v198_v33, %v117_v32 }
 0x212   :  { %123 = vperm.xlu1 %195, %v120_v34  }
 0x216   :  { %130 = vperm.xlu1 %195, %v127_v35  }
 0x28d   :  { %v124_v36 = vpop.permute.xlu1 %123 }
 0x28e   :  { %v126_v37 = vmul.f32 %v124_v36, %v111_v25 }
 0x291   :  { %v131_v38 = vpop.permute.xlu1 %130 }
 0x292   :  { %v133_v39 = vadd.f32 %v131_v38, %v126_v37 }
 0x294   :  { %v134_v40 = vmax.f32 %v133_v39, 0.0 }
 0x296   :  { %135 = vst [vmem:[%s291_s4] sm:$0xff] %v134_v40 }

// kernel: vaegan_vae_forward.27
= control target key start
LH: loop header
LB: loop body
LE: loop exit
PB: predicated region body
PF: predicated region fallthrough
CT: control target
= control target key end

     0   :  { %v199_v0 = vmov 0.0   ;;  %vm200_vm0 = vmmov 0   ;;  %v201_v24 = vmov 0   ;;  %s287_s1 = inlined_call_operand.vmem [shape: f32[128,128], index: 1, kind: input, shape index: {}]   ;;  %s288_s0 = inlined_call_operand.vmem [shape: f32[8,128], index: 0, kind: input, shape index: {}]   ;;  %s289_s2 = inlined_call_operand.vmem [shape: f32[8,1], index: 2, kind: input, shape index: {}]   ;;  %s290_s3 = inlined_call_operand.vmem [shape: f32[8,1], index: 3, kind: input, shape index: {}]   ;;  %s291_s4 = inlined_call_operand.vmem [shape: f32[8,128], index: 4, kind: output, shape index: {}]  }
   0x1   :  { %157 = vmatprep.subr.mxu0 %v199_v0  ;;  %v33_v1 = vld [vmem:[%s287_s1 + $0x78] sm:$0xff]  ;;  %v32_v2 = vld [vmem:[%s287_s1 + $0x70] sm:$0xff]  ;;  %189 = vmatprep.mubr.msk.f32.mxu0 %vm200_vm0, %v199_v0  ;;  %v31_v3 = vld [vmem:[%s287_s1 + $0x68] sm:$0xff] }
   0x2   :  { %158 = vmatpush3.msra.mxu0 %v33_v1  ;;  %v30_v4 = vld [vmem:[%s287_s1 + $0x60] sm:$0xff]  ;;  %v29_v5 = vld [vmem:[%s287_s1 + $0x58] sm:$0xff]  ;;  %v28_v6 = vld [vmem:[%s287_s1 + $0x50] sm:$0xff]  ;;  %195 = vset.pattern.permute.xlu1 %v201_v24 }
   0x3   :  { %159 = vmatprep.subr.mxu0 %v199_v0  ;;  %v27_v7 = vld [vmem:[%s287_s1 + $0x48] sm:$0xff]  ;;  %v26_v8 = vld [vmem:[%s287_s1 + $0x40] sm:$0xff]  ;;  %v25_v9 = vld [vmem:[%s287_s1 + $0x38] sm:$0xff]  ;;  %196 = vset.pattern.permute.xlu0 %v201_v24 }
   0x4   :  { %160 = vmatpush3.msra.mxu0 %v32_v2  ;;  %v24_v10 = vld [vmem:[%s287_s1 + $0x30] sm:$0xff]  ;;  %v23_v11 = vld [vmem:[%s287_s1 + $0x28] sm:$0xff]  ;;  %v22_v12 = vld [vmem:[%s287_s1 + $0x20] sm:$0xff] }
   0x5   :  { %161 = vmatprep.subr.mxu0 %v199_v0  ;;  %v21_v13 = vld [vmem:[%s287_s1 + $0x18] sm:$0xff]  ;;  %v20_v14 = vld [vmem:[%s287_s1 + $0x10] sm:$0xff]  ;;  %v19_v15 = vld [vmem:[%s287_s1 + $0x8] sm:$0xff] }
   0x6   :  { %162 = vmatpush3.msra.mxu0 %v31_v3  ;;  %v18_v16 = vld [vmem:[%s287_s1] sm:$0xff] }
   0x7   :  { %163 = vmatprep.subr.mxu0 %v199_v0  ;;  %v17_v17 = vld [vmem:[%s288_s0] sm:$0xff] }
   0x8   :  { %164 = vmatpush3.msra.mxu0 %v30_v4  ;;  %v117_v28 = vld [vmem:[%s289_s2] sm:$0xff] }
   0x9   :  { %165 = vmatprep.subr.mxu0 %v199_v0  ;;  %v127_v31 = vld [vmem:[%s290_s3] sm:$0xff] }
   0xa   :  { %166 = vmatpush3.msra.mxu0 %v29_v5 }
   0xb   :  { %167 = vmatprep.subr.mxu0 %v199_v0 }
   0xc   :  { %168 = vmatpush3.msra.mxu0 %v28_v6 }
   0xd   :  { %169 = vmatprep.subr.mxu0 %v199_v0 }
   0xe   :  { %170 = vmatpush3.msra.mxu0 %v27_v7 }
   0xf   :  { %171 = vmatprep.subr.mxu0 %v199_v0 }
  0x10   :  { %172 = vmatpush3.msra.mxu0 %v26_v8 }
  0x11   :  { %173 = vmatprep.subr.mxu0 %v199_v0 }
  0x12   :  { %174 = vmatpush3.msra.mxu0 %v25_v9 }
  0x13   :  { %175 = vmatprep.subr.mxu0 %v199_v0 }
  0x14   :  { %176 = vmatpush3.msra.mxu0 %v24_v10 }
  0x15   :  { %177 = vmatprep.subr.mxu0 %v199_v0 }
  0x16   :  { %178 = vmatpush3.msra.mxu0 %v23_v11 }
  0x17   :  { %179 = vmatprep.subr.mxu0 %v199_v0 }
  0x18   :  { %180 = vmatpush3.msra.mxu0 %v22_v12 }
  0x19   :  { %181 = vmatprep.subr.mxu0 %v199_v0 }
  0x1a   :  { %182 = vmatpush3.msra.mxu0 %v21_v13 }
  0x1b   :  { %183 = vmatprep.subr.mxu0 %v199_v0 }
  0x1c   :  { %184 = vmatpush3.msra.mxu0 %v20_v14 }
  0x1d   :  { %185 = vmatprep.subr.mxu0 %v199_v0 }
  0x1e   :  { %186 = vmatpush3.msra.mxu0 %v19_v15 }
  0x1f   :  { %187 = vmatprep.subr.mxu0 %v199_v0 }
  0x20   :  { %188 = vmatpush3.msra.mxu0 %v18_v16 }
  0x21   :  { %190 = vmatmul.mubr.f32.vlgmr.msra.gmra.mxu0 %v17_v17 }
  0xe1   :  { %v100_v18 = vpop.f32.mrf.mxu0 }
  0xe2   :  { %108 = vadd.xlane.f32.xlu0 %v100_v18 }
  0xe3   :  { %v191_v19 = vpop.f32.mrf.mxu0 }
 0x16b   :  { %v109_v20 = vpop.xlane.xlu0 %108 }
 0x16c   :  { %v110_v21 = vmul.f32 0.0078125, %v109_v20 }
 0x16e   :  { %v111_v22 = vsub.f32 %v100_v18, %v110_v21 }
 0x170   :  { %v113_v23 = vmul.f32 %v111_v22, %v111_v22 }
 0x172   :  { %114 = vadd.xlane.f32.xlu0 %v113_v23 }
 0x1fb   :  { %v115_v25 = vpop.xlane.xlu0 %114 }
 0x1fc   :  { %v116_v26 = vmul.f32 0.0078125, %v115_v25 }
 0x1fe   :  { %v118_v27 = vadd.f32 1e-05, %v116_v26 }
 0x200   :  { %197 = vrsqrt.f32 %v118_v27 }
 0x20d   :  { %v198_v29 = vpop.eup %197 }
 0x20e   :  { %v120_v30 = vmul.f32 %v198_v29, %v117_v28 }
 0x210   :  { %123 = vperm.xlu1 %195, %v120_v30  }
 0x214   :  { %130 = vperm.xlu1 %195, %v127_v31  }
 0x28b   :  { %v124_v32 = vpop.permute.xlu1 %123 }
 0x28c   :  { %v126_v33 = vmul.f32 %v124_v32, %v111_v22 }
 0x28f   :  { %v131_v34 = vpop.permute.xlu1 %130 }
 0x290   :  { %v133_v35 = vadd.f32 %v131_v34, %v126_v33 }
 0x292   :  { %v134_v36 = vmax.f32 %v133_v35, 0.0 }
 0x294   :  { %135 = vst [vmem:[%s291_s4] sm:$0xff] %v134_v36 }

// kernel: vaegan_vae_forward.28
= control target key start
LH: loop header
LB: loop body
LE: loop exit
PB: predicated region body
PF: predicated region fallthrough
CT: control target
= control target key end

     0   :  { %v321_v3 = vmov 0.0   ;;  %s586_s1 = inlined_call_operand.vmem [shape: f32[128,512], index: 1, kind: input, shape index: {}]   ;;  %s587_s0 = inlined_call_operand.vmem [shape: f32[8,128], index: 0, kind: input, shape index: {}]   ;;  %s588_s2 = inlined_call_operand.vmem [shape: f32[8,1], index: 2, kind: input, shape index: {}]   ;;  %s589_s5 = inlined_call_operand.vmem [shape: f32[8,512], index: 5, kind: output, shape index: {0}]   ;;  %s590_s3 = inlined_call_operand.vmem [shape: f32[8,1], index: 3, kind: input, shape index: {}]   ;;  %s591_s4 = inlined_call_operand.vmem [shape: f32[8,1], index: 4, kind: input, shape index: {}]   ;;  %s592_s6 = inlined_call_operand.vmem [shape: f32[8,512], index: 6, kind: output, shape index: {1}]  }
   0x1   :  { %v84_v0 = vld [vmem:[%s586_s1 + $0x1e8] sm:$0xff]  ;;  %v86_v1 = vld [vmem:[%s586_s1 + $0x1f8] sm:$0xff]  ;;  %v83_v2 = vld [vmem:[%s586_s1 + $0x1e0] sm:$0xff]  ;;  %157 = vmatprep.mubr.f32.mxu0 %v321_v3  ;;  %228 = vmatprep.mubr.f32.mxu1 %v321_v3  ;;  %v322_v3 = vmov 0  }
   0x2   :  { %93 = vmatprep.subr.mxu0 %v84_v0  ;;  %164 = vmatprep.subr.mxu1 %v86_v1  ;;  %v85_v4 = vld [vmem:[%s586_s1 + $0x1f0] sm:$0xff]  ;;  %v80_v5 = vld [vmem:[%s586_s1 + $0x1c8] sm:$0xff]  ;;  %v82_v6 = vld [vmem:[%s586_s1 + $0x1d8] sm:$0xff] }
   0x3   :  { %94 = vmatpush1.msra.mxu0 %v83_v2  ;;  %165 = vmatpush1.msra.mxu1 %v85_v4  ;;  %v79_v7 = vld [vmem:[%s586_s1 + $0x1c0] sm:$0xff]  ;;  %v81_v8 = vld [vmem:[%s586_s1 + $0x1d0] sm:$0xff]  ;;  %v76_v9 = vld [vmem:[%s586_s1 + $0x1a8] sm:$0xff] }
   0x4   :  { %95 = vmatprep.subr.mxu0 %v80_v5  ;;  %166 = vmatprep.subr.mxu1 %v82_v6  ;;  %v78_v10 = vld [vmem:[%s586_s1 + $0x1b8] sm:$0xff]  ;;  %v75_v11 = vld [vmem:[%s586_s1 + $0x1a0] sm:$0xff]  ;;  %v77_v12 = vld [vmem:[%s586_s1 + $0x1b0] sm:$0xff] }
   0x5   :  { %96 = vmatpush1.msra.mxu0 %v79_v7  ;;  %167 = vmatpush1.msra.mxu1 %v81_v8  ;;  %v72_v13 = vld [vmem:[%s586_s1 + $0x188] sm:$0xff]  ;;  %v74_v14 = vld [vmem:[%s586_s1 + $0x198] sm:$0xff]  ;;  %v71_v15 = vld [vmem:[%s586_s1 + $0x180] sm:$0xff] }
   0x6   :  { %97 = vmatprep.subr.mxu0 %v76_v9  ;;  %168 = vmatprep.subr.mxu1 %v78_v10  ;;  %v73_v16 = vld [vmem:[%s586_s1 + $0x190] sm:$0xff]  ;;  %v68_v17 = vld [vmem:[%s586_s1 + $0x168] sm:$0xff]  ;;  %v70_v18 = vld [vmem:[%s586_s1 + $0x178] sm:$0xff] }
   0x7   :  { %98 = vmatpush1.msra.mxu0 %v75_v11  ;;  %169 = vmatpush1.msra.mxu1 %v77_v12  ;;  %v67_v19 = vld [vmem:[%s586_s1 + $0x160] sm:$0xff]  ;;  %v69_v20 = vld [vmem:[%s586_s1 + $0x170] sm:$0xff]  ;;  %v64_v21 = vld [vmem:[%s586_s1 + $0x148] sm:$0xff] }
   0x8   :  { %99 = vmatprep.subr.mxu0 %v72_v13  ;;  %170 = vmatprep.subr.mxu1 %v74_v14  ;;  %v66_v22 = vld [vmem:[%s586_s1 + $0x158] sm:$0xff]  ;;  %v63_v23 = vld [vmem:[%s586_s1 + $0x140] sm:$0xff]  ;;  %v65_v24 = vld [vmem:[%s586_s1 + $0x150] sm:$0xff] }
   0x9   :  { %100 = vmatpush1.msra.mxu0 %v71_v15  ;;  %171 = vmatpush1.msra.mxu1 %v73_v16  ;;  %v60_v25 = vld [vmem:[%s586_s1 + $0x128] sm:$0xff]  ;;  %v62_v26 = vld [vmem:[%s586_s1 + $0x138] sm:$0xff]  ;;  %v59_v27 = vld [vmem:[%s586_s1 + $0x120] sm:$0xff] }
   0xa   :  { %101 = vmatprep.subr.mxu0 %v68_v17  ;;  %172 = vmatprep.subr.mxu1 %v70_v18  ;;  %v61_v28 = vld [vmem:[%s586_s1 + $0x130] sm:$0xff]  ;;  %v56_v29 = vld [vmem:[%s586_s1 + $0x108] sm:$0xff]  ;;  %v58_v30 = vld [vmem:[%s586_s1 + $0x118] sm:$0xff] }
   0xb   :  { %102 = vmatpush1.msra.mxu0 %v67_v19  ;;  %173 = vmatpush1.msra.mxu1 %v69_v20  ;;  %v55_v31 = vld [vmem:[%s586_s1 + $0x100] sm:$0xff]  ;;  %v57_v32 = vld [vmem:[%s586_s1 + $0x110] sm:$0xff]  ;;  %v52_v33 = vld [vmem:[%s586_s1 + $0xe8] sm:$0xff] }
   0xc   :  { %103 = vmatprep.subr.mxu0 %v64_v21  ;;  %174 = vmatprep.subr.mxu1 %v66_v22  ;;  %v54_v34 = vld [vmem:[%s586_s1 + $0xf8] sm:$0xff]  ;;  %v51_v35 = vld [vmem:[%s586_s1 + $0xe0] sm:$0xff]  ;;  %v53_v36 = vld [vmem:[%s586_s1 + $0xf0] sm:$0xff] }
   0xd   :  { %104 = vmatpush1.msra.mxu0 %v63_v23  ;;  %175 = vmatpush1.msra.mxu1 %v65_v24  ;;  %v48_v37 = vld [vmem:[%s586_s1 + $0xc8] sm:$0xff]  ;;  %v50_v38 = vld [vmem:[%s586_s1 + $0xd8] sm:$0xff]  ;;  %v47_v39 = vld [vmem:[%s586_s1 + $0xc0] sm:$0xff] }
   0xe   :  { %105 = vmatprep.subr.mxu0 %v60_v25  ;;  %176 = vmatprep.subr.mxu1 %v62_v26  ;;  %v49_v40 = vld [vmem:[%s586_s1 + $0xd0] sm:$0xff]  ;;  %v44_v41 = vld [vmem:[%s586_s1 + $0xa8] sm:$0xff]  ;;  %v46_v42 = vld [vmem:[%s586_s1 + $0xb8] sm:$0xff] }
   0xf   :  { %106 = vmatpush1.msra.mxu0 %v59_v27  ;;  %177 = vmatpush1.msra.mxu1 %v61_v28  ;;  %v43_v43 = vld [vmem:[%s586_s1 + $0xa0] sm:$0xff]  ;;  %v45_v44 = vld [vmem:[%s586_s1 + $0xb0] sm:$0xff]  ;;  %v40_v45 = vld [vmem:[%s586_s1 + $0x88] sm:$0xff] }
  0x10   :  { %107 = vmatprep.subr.mxu0 %v56_v29  ;;  %178 = vmatprep.subr.mxu1 %v58_v30  ;;  %v42_v46 = vld [vmem:[%s586_s1 + $0x98] sm:$0xff]  ;;  %v39_v47 = vld [vmem:[%s586_s1 + $0x80] sm:$0xff]  ;;  %v41_v48 = vld [vmem:[%s586_s1 + $0x90] sm:$0xff] }
  0x11   :  { %108 = vmatpush1.msra.mxu0 %v55_v31  ;;  %179 = vmatpush1.msra.mxu1 %v57_v32  ;;  %v36_v49 = vld [vmem:[%s586_s1 + $0x68] sm:$0xff]  ;;  %v38_v50 = vld [vmem:[%s586_s1 + $0x78] sm:$0xff]  ;;  %v35_v51 = vld [vmem:[%s586_s1 + $0x60] sm:$0xff] }
  0x12   :  { %109 = vmatprep.subr.mxu0 %v52_v33  ;;  %180 = vmatprep.subr.mxu1 %v54_v34  ;;  %v37_v52 = vld [vmem:[%s586_s1 + $0x70] sm:$0xff]  ;;  %v32_v53 = vld [vmem:[%s586_s1 + $0x48] sm:$0xff]  ;;  %v34_v54 = vld [vmem:[%s586_s1 + $0x58] sm:$0xff] }
  0x13   :  { %110 = vmatpush1.msra.mxu0 %v51_v35  ;;  %181 = vmatpush1.msra.mxu1 %v53_v36  ;;  %v31_v55 = vld [vmem:[%s586_s1 + $0x40] sm:$0xff]  ;;  %v33_v56 = vld [vmem:[%s586_s1 + $0x50] sm:$0xff]  ;;  %v28_v57 = vld [vmem:[%s586_s1 + $0x28] sm:$0xff] }
  0x14   :  { %111 = vmatprep.subr.mxu0 %v48_v37  ;;  %182 = vmatprep.subr.mxu1 %v50_v38  ;;  %v30_v58 = vld [vmem:[%s586_s1 + $0x38] sm:$0xff]  ;;  %v27_v59 = vld [vmem:[%s586_s1 + $0x20] sm:$0xff]  ;;  %v29_v60 = vld [vmem:[%s586_s1 + $0x30] sm:$0xff] }
  0x15   :  { %112 = vmatpush1.msra.mxu0 %v47_v39  ;;  %183 = vmatpush1.msra.mxu1 %v49_v40  ;;  %v24_v61 = vld [vmem:[%s586_s1 + $0x8] sm:$0xff]  ;;  %v26_v62 = vld [vmem:[%s586_s1 + $0x18] sm:$0xff]  ;;  %v23_v63 = vld [vmem:[%s586_s1] sm:$0xff] }
  0x16   :  { %113 = vmatprep.subr.mxu0 %v44_v41  ;;  %184 = vmatprep.subr.mxu1 %v46_v42  ;;  %v25_v0 = vld [vmem:[%s586_s1 + $0x10] sm:$0xff]  ;;  %v22_v1 = vld [vmem:[%s587_s0] sm:$0xff] }
  0x17   :  { %114 = vmatpush1.msra.mxu0 %v43_v43  ;;  %185 = vmatpush1.msra.mxu1 %v45_v44  ;;  %v87_v2 = vld [vmem:[%s588_s2] sm:$0xff] }
  0x18   :  { %115 = vmatprep.subr.mxu0 %v40_v45  ;;  %186 = vmatprep.subr.mxu1 %v42_v46  ;;  %v276_v32 = vld [vmem:[%s590_s3] sm:$0xff] }
  0x19   :  { %116 = vmatpush1.msra.mxu0 %v39_v47  ;;  %187 = vmatpush1.msra.mxu1 %v41_v48  ;;  %v289_v35 = vld [vmem:[%s591_s4] sm:$0xff] }
  0x1a   :  { %117 = vmatprep.subr.mxu0 %v36_v49  ;;  %188 = vmatprep.subr.mxu1 %v38_v50 }
  0x1b   :  { %118 = vmatpush1.msra.mxu0 %v35_v51  ;;  %189 = vmatpush1.msra.mxu1 %v37_v52 }
  0x1c   :  { %119 = vmatprep.subr.mxu0 %v32_v53  ;;  %190 = vmatprep.subr.mxu1 %v34_v54 }
  0x1d   :  { %120 = vmatpush1.msra.mxu0 %v31_v55  ;;  %191 = vmatpush1.msra.mxu1 %v33_v56 }
  0x1e   :  { %121 = vmatprep.subr.mxu0 %v28_v57  ;;  %192 = vmatprep.subr.mxu1 %v30_v58 }
  0x1f   :  { %122 = vmatpush1.msra.mxu0 %v27_v59  ;;  %193 = vmatpush1.msra.mxu1 %v29_v60 }
  0x20   :  { %123 = vmatprep.subr.mxu0 %v24_v61  ;;  %194 = vmatprep.subr.mxu1 %v26_v62 }
  0x21   :  { %124 = vmatpush1.msra.mxu0 %v23_v63  ;;  %195 = vmatpush1.msra.mxu1 %v25_v0 }
  0x22   :  { %158 = vmatmul.mubr.f32.vlgmr.msra.gmra.mxu0 %v22_v1  ;;  %229 = vmatmul.mubr.f32.vlgmr.msra.gmra.mxu1 %v22_v1 }
  0x23   :  { %317 = vset.pattern.permute.xlu0 %v322_v3  ;;  %318 = vset.pattern.permute.xlu1 %v322_v3 }
  0x24   :  { %90 = vperm.xlu0 %317, %v87_v2  }
  0x9f   :  { %v91_v4 = vpop.permute.xlu0 %90 }
  0xe2   :  { %v159_v5 = vpop.f32.mrf.mxu0  ;;  %v230_v6 = vpop.f32.mrf.mxu1 }
  0xe3   :  { %v160_v7 = vadd.f32 %v159_v5, %v91_v4  ;;  %v231_v8 = vadd.f32 %v230_v6, %v91_v4 }
  0xe4   :  { %v161_v9 = vpop.f32.mrf.mxu0  ;;  %v232_v10 = vpop.f32.mrf.mxu1 }
  0xe5   :  { %235 = vst [vmem:[%s589_s5] sm:$0xff] %v160_v7  ;;  %237 = vst [vmem:[%s589_s5 + $0x10] sm:$0xff] %v231_v8  ;;  %v162_v11 = vadd.f32 %v161_v9, %v91_v4  ;;  %v233_v12 = vadd.f32 %v232_v10, %v91_v4 }
  0xe7   :  { %236 = vst [vmem:[%s589_s5 + $0x8] sm:$0xff] %v162_v11  ;;  %v252_v13 = vadd.f32 %v162_v11, %v160_v7  ;;  %238 = vst [vmem:[%s589_s5 + $0x18] sm:$0xff] %v233_v12 }
  0xe9   :  { %v253_v14 = vadd.f32 %v252_v13, %v231_v8 }
  0xeb   :  { %v254_v15 = vadd.f32 %v253_v14, %v233_v12 }
  0xed   :  { %255 = vadd.xlane.f32.xlu0 %v254_v15 }
 0x176   :  { %v256_v16 = vpop.xlane.xlu0 %255 }
 0x177   :  { %v257_v17 = vmul.f32 0.001953125, %v256_v16 }
 0x179   :  { %v258_v18 = vsub.f32 %v160_v7, %v257_v17  ;;  %v259_v19 = vsub.f32 %v162_v11, %v257_v17  ;;  %v260_v20 = vsub.f32 %v231_v8, %v257_v17  ;;  %v261_v21 = vsub.f32 %v233_v12, %v257_v17 }
 0x17b   :  { %v266_v22 = vmul.f32 %v258_v18, %v258_v18  ;;  %v267_v23 = vmul.f32 %v259_v19, %v259_v19  ;;  %v268_v24 = vmul.f32 %v260_v20, %v260_v20  ;;  %v269_v26 = vmul.f32 %v261_v21, %v261_v21 }
 0x17d   :  { %v270_v25 = vadd.f32 %v267_v23, %v266_v22 }
 0x17f   :  { %v271_v27 = vadd.f32 %v270_v25, %v268_v24 }
 0x181   :  { %v272_v28 = vadd.f32 %v271_v27, %v269_v26 }
 0x183   :  { %273 = vadd.xlane.f32.xlu1 %v272_v28 }
 0x20c   :  { %v274_v29 = vpop.xlane.xlu1 %273 }
 0x20d   :  { %v275_v30 = vmul.f32 0.001953125, %v274_v29 }
 0x20f   :  { %v277_v31 = vadd.f32 1e-05, %v275_v30 }
 0x211   :  { %319 = vrsqrt.f32 %v277_v31 }
 0x21e   :  { %v320_v33 = vpop.eup %319 }
 0x21f   :  { %v279_v34 = vmul.f32 %v320_v33, %v276_v32 }
 0x221   :  { %282 = vperm.xlu1 %318, %v279_v34  }
 0x225   :  { %292 = vperm.xlu1 %318, %v289_v35  }
 0x29c   :  { %v283_v36 = vpop.permute.xlu1 %282 }
 0x29d   :  { %v285_v37 = vmul.f32 %v283_v36, %v258_v18  ;;  %v286_v38 = vmul.f32 %v283_v36, %v259_v19  ;;  %v287_v39 = vmul.f32 %v283_v36, %v260_v20  ;;  %v288_v40 = vmul.f32 %v283_v36, %v261_v21 }
 0x2a0   :  { %v293_v41 = vpop.permute.xlu1 %292 }
 0x2a1   :  { %v295_v42 = vadd.f32 %v293_v41, %v285_v37  ;;  %v296_v43 = vadd.f32 %v293_v41, %v286_v38  ;;  %v297_v44 = vadd.f32 %v293_v41, %v287_v39  ;;  %v298_v45 = vadd.f32 %v293_v41, %v288_v40 }
 0x2a3   :  { %v299_v46 = vmax.f32 %v295_v42, 0.0  ;;  %v300_v47 = vmax.f32 %v296_v43, 0.0  ;;  %v301_v48 = vmax.f32 %v297_v44, 0.0  ;;  %v302_v49 = vmax.f32 %v298_v45, 0.0 }
 0x2a5   :  { %303 = vst [vmem:[%s592_s6] sm:$0xff] %v299_v46  ;;  %304 = vst [vmem:[%s592_s6 + $0x8] sm:$0xff] %v300_v47 }
 0x2a6   :  { %305 = vst [vmem:[%s592_s6 + $0x10] sm:$0xff] %v301_v48  ;;  %306 = vst [vmem:[%s592_s6 + $0x18] sm:$0xff] %v302_v49 }

// kernel: vaegan_vae_forward.29
= control target key start
LH: loop header
LB: loop body
LE: loop exit
PB: predicated region body
PF: predicated region fallthrough
CT: control target
= control target key end

     0   :  { %v302_v3 = vmov 0.0   ;;  %s542_s1 = inlined_call_operand.vmem [shape: f32[128,512], index: 1, kind: input, shape index: {}]   ;;  %s543_s0 = inlined_call_operand.vmem [shape: f32[8,128], index: 0, kind: input, shape index: {}]   ;;  %s544_s2 = inlined_call_operand.vmem [shape: f32[8,1], index: 2, kind: input, shape index: {}]   ;;  %s545_s3 = inlined_call_operand.vmem [shape: f32[8,1], index: 3, kind: input, shape index: {}]   ;;  %s546_s4 = inlined_call_operand.vmem [shape: f32[8,512], index: 4, kind: output, shape index: {}]  }
   0x1   :  { %v79_v0 = vld [vmem:[%s542_s1 + $0x1e8] sm:$0xff]  ;;  %v78_v1 = vld [vmem:[%s542_s1 + $0x1e0] sm:$0xff]  ;;  %146 = vmatprep.mubr.f32.mxu0 %v302_v3  ;;  %217 = vmatprep.mubr.f32.mxu1 %v302_v3  ;;  %v81_v4 = vld [vmem:[%s542_s1 + $0x1f8] sm:$0xff] }
   0x2   :  { %v75_v2 = vld [vmem:[%s542_s1 + $0x1c8] sm:$0xff]  ;;  %82 = vmatprep.subr.mxu0 %v79_v0  ;;  %v74_v5 = vld [vmem:[%s542_s1 + $0x1c0] sm:$0xff]  ;;  %v80_v6 = vld [vmem:[%s542_s1 + $0x1f0] sm:$0xff]  ;;  %153 = vmatprep.subr.mxu1 %v81_v4 }
   0x3   :  { %83 = vmatpush1.msra.mxu0 %v78_v1  ;;  %v71_v7 = vld [vmem:[%s542_s1 + $0x1a8] sm:$0xff]  ;;  %v77_v8 = vld [vmem:[%s542_s1 + $0x1d8] sm:$0xff]  ;;  %154 = vmatpush1.msra.mxu1 %v80_v6  ;;  %v70_v9 = vld [vmem:[%s542_s1 + $0x1a0] sm:$0xff] }
   0x4   :  { %84 = vmatprep.subr.mxu0 %v75_v2  ;;  %v76_v10 = vld [vmem:[%s542_s1 + $0x1d0] sm:$0xff]  ;;  %v73_v11 = vld [vmem:[%s542_s1 + $0x1b8] sm:$0xff]  ;;  %155 = vmatprep.subr.mxu1 %v77_v8  ;;  %v67_v12 = vld [vmem:[%s542_s1 + $0x188] sm:$0xff] }
   0x5   :  { %85 = vmatpush1.msra.mxu0 %v74_v5  ;;  %v72_v13 = vld [vmem:[%s542_s1 + $0x1b0] sm:$0xff]  ;;  %156 = vmatpush1.msra.mxu1 %v76_v10  ;;  %v66_v14 = vld [vmem:[%s542_s1 + $0x180] sm:$0xff]  ;;  %v69_v15 = vld [vmem:[%s542_s1 + $0x198] sm:$0xff] }
   0x6   :  { %86 = vmatprep.subr.mxu0 %v71_v7  ;;  %157 = vmatprep.subr.mxu1 %v73_v11  ;;  %v63_v16 = vld [vmem:[%s542_s1 + $0x168] sm:$0xff]  ;;  %v68_v17 = vld [vmem:[%s542_s1 + $0x190] sm:$0xff]  ;;  %v62_v18 = vld [vmem:[%s542_s1 + $0x160] sm:$0xff] }
   0x7   :  { %87 = vmatpush1.msra.mxu0 %v70_v9  ;;  %158 = vmatpush1.msra.mxu1 %v72_v13  ;;  %v65_v19 = vld [vmem:[%s542_s1 + $0x178] sm:$0xff]  ;;  %v59_v20 = vld [vmem:[%s542_s1 + $0x148] sm:$0xff]  ;;  %v64_v21 = vld [vmem:[%s542_s1 + $0x170] sm:$0xff] }
   0x8   :  { %88 = vmatprep.subr.mxu0 %v67_v12  ;;  %159 = vmatprep.subr.mxu1 %v69_v15  ;;  %v58_v22 = vld [vmem:[%s542_s1 + $0x140] sm:$0xff]  ;;  %v61_v23 = vld [vmem:[%s542_s1 + $0x158] sm:$0xff]  ;;  %v55_v24 = vld [vmem:[%s542_s1 + $0x128] sm:$0xff] }
   0x9   :  { %89 = vmatpush1.msra.mxu0 %v66_v14  ;;  %160 = vmatpush1.msra.mxu1 %v68_v17  ;;  %v60_v25 = vld [vmem:[%s542_s1 + $0x150] sm:$0xff]  ;;  %v54_v26 = vld [vmem:[%s542_s1 + $0x120] sm:$0xff]  ;;  %v57_v27 = vld [vmem:[%s542_s1 + $0x138] sm:$0xff] }
   0xa   :  { %90 = vmatprep.subr.mxu0 %v63_v16  ;;  %161 = vmatprep.subr.mxu1 %v65_v19  ;;  %v51_v28 = vld [vmem:[%s542_s1 + $0x108] sm:$0xff]  ;;  %v56_v29 = vld [vmem:[%s542_s1 + $0x130] sm:$0xff]  ;;  %v50_v30 = vld [vmem:[%s542_s1 + $0x100] sm:$0xff] }
   0xb   :  { %91 = vmatpush1.msra.mxu0 %v62_v18  ;;  %162 = vmatpush1.msra.mxu1 %v64_v21  ;;  %v53_v31 = vld [vmem:[%s542_s1 + $0x118] sm:$0xff]  ;;  %v47_v32 = vld [vmem:[%s542_s1 + $0xe8] sm:$0xff]  ;;  %v52_v33 = vld [vmem:[%s542_s1 + $0x110] sm:$0xff] }
   0xc   :  { %92 = vmatprep.subr.mxu0 %v59_v20  ;;  %163 = vmatprep.subr.mxu1 %v61_v23  ;;  %v46_v34 = vld [vmem:[%s542_s1 + $0xe0] sm:$0xff]  ;;  %v49_v35 = vld [vmem:[%s542_s1 + $0xf8] sm:$0xff]  ;;  %v43_v36 = vld [vmem:[%s542_s1 + $0xc8] sm:$0xff] }
   0xd   :  { %93 = vmatpush1.msra.mxu0 %v58_v22  ;;  %164 = vmatpush1.msra.mxu1 %v60_v25  ;;  %v48_v37 = vld [vmem:[%s542_s1 + $0xf0] sm:$0xff]  ;;  %v42_v38 = vld [vmem:[%s542_s1 + $0xc0] sm:$0xff]  ;;  %v45_v39 = vld [vmem:[%s542_s1 + $0xd8] sm:$0xff]  ;;  %v303_v22 = vmov 0  }
   0xe   :  { %94 = vmatprep.subr.mxu0 %v55_v24  ;;  %165 = vmatprep.subr.mxu1 %v57_v27  ;;  %v39_v40 = vld [vmem:[%s542_s1 + $0xa8] sm:$0xff]  ;;  %v44_v41 = vld [vmem:[%s542_s1 + $0xd0] sm:$0xff]  ;;  %v38_v42 = vld [vmem:[%s542_s1 + $0xa0] sm:$0xff] }
   0xf   :  { %95 = vmatpush1.msra.mxu0 %v54_v26  ;;  %166 = vmatpush1.msra.mxu1 %v56_v29  ;;  %v41_v43 = vld [vmem:[%s542_s1 + $0xb8] sm:$0xff]  ;;  %v35_v44 = vld [vmem:[%s542_s1 + $0x88] sm:$0xff]  ;;  %v40_v45 = vld [vmem:[%s542_s1 + $0xb0] sm:$0xff] }
  0x10   :  { %96 = vmatprep.subr.mxu0 %v51_v28  ;;  %167 = vmatprep.subr.mxu1 %v53_v31  ;;  %v34_v46 = vld [vmem:[%s542_s1 + $0x80] sm:$0xff]  ;;  %v37_v47 = vld [vmem:[%s542_s1 + $0x98] sm:$0xff]  ;;  %v31_v48 = vld [vmem:[%s542_s1 + $0x68] sm:$0xff] }
  0x11   :  { %97 = vmatpush1.msra.mxu0 %v50_v30  ;;  %168 = vmatpush1.msra.mxu1 %v52_v33  ;;  %v36_v49 = vld [vmem:[%s542_s1 + $0x90] sm:$0xff]  ;;  %v30_v50 = vld [vmem:[%s542_s1 + $0x60] sm:$0xff]  ;;  %v33_v51 = vld [vmem:[%s542_s1 + $0x78] sm:$0xff] }
  0x12   :  { %98 = vmatprep.subr.mxu0 %v47_v32  ;;  %169 = vmatprep.subr.mxu1 %v49_v35  ;;  %v27_v52 = vld [vmem:[%s542_s1 + $0x48] sm:$0xff]  ;;  %v32_v53 = vld [vmem:[%s542_s1 + $0x70] sm:$0xff]  ;;  %v26_v54 = vld [vmem:[%s542_s1 + $0x40] sm:$0xff] }
  0x13   :  { %99 = vmatpush1.msra.mxu0 %v46_v34  ;;  %170 = vmatpush1.msra.mxu1 %v48_v37  ;;  %v29_v55 = vld [vmem:[%s542_s1 + $0x58] sm:$0xff]  ;;  %v23_v56 = vld [vmem:[%s542_s1 + $0x28] sm:$0xff]  ;;  %v28_v57 = vld [vmem:[%s542_s1 + $0x50] sm:$0xff] }
  0x14   :  { %100 = vmatprep.subr.mxu0 %v43_v36  ;;  %171 = vmatprep.subr.mxu1 %v45_v39  ;;  %v22_v58 = vld [vmem:[%s542_s1 + $0x20] sm:$0xff]  ;;  %v25_v59 = vld [vmem:[%s542_s1 + $0x38] sm:$0xff]  ;;  %v19_v60 = vld [vmem:[%s542_s1 + $0x8] sm:$0xff] }
  0x15   :  { %101 = vmatpush1.msra.mxu0 %v42_v38  ;;  %172 = vmatpush1.msra.mxu1 %v44_v41  ;;  %v24_v61 = vld [vmem:[%s542_s1 + $0x30] sm:$0xff]  ;;  %v18_v62 = vld [vmem:[%s542_s1] sm:$0xff]  ;;  %v21_v63 = vld [vmem:[%s542_s1 + $0x18] sm:$0xff] }
  0x16   :  { %102 = vmatprep.subr.mxu0 %v39_v40  ;;  %173 = vmatprep.subr.mxu1 %v41_v43  ;;  %v17_v0 = vld [vmem:[%s543_s0] sm:$0xff]  ;;  %v20_v1 = vld [vmem:[%s542_s1 + $0x10] sm:$0xff] }
  0x17   :  { %103 = vmatpush1.msra.mxu0 %v38_v42  ;;  %174 = vmatpush1.msra.mxu1 %v40_v45  ;;  %v261_v26 = vld [vmem:[%s544_s2] sm:$0xff] }
  0x18   :  { %104 = vmatprep.subr.mxu0 %v35_v44  ;;  %175 = vmatprep.subr.mxu1 %v37_v47  ;;  %v274_v29 = vld [vmem:[%s545_s3] sm:$0xff] }
  0x19   :  { %105 = vmatpush1.msra.mxu0 %v34_v46  ;;  %176 = vmatpush1.msra.mxu1 %v36_v49 }
  0x1a   :  { %106 = vmatprep.subr.mxu0 %v31_v48  ;;  %177 = vmatprep.subr.mxu1 %v33_v51 }
  0x1b   :  { %107 = vmatpush1.msra.mxu0 %v30_v50  ;;  %178 = vmatpush1.msra.mxu1 %v32_v53 }
  0x1c   :  { %108 = vmatprep.subr.mxu0 %v27_v52  ;;  %179 = vmatprep.subr.mxu1 %v29_v55 }
  0x1d   :  { %109 = vmatpush1.msra.mxu0 %v26_v54  ;;  %180 = vmatpush1.msra.mxu1 %v28_v57 }
  0x1e   :  { %110 = vmatprep.subr.mxu0 %v23_v56  ;;  %181 = vmatprep.subr.mxu1 %v25_v59 }
  0x1f   :  { %111 = vmatpush1.msra.mxu0 %v22_v58  ;;  %182 = vmatpush1.msra.mxu1 %v24_v61 }
  0x20   :  { %112 = vmatprep.subr.mxu0 %v19_v60  ;;  %183 = vmatprep.subr.mxu1 %v21_v63 }
  0x21   :  { %113 = vmatpush1.msra.mxu0 %v18_v62  ;;  %184 = vmatpush1.msra.mxu1 %v20_v1 }
  0x22   :  { %147 = vmatmul.mubr.f32.vlgmr.msra.gmra.mxu0 %v17_v0  ;;  %218 = vmatmul.mubr.f32.vlgmr.msra.gmra.mxu1 %v17_v0 }
  0x23   :  { %298 = vset.pattern.permute.xlu1 %v303_v22  ;;  %299 = vset.pattern.permute.xlu0 %v303_v22 }
  0xe2   :  { %v148_v2 = vpop.f32.mrf.mxu0  ;;  %v219_v4 = vpop.f32.mrf.mxu1 }
  0xe4   :  { %v150_v3 = vpop.f32.mrf.mxu0  ;;  %v221_v7 = vpop.f32.mrf.mxu1 }
  0xe5   :  { %v237_v5 = vadd.f32 %v150_v3, %v148_v2 }
  0xe7   :  { %v238_v6 = vadd.f32 %v237_v5, %v219_v4 }
  0xe9   :  { %v239_v8 = vadd.f32 %v238_v6, %v221_v7 }
  0xeb   :  { %240 = vadd.xlane.f32.xlu0 %v239_v8 }
 0x174   :  { %v241_v9 = vpop.xlane.xlu0 %240 }
 0x175   :  { %v242_v10 = vmul.f32 0.001953125, %v241_v9 }
 0x177   :  { %v243_v11 = vsub.f32 %v148_v2, %v242_v10  ;;  %v244_v12 = vsub.f32 %v150_v3, %v242_v10  ;;  %v245_v13 = vsub.f32 %v219_v4, %v242_v10  ;;  %v246_v14 = vsub.f32 %v221_v7, %v242_v10 }
 0x179   :  { %v251_v15 = vmul.f32 %v243_v11, %v243_v11  ;;  %v252_v16 = vmul.f32 %v244_v12, %v244_v12  ;;  %v253_v17 = vmul.f32 %v245_v13, %v245_v13  ;;  %v254_v19 = vmul.f32 %v246_v14, %v246_v14 }
 0x17b   :  { %v255_v18 = vadd.f32 %v252_v16, %v251_v15 }
 0x17d   :  { %v256_v20 = vadd.f32 %v255_v18, %v253_v17 }
 0x17f   :  { %v257_v21 = vadd.f32 %v256_v20, %v254_v19 }
 0x181   :  { %258 = vadd.xlane.f32.xlu0 %v257_v21 }
 0x20a   :  { %v259_v23 = vpop.xlane.xlu0 %258 }
 0x20b   :  { %v260_v24 = vmul.f32 0.001953125, %v259_v23 }
 0x20d   :  { %v262_v25 = vadd.f32 1e-05, %v260_v24 }
 0x20f   :  { %300 = vrsqrt.f32 %v262_v25 }
 0x21c   :  { %v301_v27 = vpop.eup %300 }
 0x21d   :  { %v264_v28 = vmul.f32 %v301_v27, %v261_v26 }
 0x21f   :  { %267 = vperm.xlu1 %298, %v264_v28  }
 0x223   :  { %277 = vperm.xlu1 %298, %v274_v29  }
 0x29a   :  { %v268_v30 = vpop.permute.xlu1 %267 }
 0x29b   :  { %v270_v31 = vmul.f32 %v268_v30, %v243_v11  ;;  %v271_v32 = vmul.f32 %v268_v30, %v244_v12  ;;  %v272_v33 = vmul.f32 %v268_v30, %v245_v13  ;;  %v273_v34 = vmul.f32 %v268_v30, %v246_v14 }
 0x29e   :  { %v278_v35 = vpop.permute.xlu1 %277 }
 0x29f   :  { %v280_v36 = vadd.f32 %v278_v35, %v270_v31  ;;  %v281_v37 = vadd.f32 %v278_v35, %v271_v32  ;;  %v282_v38 = vadd.f32 %v278_v35, %v272_v33  ;;  %v283_v39 = vadd.f32 %v278_v35, %v273_v34 }
 0x2a1   :  { %v284_v40 = vmax.f32 %v280_v36, 0.0  ;;  %v285_v41 = vmax.f32 %v281_v37, 0.0  ;;  %v286_v42 = vmax.f32 %v282_v38, 0.0  ;;  %v287_v43 = vmax.f32 %v283_v39, 0.0 }
 0x2a3   :  { %288 = vst [vmem:[%s546_s4] sm:$0xff] %v284_v40  ;;  %289 = vst [vmem:[%s546_s4 + $0x8] sm:$0xff] %v285_v41 }
 0x2a4   :  { %290 = vst [vmem:[%s546_s4 + $0x10] sm:$0xff] %v286_v42  ;;  %291 = vst [vmem:[%s546_s4 + $0x18] sm:$0xff] %v287_v43 }

// kernel: vaegan_vae_forward.31
= control target key start
LH: loop header
LB: loop body
LE: loop exit
PB: predicated region body
PF: predicated region fallthrough
CT: control target
= control target key end

     0   :  { %v278_v3 = vmov 0.0   ;;  %s518_s1 = inlined_call_operand.vmem [shape: f32[128,512], index: 1, kind: input, shape index: {}]   ;;  %s519_s0 = inlined_call_operand.vmem [shape: f32[8,128], index: 0, kind: input, shape index: {}]   ;;  %s520_s2 = inlined_call_operand.vmem [shape: f32[8,512], index: 2, kind: input, shape index: {}]   ;;  %s521_s3 = inlined_call_operand.vmem [shape: f32[8,512], index: 3, kind: output, shape index: {}]  }
   0x1   :  { %v76_v0 = vld [vmem:[%s518_s1 + $0x1e8] sm:$0xff]  ;;  %v78_v1 = vld [vmem:[%s518_s1 + $0x1f8] sm:$0xff]  ;;  %v75_v2 = vld [vmem:[%s518_s1 + $0x1e0] sm:$0xff]  ;;  %147 = vmatprep.mubr.f32.mxu0 %v278_v3  ;;  %218 = vmatprep.mubr.f32.mxu1 %v278_v3 }
   0x2   :  { %83 = vmatprep.subr.mxu0 %v76_v0  ;;  %154 = vmatprep.subr.mxu1 %v78_v1  ;;  %v77_v4 = vld [vmem:[%s518_s1 + $0x1f0] sm:$0xff]  ;;  %v72_v5 = vld [vmem:[%s518_s1 + $0x1c8] sm:$0xff]  ;;  %v74_v6 = vld [vmem:[%s518_s1 + $0x1d8] sm:$0xff] }
   0x3   :  { %84 = vmatpush1.msra.mxu0 %v75_v2  ;;  %155 = vmatpush1.msra.mxu1 %v77_v4  ;;  %v71_v7 = vld [vmem:[%s518_s1 + $0x1c0] sm:$0xff]  ;;  %v73_v8 = vld [vmem:[%s518_s1 + $0x1d0] sm:$0xff]  ;;  %v68_v9 = vld [vmem:[%s518_s1 + $0x1a8] sm:$0xff] }
   0x4   :  { %85 = vmatprep.subr.mxu0 %v72_v5  ;;  %156 = vmatprep.subr.mxu1 %v74_v6  ;;  %v70_v10 = vld [vmem:[%s518_s1 + $0x1b8] sm:$0xff]  ;;  %v67_v11 = vld [vmem:[%s518_s1 + $0x1a0] sm:$0xff]  ;;  %v69_v12 = vld [vmem:[%s518_s1 + $0x1b0] sm:$0xff] }
   0x5   :  { %86 = vmatpush1.msra.mxu0 %v71_v7  ;;  %157 = vmatpush1.msra.mxu1 %v73_v8  ;;  %v64_v13 = vld [vmem:[%s518_s1 + $0x188] sm:$0xff]  ;;  %v66_v14 = vld [vmem:[%s518_s1 + $0x198] sm:$0xff]  ;;  %v63_v15 = vld [vmem:[%s518_s1 + $0x180] sm:$0xff] }
   0x6   :  { %87 = vmatprep.subr.mxu0 %v68_v9  ;;  %158 = vmatprep.subr.mxu1 %v70_v10  ;;  %v65_v16 = vld [vmem:[%s518_s1 + $0x190] sm:$0xff]  ;;  %v60_v17 = vld [vmem:[%s518_s1 + $0x168] sm:$0xff]  ;;  %v62_v18 = vld [vmem:[%s518_s1 + $0x178] sm:$0xff] }
   0x7   :  { %88 = vmatpush1.msra.mxu0 %v67_v11  ;;  %159 = vmatpush1.msra.mxu1 %v69_v12  ;;  %v59_v19 = vld [vmem:[%s518_s1 + $0x160] sm:$0xff]  ;;  %v61_v20 = vld [vmem:[%s518_s1 + $0x170] sm:$0xff]  ;;  %v56_v21 = vld [vmem:[%s518_s1 + $0x148] sm:$0xff] }
   0x8   :  { %89 = vmatprep.subr.mxu0 %v64_v13  ;;  %160 = vmatprep.subr.mxu1 %v66_v14  ;;  %v58_v22 = vld [vmem:[%s518_s1 + $0x158] sm:$0xff]  ;;  %v55_v23 = vld [vmem:[%s518_s1 + $0x140] sm:$0xff]  ;;  %v57_v24 = vld [vmem:[%s518_s1 + $0x150] sm:$0xff] }
   0x9   :  { %90 = vmatpush1.msra.mxu0 %v63_v15  ;;  %161 = vmatpush1.msra.mxu1 %v65_v16  ;;  %v52_v25 = vld [vmem:[%s518_s1 + $0x128] sm:$0xff]  ;;  %v54_v26 = vld [vmem:[%s518_s1 + $0x138] sm:$0xff]  ;;  %v51_v27 = vld [vmem:[%s518_s1 + $0x120] sm:$0xff] }
   0xa   :  { %91 = vmatprep.subr.mxu0 %v60_v17  ;;  %162 = vmatprep.subr.mxu1 %v62_v18  ;;  %v53_v28 = vld [vmem:[%s518_s1 + $0x130] sm:$0xff]  ;;  %v48_v29 = vld [vmem:[%s518_s1 + $0x108] sm:$0xff]  ;;  %v50_v30 = vld [vmem:[%s518_s1 + $0x118] sm:$0xff] }
   0xb   :  { %92 = vmatpush1.msra.mxu0 %v59_v19  ;;  %163 = vmatpush1.msra.mxu1 %v61_v20  ;;  %v47_v31 = vld [vmem:[%s518_s1 + $0x100] sm:$0xff]  ;;  %v49_v32 = vld [vmem:[%s518_s1 + $0x110] sm:$0xff]  ;;  %v44_v33 = vld [vmem:[%s518_s1 + $0xe8] sm:$0xff] }
   0xc   :  { %93 = vmatprep.subr.mxu0 %v56_v21  ;;  %164 = vmatprep.subr.mxu1 %v58_v22  ;;  %v46_v34 = vld [vmem:[%s518_s1 + $0xf8] sm:$0xff]  ;;  %v43_v35 = vld [vmem:[%s518_s1 + $0xe0] sm:$0xff]  ;;  %v45_v36 = vld [vmem:[%s518_s1 + $0xf0] sm:$0xff] }
   0xd   :  { %94 = vmatpush1.msra.mxu0 %v55_v23  ;;  %165 = vmatpush1.msra.mxu1 %v57_v24  ;;  %v40_v37 = vld [vmem:[%s518_s1 + $0xc8] sm:$0xff]  ;;  %v42_v38 = vld [vmem:[%s518_s1 + $0xd8] sm:$0xff]  ;;  %v39_v39 = vld [vmem:[%s518_s1 + $0xc0] sm:$0xff] }
   0xe   :  { %95 = vmatprep.subr.mxu0 %v52_v25  ;;  %166 = vmatprep.subr.mxu1 %v54_v26  ;;  %v41_v40 = vld [vmem:[%s518_s1 + $0xd0] sm:$0xff]  ;;  %v36_v41 = vld [vmem:[%s518_s1 + $0xa8] sm:$0xff]  ;;  %v38_v42 = vld [vmem:[%s518_s1 + $0xb8] sm:$0xff] }
   0xf   :  { %96 = vmatpush1.msra.mxu0 %v51_v27  ;;  %167 = vmatpush1.msra.mxu1 %v53_v28  ;;  %v35_v43 = vld [vmem:[%s518_s1 + $0xa0] sm:$0xff]  ;;  %v37_v44 = vld [vmem:[%s518_s1 + $0xb0] sm:$0xff]  ;;  %v32_v45 = vld [vmem:[%s518_s1 + $0x88] sm:$0xff] }
  0x10   :  { %97 = vmatprep.subr.mxu0 %v48_v29  ;;  %168 = vmatprep.subr.mxu1 %v50_v30  ;;  %v34_v46 = vld [vmem:[%s518_s1 + $0x98] sm:$0xff]  ;;  %v31_v47 = vld [vmem:[%s518_s1 + $0x80] sm:$0xff]  ;;  %v33_v48 = vld [vmem:[%s518_s1 + $0x90] sm:$0xff] }
  0x11   :  { %98 = vmatpush1.msra.mxu0 %v47_v31  ;;  %169 = vmatpush1.msra.mxu1 %v49_v32  ;;  %v28_v49 = vld [vmem:[%s518_s1 + $0x68] sm:$0xff]  ;;  %v30_v50 = vld [vmem:[%s518_s1 + $0x78] sm:$0xff]  ;;  %v27_v51 = vld [vmem:[%s518_s1 + $0x60] sm:$0xff] }
  0x12   :  { %99 = vmatprep.subr.mxu0 %v44_v33  ;;  %170 = vmatprep.subr.mxu1 %v46_v34  ;;  %v29_v52 = vld [vmem:[%s518_s1 + $0x70] sm:$0xff]  ;;  %v24_v53 = vld [vmem:[%s518_s1 + $0x48] sm:$0xff]  ;;  %v26_v54 = vld [vmem:[%s518_s1 + $0x58] sm:$0xff] }
  0x13   :  { %100 = vmatpush1.msra.mxu0 %v43_v35  ;;  %171 = vmatpush1.msra.mxu1 %v45_v36  ;;  %v23_v55 = vld [vmem:[%s518_s1 + $0x40] sm:$0xff]  ;;  %v25_v56 = vld [vmem:[%s518_s1 + $0x50] sm:$0xff]  ;;  %v20_v57 = vld [vmem:[%s518_s1 + $0x28] sm:$0xff] }
  0x14   :  { %101 = vmatprep.subr.mxu0 %v40_v37  ;;  %172 = vmatprep.subr.mxu1 %v42_v38  ;;  %v22_v58 = vld [vmem:[%s518_s1 + $0x38] sm:$0xff]  ;;  %v19_v59 = vld [vmem:[%s518_s1 + $0x20] sm:$0xff]  ;;  %v21_v60 = vld [vmem:[%s518_s1 + $0x30] sm:$0xff] }
  0x15   :  { %102 = vmatpush1.msra.mxu0 %v39_v39  ;;  %173 = vmatpush1.msra.mxu1 %v41_v40  ;;  %v16_v61 = vld [vmem:[%s518_s1 + $0x8] sm:$0xff]  ;;  %v18_v62 = vld [vmem:[%s518_s1 + $0x18] sm:$0xff]  ;;  %v15_v63 = vld [vmem:[%s518_s1] sm:$0xff] }
  0x16   :  { %103 = vmatprep.subr.mxu0 %v36_v41  ;;  %174 = vmatprep.subr.mxu1 %v38_v42  ;;  %v17_v0 = vld [vmem:[%s518_s1 + $0x10] sm:$0xff]  ;;  %v14_v1 = vld [vmem:[%s519_s0] sm:$0xff]  ;;  %v80_v6 = vld [vmem:[%s520_s2 + $0x8] sm:$0xff] }
  0x17   :  { %104 = vmatpush1.msra.mxu0 %v35_v43  ;;  %175 = vmatpush1.msra.mxu1 %v37_v44  ;;  %v79_v2 = vld [vmem:[%s520_s2] sm:$0xff]  ;;  %v81_v3 = vld [vmem:[%s520_s2 + $0x10] sm:$0xff]  ;;  %v82_v7 = vld [vmem:[%s520_s2 + $0x18] sm:$0xff] }
  0x18   :  { %105 = vmatprep.subr.mxu0 %v32_v45  ;;  %176 = vmatprep.subr.mxu1 %v34_v46 }
  0x19   :  { %106 = vmatpush1.msra.mxu0 %v31_v47  ;;  %177 = vmatpush1.msra.mxu1 %v33_v48 }
  0x1a   :  { %107 = vmatprep.subr.mxu0 %v28_v49  ;;  %178 = vmatprep.subr.mxu1 %v30_v50 }
  0x1b   :  { %108 = vmatpush1.msra.mxu0 %v27_v51  ;;  %179 = vmatpush1.msra.mxu1 %v29_v52 }
  0x1c   :  { %109 = vmatprep.subr.mxu0 %v24_v53  ;;  %180 = vmatprep.subr.mxu1 %v26_v54 }
  0x1d   :  { %110 = vmatpush1.msra.mxu0 %v23_v55  ;;  %181 = vmatpush1.msra.mxu1 %v25_v56 }
  0x1e   :  { %111 = vmatprep.subr.mxu0 %v20_v57  ;;  %182 = vmatprep.subr.mxu1 %v22_v58 }
  0x1f   :  { %112 = vmatpush1.msra.mxu0 %v19_v59  ;;  %183 = vmatpush1.msra.mxu1 %v21_v60 }
  0x20   :  { %113 = vmatprep.subr.mxu0 %v16_v61  ;;  %184 = vmatprep.subr.mxu1 %v18_v62 }
  0x21   :  { %114 = vmatpush1.msra.mxu0 %v15_v63  ;;  %185 = vmatpush1.msra.mxu1 %v17_v0 }
  0x22   :  { %148 = vmatmul.mubr.f32.vlgmr.msra.gmra.mxu0 %v14_v1  ;;  %219 = vmatmul.mubr.f32.vlgmr.msra.gmra.mxu1 %v14_v1 }
  0xe2   :  { %v149_v4 = vpop.f32.mrf.mxu0  ;;  %v220_v5 = vpop.f32.mrf.mxu1 }
  0xe3   :  { %v150_v8 = vadd.f32 %v149_v4, %v79_v2  ;;  %v221_v9 = vadd.f32 %v220_v5, %v81_v3 }
  0xe4   :  { %v151_v10 = vpop.f32.mrf.mxu0  ;;  %v222_v11 = vpop.f32.mrf.mxu1 }
  0xe5   :  { %v257_v12 = vmul.f32 -1.442695, %v150_v8  ;;  %v259_v13 = vmul.f32 -1.442695, %v221_v9  ;;  %v152_v14 = vadd.f32 %v151_v10, %v80_v6  ;;  %v223_v15 = vadd.f32 %v222_v11, %v82_v7 }
  0xe7   :  { %262 = vpow2.f32 %v257_v12  ;;  %v258_v16 = vmul.f32 -1.442695, %v152_v14  ;;  %v260_v17 = vmul.f32 -1.442695, %v223_v15 }
  0xe8   :  { %264 = vpow2.f32 %v259_v13 }
  0xe9   :  { %266 = vpow2.f32 %v258_v16 }
  0xea   :  { %268 = vpow2.f32 %v260_v17 }
  0xf4   :  { %v263_v18 = vpop.eup %262 }
  0xf5   :  { %v265_v19 = vpop.eup %264  ;;  %v237_v20 = vadd.f32 1.0, %v263_v18 }
  0xf6   :  { %v267_v21 = vpop.eup %266  ;;  %v239_v22 = vadd.f32 1.0, %v265_v19 }
  0xf7   :  { %v269_v23 = vpop.eup %268  ;;  %270 = vrcp.f32 %v237_v20  ;;  %v238_v24 = vadd.f32 1.0, %v267_v21 }
  0xf8   :  { %272 = vrcp.f32 %v239_v22  ;;  %v240_v25 = vadd.f32 1.0, %v269_v23 }
  0xf9   :  { %274 = vrcp.f32 %v238_v24 }
  0xfa   :  { %276 = vrcp.f32 %v240_v25 }
 0x104   :  { %v271_v26 = vpop.eup %270 }
 0x105   :  { %v273_v27 = vpop.eup %272  ;;  %249 = vst [vmem:[%s521_s3] sm:$0xff] %v271_v26 }
 0x106   :  { %v275_v28 = vpop.eup %274  ;;  %251 = vst [vmem:[%s521_s3 + $0x10] sm:$0xff] %v273_v27 }
 0x107   :  { %v277_v29 = vpop.eup %276  ;;  %250 = vst [vmem:[%s521_s3 + $0x8] sm:$0xff] %v275_v28 }
 0x108   :  { %252 = vst [vmem:[%s521_s3 + $0x18] sm:$0xff] %v277_v29 }

// kernel: vaegan_vae_forward.36
= control target key start
LH: loop header
LB: loop body
LE: loop exit
PB: predicated region body
PF: predicated region fallthrough
CT: control target
= control target key end

     0   :  { %v168_v0 = vmov 0.0   ;;  %vm169_vm0 = vmmov 0   ;;  %v170_v3 = vmov 0   ;;  %s248_s1 = inlined_call_operand.vmem [shape: f32[128,128], index: 1, kind: input, shape index: {}]   ;;  %s249_s2 = inlined_call_operand.vmem [shape: f32[8,1], index: 2, kind: input, shape index: {}]   ;;  %s250_s0 = inlined_call_operand.vmem [shape: f32[8,128], index: 0, kind: input, shape index: {}]   ;;  %s251_s3 = inlined_call_operand.vmem [shape: f32[8,128], index: 3, kind: output, shape index: {}]  }
   0x1   :  { %129 = vmatprep.subr.mxu0 %v168_v0  ;;  %v30_v1 = vld [vmem:[%s248_s1 + $0x78] sm:$0xff]  ;;  %v29_v2 = vld [vmem:[%s248_s1 + $0x70] sm:$0xff]  ;;  %161 = vmatprep.mubr.msk.f32.mxu0 %vm169_vm0, %v168_v0  ;;  %v28_v4 = vld [vmem:[%s248_s1 + $0x68] sm:$0xff] }
   0x2   :  { %130 = vmatpush3.msra.mxu0 %v30_v1  ;;  %167 = vset.pattern.permute.xlu0 %v170_v3  ;;  %v27_v5 = vld [vmem:[%s248_s1 + $0x60] sm:$0xff]  ;;  %v26_v7 = vld [vmem:[%s248_s1 + $0x58] sm:$0xff]  ;;  %v25_v8 = vld [vmem:[%s248_s1 + $0x50] sm:$0xff] }
   0x3   :  { %131 = vmatprep.subr.mxu0 %v168_v0  ;;  %v31_v6 = vld [vmem:[%s249_s2] sm:$0xff]  ;;  %v24_v9 = vld [vmem:[%s248_s1 + $0x48] sm:$0xff]  ;;  %v22_v11 = vld [vmem:[%s248_s1 + $0x38] sm:$0xff] }
   0x4   :  { %132 = vmatpush3.msra.mxu0 %v29_v2  ;;  %34 = vperm.xlu0 %167, %v31_v6   ;;  %v23_v10 = vld [vmem:[%s248_s1 + $0x40] sm:$0xff]  ;;  %v21_v12 = vld [vmem:[%s248_s1 + $0x30] sm:$0xff]  ;;  %v20_v13 = vld [vmem:[%s248_s1 + $0x28] sm:$0xff] }
   0x5   :  { %133 = vmatprep.subr.mxu0 %v168_v0  ;;  %v19_v14 = vld [vmem:[%s248_s1 + $0x20] sm:$0xff]  ;;  %v18_v15 = vld [vmem:[%s248_s1 + $0x18] sm:$0xff]  ;;  %v17_v16 = vld [vmem:[%s248_s1 + $0x10] sm:$0xff] }
   0x6   :  { %134 = vmatpush3.msra.mxu0 %v28_v4  ;;  %v16_v17 = vld [vmem:[%s248_s1 + $0x8] sm:$0xff]  ;;  %v15_v18 = vld [vmem:[%s248_s1] sm:$0xff] }
   0x7   :  { %135 = vmatprep.subr.mxu0 %v168_v0  ;;  %v14_v19 = vld [vmem:[%s250_s0] sm:$0xff] }
   0x8   :  { %136 = vmatpush3.msra.mxu0 %v27_v5 }
   0x9   :  { %137 = vmatprep.subr.mxu0 %v168_v0 }
   0xa   :  { %138 = vmatpush3.msra.mxu0 %v26_v7 }
   0xb   :  { %139 = vmatprep.subr.mxu0 %v168_v0 }
   0xc   :  { %140 = vmatpush3.msra.mxu0 %v25_v8 }
   0xd   :  { %141 = vmatprep.subr.mxu0 %v168_v0 }
   0xe   :  { %142 = vmatpush3.msra.mxu0 %v24_v9 }
   0xf   :  { %143 = vmatprep.subr.mxu0 %v168_v0 }
  0x10   :  { %144 = vmatpush3.msra.mxu0 %v23_v10 }
  0x11   :  { %145 = vmatprep.subr.mxu0 %v168_v0 }
  0x12   :  { %146 = vmatpush3.msra.mxu0 %v22_v11 }
  0x13   :  { %147 = vmatprep.subr.mxu0 %v168_v0 }
  0x14   :  { %148 = vmatpush3.msra.mxu0 %v21_v12 }
  0x15   :  { %149 = vmatprep.subr.mxu0 %v168_v0 }
  0x16   :  { %150 = vmatpush3.msra.mxu0 %v20_v13 }
  0x17   :  { %151 = vmatprep.subr.mxu0 %v168_v0 }
  0x18   :  { %152 = vmatpush3.msra.mxu0 %v19_v14 }
  0x19   :  { %153 = vmatprep.subr.mxu0 %v168_v0 }
  0x1a   :  { %154 = vmatpush3.msra.mxu0 %v18_v15 }
  0x1b   :  { %155 = vmatprep.subr.mxu0 %v168_v0 }
  0x1c   :  { %156 = vmatpush3.msra.mxu0 %v17_v16 }
  0x1d   :  { %157 = vmatprep.subr.mxu0 %v168_v0 }
  0x1e   :  { %158 = vmatpush3.msra.mxu0 %v16_v17 }
  0x1f   :  { %159 = vmatprep.subr.mxu0 %v168_v0 }
  0x20   :  { %160 = vmatpush3.msra.mxu0 %v15_v18 }
  0x21   :  { %162 = vmatmul.mubr.f32.vlgmr.msra.gmra.mxu0 %v14_v19 }
  0x7f   :  { %v35_v20 = vpop.permute.xlu0 %34 }
  0xe1   :  { %v103_v21 = vpop.f32.mrf.mxu0 }
  0xe2   :  { %v104_v22 = vadd.f32 %v103_v21, %v35_v20 }
  0xe3   :  { %v163_v23 = vpop.f32.mrf.mxu0 }
  0xe4   :  { %107 = vst [vmem:[%s251_s3] sm:$0xff] %v104_v22 }

// kernel: vaegan_vae_forward.37
= control target key start
LH: loop header
LB: loop body
LE: loop exit
PB: predicated region body
PF: predicated region fallthrough
CT: control target
= control target key end

     0   :  { %s302_s0 = inlined_call_operand.vmem [shape: f32[16,128], index: 0, kind: input, shape index: {}]   ;;  %s303_s1 = inlined_call_operand.vmem [shape: f32[8,512], index: 1, kind: input, shape index: {}]   ;;  %s304_s2 = inlined_call_operand.vmem [shape: f32[8,512], index: 2, kind: input, shape index: {}]   ;;  %s305_s3 = inlined_call_operand.vmem [shape: f32[8,128], index: 3, kind: input, shape index: {}]   ;;  %s306_s4 = inlined_call_operand.vmem [shape: f32[16,128], index: 4, kind: input, shape index: {}]   ;;  %s307_s5 = inlined_call_operand.vmem [shape: f32[3], index: 5, kind: output, shape index: {}]  }
   0x1   :  { %v22_v0 = vld [vmem:[%s302_s0 + $0x8] sm:$0xff]  ;;  %v113_v1 = vld [vmem:[%s305_s3] sm:$0xff]  ;;  %v45_v6 = vld [vmem:[%s303_s1 + $0x10] sm:$0xff] }
   0x2   :  { %v26_v2 = vmul.f32 1.442695, %v22_v0  ;;  %v116_v3 = vsub.f32 0.0, %v113_v1  ;;  %v43_v4 = vld [vmem:[%s303_s1] sm:$0xff]  ;;  %v44_v5 = vld [vmem:[%s303_s1 + $0x8] sm:$0xff]  ;;  %v46_v8 = vld [vmem:[%s303_s1 + $0x18] sm:$0xff] }
   0x3   :  { %v174_v9 = vmul.f32 -1.442695, %v43_v4  ;;  %v175_v11 = vmul.f32 -1.442695, %v44_v5  ;;  %v176_v12 = vmul.f32 -1.442695, %v45_v6 }
   0x4   :  { %187 = vpow2.f32 %v26_v2  ;;  %v118_v7 = vand.u32 2147483647, %v116_v3  ;;  %v177_v13 = vmul.f32 -1.442695, %v46_v8 }
   0x5   :  { %189 = vpow2.f32 %v174_v9 }
   0x6   :  { %v119_v10 = vsub.f32 0.0, %v118_v7 }
   0x7   :  { %10 = vsyncpa [#allocation3], 0  ;;  %191 = vpow2.f32 %v175_v11  ;;  %v21_v15 = vld [vmem:[%s302_s0] sm:$0xff]  ;;  %v23_v16 = vlaneseq  ;;  %v48_v36 = vld [vmem:[%s304_s2 + $0x8] sm:$0xff]  ;;  %v117_v43 = vmax.f32 %v116_v3, 0.0  ;;  %s164_s17 = sshll.u32 %s307_s5, 4  ;;  %s165_s17 = int_to_ptr.vmem [resolvable:$true] %s164_s17 }
   0x8   :  { %v120_v14 = vmul.f32 1.442695, %v119_v10  ;;  %193 = vpow2.f32 %v176_v12  ;;  %v28_v17 = vmul.f32 %v21_v15, %v21_v15  ;;  %v47_v35 = vld [vmem:[%s304_s2] sm:$0xff]  ;;  %v49_v38 = vld [vmem:[%s304_s2 + $0x10] sm:$0xff]  ;;  %v50_v44 = vld [vmem:[%s304_s2 + $0x18] sm:$0xff]  ;;  %s209_s24 = scalar_lea.vmem %s165_s17, 16  ;;  %p214_p1 = scmp.lt.s32.totalorder %s165_s17, %s165_s17 }
   0x9   :  { %v24_v19 = vand.u32 127, %v23_v16  ;;  %v52_v34 = vshrl.u32 %v23_v16, 7  ;;  %v136_v41 = vld [vmem:[%s306_s4] sm:$0xff]  ;;  %v137_v46 = vld [vmem:[%s306_s4 + $0x8] sm:$0xff]  ;;  %p210_p0 = scmp.ne.s32.totalorder %s165_s17, %s209_s24  ;;  %p215_p2 = scmp.lt.s32.totalorder %s209_s24, %s209_s24 }
   0xa   :  { %195 = vpow2.f32 %v120_v14  ;;  %v138_v53 = vmul.f32 %v136_v41, %v136_v41  ;;  %v139_v57 = vmul.f32 %v137_v46, %v137_v46 }
   0xb   :  { %197 = vpow2.f32 %v177_v13  ;;  %vm25_vm0 = vcmp.lt.s32.totalorder %v24_v19, 2  ;;  %vm53_vm1 = vcmp.lt.s32.totalorder %v52_v34, 3  ;;  %vm114_vm2 = vcmp.lt.s32.totalorder %v52_v34, 1  ;;  %p216_p3 = por %p215_p2, %p214_p1 }
   0xc   :  { %vm115_vm3 = vmand %vm114_vm2, %vm25_vm0  ;;  %v140_v2 = vadd.f32 %v139_v57, %v138_v53 }
   0xd   :  { %p217_p4 = pnand %p216_p3, %p210_p0 }
  0x11   :  { %v188_v18 = vpop.eup %187 }
  0x12   :  { %v29_v20 = vadd.f32 %v188_v18, %v28_v17  ;;  %v190_v21 = vpop.eup %189 }
  0x13   :  { %v77_v24 = vadd.f32 1.0, %v190_v21 }
  0x14   :  { %v30_v22 = vsub.f32 %v29_v20, %v22_v0  ;;  %v192_v23 = vpop.eup %191 }
  0x15   :  { %v194_v25 = vpop.eup %193  ;;  %v78_v27 = vadd.f32 1.0, %v192_v23  ;;  %199 = vrcp.f32 %v77_v24 }
  0x16   :  { %v173_v26 = vadd.f32 -1.0, %v30_v22  ;;  %v79_v29 = vadd.f32 1.0, %v194_v25 }
  0x17   :  { %v196_v28 = vpop.eup %195  ;;  %201 = vrcp.f32 %v78_v27 }
  0x18   :  { %v198_v30 = vpop.eup %197  ;;  %v32_v31 = vsel %vm25_vm0, %v173_v26, 0.0  ;;  %v122_v32 = vadd.f32 1.0, %v196_v28  ;;  %203 = vrcp.f32 %v79_v29 }
  0x19   :  { %33 = vadd.xlane.f32.xlu0 %v32_v31  ;;  %v80_v33 = vadd.f32 1.0, %v198_v30 }
  0x1a   :  { %205 = vlog2.f32 %v122_v32 }
  0x1b   :  { %207 = vrcp.f32 %v80_v33 }
  0x22   :  { %v200_v37 = vpop.eup %199 }
  0x23   :  { %v89_v40 = vsub.f32 %v200_v37, %v47_v35 }
  0x24   :  { %v202_v39 = vpop.eup %201 }
  0x25   :  { %v204_v42 = vpop.eup %203  ;;  %v90_v45 = vsub.f32 %v202_v39, %v48_v36  ;;  %v93_v49 = vmul.f32 %v89_v40, %v89_v40 }
  0x26   :  { %v91_v48 = vsub.f32 %v204_v42, %v49_v38 }
  0x27   :  { %v206_v47 = vpop.eup %205  ;;  %v94_v52 = vmul.f32 %v90_v45, %v90_v45  ;;  %v97_v56 = vsel %vm53_vm1, %v93_v49, 0.0 }
  0x28   :  { %v208_v50 = vpop.eup %207  ;;  %v124_v51 = vmul.f32 0.6931472, %v206_v47  ;;  %v95_v55 = vmul.f32 %v91_v48, %v91_v48 }
  0x29   :  { %v92_v54 = vsub.f32 %v208_v50, %v50_v44  ;;  %v98_v59 = vsel %vm53_vm1, %v94_v52, 0.0 }
  0x2a   :  { %v125_v58 = vadd.f32 %v124_v51, %v117_v43  ;;  %v99_v61 = vsel %vm53_vm1, %v95_v55, 0.0  ;;  %v101_v62 = vadd.f32 %v98_v59, %v97_v56 }
  0x2b   :  { %v96_v60 = vmul.f32 %v92_v54, %v92_v54 }
  0x2c   :  { %v126_v63 = vsel %vm115_vm3, %v125_v58, 0.0  ;;  %v102_v1 = vadd.f32 %v101_v62, %v99_v61 }
  0x2d   :  { %127 = vadd.xlane.f32.xlu1 %v126_v63  ;;  %v100_v0 = vsel %vm53_vm1, %v96_v60, 0.0 }
  0x2e   :  { %v103_v3 = vadd.f32 %v102_v1, %v100_v0 }
  0x30   :  { %104 = vadd.xlane.f32.xlu0 %v103_v3 }
  0x31   :  { %141 = vadd.xlane.f32.xlu1 %v140_v2 }
  0xa2   :  { %v34_v4 = vpop.xlane.xlu0 %33 }
  0xa3   :  { %v35_v5 = vrot.slane %v34_v4, 4 }
  0xa5   :  { %v36_v6 = vadd.f32 %v35_v5, %v34_v4 }
  0xa7   :  { %v37_v7 = vrot.slane %v36_v6, 2 }
  0xa9   :  { %v38_v8 = vadd.f32 %v37_v7, %v36_v6 }
  0xab   :  { %v39_v9 = vrot.slane %v38_v8, 1 }
  0xad   :  { %v40_v10 = vadd.f32 %v39_v9, %v38_v8 }
  0xaf   :  { %178 = vpush %v40_v10 }
  0xb6   :  { %v128_v11 = vpop.xlane.xlu1 %127 }
  0xb7   :  { %v129_v12 = vrot.slane %v128_v11, 4 }
  0xb9   :  { %v130_v13 = vadd.f32 %v129_v12, %v128_v11  ;;  %v105_v14 = vpop.xlane.xlu0 %104 }
  0xba   :  { %v142_v15 = vpop.xlane.xlu1 %141  ;;  %v106_v17 = vrot.slane %v105_v14, 4 }
  0xbb   :  { %v131_v16 = vrot.slane %v130_v13, 2  ;;  %v143_v18 = vrot.slane %v142_v15, 4 }
  0xbc   :  { %v107_v19 = vadd.f32 %v106_v17, %v105_v14 }
  0xbd   :  { %v144_v20 = vadd.f32 %v143_v18, %v142_v15  ;;  %v132_v21 = vadd.f32 %v131_v16, %v130_v13 }
  0xbe   :  { %v108_v22 = vrot.slane %v107_v19, 2 }
  0xbf   :  { %v145_v23 = vrot.slane %v144_v20, 2  ;;  %v133_v24 = vrot.slane %v132_v21, 1 }
  0xc0   :  { %v109_v25 = vadd.f32 %v108_v22, %v107_v19 }
  0xc1   :  { %v146_v26 = vadd.f32 %v145_v23, %v144_v20  ;;  %v134_v29 = vadd.f32 %v133_v24, %v132_v21 }
  0xc2   :  { %v110_v27 = vrot.slane %v109_v25, 1 }
  0xc3   :  { %v147_v28 = vrot.slane %v146_v26, 1 }
  0xc4   :  { %v111_v30 = vadd.f32 %v110_v27, %v109_v25 }
  0xc5   :  { %v148_v31 = vadd.f32 %v147_v28, %v146_v26 }
  0xc6   :  { %180 = vpush %v111_v30 }
  0xc7   :  { %182 = vpush %v134_v29 }
  0xc8   :  { %184 = vpush %v148_v31 }
  0xe0   :  { %s179_s2 = spop %178 }
  0xe1   :  { %s42_s18 = smul.f32 0.5, %s179_s2 }
  0xf7   :  { %s181_s19 = spop %180 }
  0xf8   :  { %s150_s20 = sadd.f32 %s181_s19, %s42_s18  ;;  %s183_s21 = spop %182 }
  0xf9   :  { %154 = sst [smem:[#allocation2 + $0x1]] %s183_s21  ;;  %s185_s22 = spop %184 }
  0xfa   :  { %152 = sst [smem:[#allocation2]] %s150_s20  ;;  %s155_s23 = smul.f32 0.0005, %s185_s22 }
  0xfc   :  { %157 = sst [smem:[#allocation2 + $0x2]] %s155_s23 }
  0xfd   :  { %220 = shalt.err (!%p217_p4)
}
  0xfe   :  { %s223_s25 = smov [#allocation2]  }
  0xff   :  { %167 = dma.smem_to_vmem %s223_s25, 16, %s165_s17, [#allocation3]  }
 0x100   :  { %221 = dma.done.wait [#allocation3], 16  }
 0x101   :  { %222 = vsyncadd [#allocation3], 4294967280 }
 0x102   :  { %171 = sfence }
 0x103   :  { %172 = vsyncpa [#allocation3], 1 }

</bundles_post_ra>
